<compile_context>
chip_gen: v7x
topology: tpu7x:2x2x1
jax: 0.10.0
libtpu: 0.0.40
codegen_flags: <defaults>
</compile_context>

<pallas_src>
import functools

import jax
import jax.numpy as jnp
from jax.experimental import pallas as pl
from jax.experimental.pallas import tpu as pltpu

EPS = 1e-6
_SQRT1_2 = 0.7071067811865476


def _rmsnorm(x, g):
    # fp32 statistics regardless of matmul compute dtype
    ms = jnp.mean(x * x, axis=-1, keepdims=True)
    return x * jax.lax.rsqrt(ms + EPS) * g


def _erf_poly(x):
    # Abramowitz & Stegun 7.1.26, max abs err ~1.5e-7; uses only mul/add/exp/div.
    a1, a2, a3, a4, a5 = (0.254829592, -0.284496736, 1.421413741,
                          -1.453152027, 1.061405429)
    p = 0.3275911
    ax = jnp.abs(x)
    t = 1.0 / (1.0 + p * ax)
    poly = ((((a5 * t + a4) * t + a3) * t + a2) * t + a1) * t
    y = 1.0 - poly * jnp.exp(-ax * ax)
    return jnp.where(x < 0, -y, y)


def _gelu_exact(x):
    # erf-based GELU, matching PyTorch nn.GELU() default (approximate='none')
    return 0.5 * x * (1.0 + _erf_poly(x * _SQRT1_2))


# ---------------------------------------------------------------------------
# One fused kernel: out = h + MoE(RMSNorm(h)), h = x + MHA(RMSNorm(x))
# Processes one (batch_tile, S, D) activation block per grid step.
# ---------------------------------------------------------------------------
def moe_encoder_kernel(x_ref, attn_g_ref, wqkv_ref, bqkv_ref, wo_ref, bo_ref,
                       ffn_g_ref, wg_ref, bg_ref, w1_ref, b1_ref, w2_ref, b2_ref,
                       o_ref, *, num_heads, compute_dtype):
    Bt, S, D = x_ref.shape
    hd = D // num_heads
    num_experts = w1_ref.shape[0]
    scale = 1.0 / (float(hd) ** 0.5)

    # Fold batch tile + sequence into the MXU M dimension.
    x = x_ref[...].reshape(Bt * S, D)                     # (M, D) fp32

    # ---------------- MHA sub-block ----------------
    xn = _rmsnorm(x, attn_g_ref[...])
    xn_c = xn.astype(compute_dtype)
    qkv = jnp.dot(xn_c, wqkv_ref[...].astype(compute_dtype),
                  preferred_element_type=jnp.float32) + bqkv_ref[...]   # (M, 3D)
    q = qkv[:, 0 * D:1 * D]
    k = qkv[:, 1 * D:2 * D]
    v = qkv[:, 2 * D:3 * D]

    attn_rows = []
    for b in range(Bt):                                   # static loops: no transposes
        r0 = b * S
        q_b = q[r0:r0 + S]
        k_b = k[r0:r0 + S]
        v_b = v[r0:r0 + S]
        head_outs = []
        for h_i in range(num_heads):
            c0 = h_i * hd
            q_h = q_b[:, c0:c0 + hd].astype(compute_dtype)
            k_h = k_b[:, c0:c0 + hd].astype(compute_dtype)
            v_h = v_b[:, c0:c0 + hd].astype(compute_dtype)
            s = jnp.einsum('qd,kd->qk', q_h, k_h,
                           preferred_element_type=jnp.float32) * scale
            s = s - jnp.max(s, axis=-1, keepdims=True)
            p = jnp.exp(s)
            p = p * pl.reciprocal(jnp.sum(p, axis=-1, keepdims=True), approx=True)
            head_outs.append(jnp.dot(p.astype(compute_dtype), v_h,
                                     preferred_element_type=jnp.float32))
        attn_rows.append(jnp.concatenate(head_outs, axis=-1))     # (S, D)
    o = jnp.concatenate(attn_rows, axis=0)                        # (M, D)

    attn_out = jnp.dot(o.astype(compute_dtype), wo_ref[...].astype(compute_dtype),
                       preferred_element_type=jnp.float32) + bo_ref[...]
    h = x + attn_out                                              # fp32 residual

    # ---------------- MoE FFN sub-block ----------------
    hn = _rmsnorm(h, ffn_g_ref[...])
    hn_c = hn.astype(compute_dtype)

    # Router: dense softmax over experts (fp32, tiny matmul).
    logits = jnp.dot(hn, wg_ref[...], preferred_element_type=jnp.float32) + bg_ref[...]
    logits = logits - jnp.max(logits, axis=-1, keepdims=True)
    gates = jnp.exp(logits)
    gates = gates * pl.reciprocal(jnp.sum(gates, axis=-1, keepdims=True), approx=True)

    # Per-expert gate-scaled accumulation (no (E,S,D) temp, no gates.T).
    moe_out = jnp.zeros_like(h)
    for e in range(num_experts):
        h1 = jnp.dot(hn_c, w1_ref[e].astype(compute_dtype),
                     preferred_element_type=jnp.float32) + b1_ref[e]
        a = _gelu_exact(h1)
        h2 = jnp.dot(a.astype(compute_dtype), w2_ref[e].astype(compute_dtype),
                     preferred_element_type=jnp.float32) + b2_ref[e]
        moe_out = moe_out + gates[:, e:e + 1] * h2

    o_ref[...] = (h + moe_out).reshape(Bt, S, D).astype(o_ref.dtype)


# ---------------------------------------------------------------------------
# Wrapper
# ---------------------------------------------------------------------------
def moe_encoder_block(x, params, *, num_heads, batch_tile=None,
                      compute_dtype=jnp.float32):
    B, S, D = x.shape
    E, _, F = params['w1'].shape
    if batch_tile is None:
        batch_tile = B
    assert B % batch_tile == 0
    assert D % num_heads == 0

    def rep(shape):
        zeros = (0,) * len(shape)
        return pl.BlockSpec(shape, lambda b, _z=zeros: _z)   # full-array, replicated

    in_specs = [
        pl.BlockSpec((batch_tile, S, D), lambda b: (b, 0, 0)),   # x
        rep((1, D)),          # attn_norm_g
        rep((D, 3 * D)),      # wqkv
        rep((1, 3 * D)),      # bqkv
        rep((D, D)),          # wo
        rep((1, D)),          # bo
        rep((1, D)),          # ffn_norm_g
        rep((D, E)),          # wg
        rep((1, E)),          # bg
        rep((E, D, F)),       # w1
        rep((E, 1, F)),       # b1
        rep((E, F, D)),       # w2
        rep((E, 1, D)),       # b2
    ]

    return pl.pallas_call(
        functools.partial(moe_encoder_kernel, num_heads=num_heads,
                          compute_dtype=compute_dtype),
        out_shape=jax.ShapeDtypeStruct((B, S, D), x.dtype),
        grid=(B // batch_tile,),
        in_specs=in_specs,
        out_specs=pl.BlockSpec((batch_tile, S, D), lambda b: (b, 0, 0)),
        compiler_params=pltpu.CompilerParams(
            dimension_semantics=("parallel",),
            vmem_limit_bytes=64 * 1024 * 1024),
    )(x, params['attn_norm_g'], params['wqkv'], params['bqkv'],
      params['wo'], params['bo'], params['ffn_norm_g'],
      params['wg'], params['bg'], params['w1'], params['b1'],
      params['w2'], params['b2'])


# ---------------------------------------------------------------------------
# Pure-JAX reference (same math, no Pallas) for correctness.
# ---------------------------------------------------------------------------
def reference(x, params, *, num_heads):
    B, S, D = x.shape
    hd = D // num_heads

    xn = _rmsnorm(x, params['attn_norm_g'])
    qkv = xn @ params['wqkv'] + params['bqkv']
    q, k, v = qkv[..., :D], qkv[..., D:2 * D], qkv[..., 2 * D:]
    q = q.reshape(B, S, num_heads, hd).transpose(0, 2, 1, 3)
    k = k.reshape(B, S, num_heads, hd).transpose(0, 2, 1, 3)
    v = v.reshape(B, S, num_heads, hd).transpose(0, 2, 1, 3)
    s = jnp.einsum('bhqd,bhkd->bhqk', q, k) / (hd ** 0.5)
    p = jax.nn.softmax(s, axis=-1)
    o = jnp.einsum('bhqk,bhkd->bhqd', p, v).transpose(0, 2, 1, 3).reshape(B, S, D)
    h = x + (o @ params['wo'] + params['bo'])

    hn = _rmsnorm(h, params['ffn_norm_g'])
    gates = jax.nn.softmax(hn @ params['wg'] + params['bg'], axis=-1)        # (B,S,E)
    h1 = jnp.einsum('bsd,edf->besf', hn, params['w1']) + params['b1'][None]
    h2 = jnp.einsum('besf,efd->besd', jax.nn.gelu(h1, approximate=False),
                    params['w2']) + params['b2'][None]
    moe = jnp.einsum('bse,besd->bsd', gates, h2)
    return h + moe


if __name__ == "__main__":
    B, S, D = 4, 16, 128         # lane-dense feature dim (multiple of 128)
    H, E, F = 4, 4, 256
    Bt = 2                       # batch tile -> M = Bt*S rows per matmul

    key = jax.random.PRNGKey(0)
    ks = jax.random.split(key, 12)

    def nrm(k, shape, std=0.02):
        return (std * jax.random.normal(k, shape)).astype(jnp.float32)

    params = {
        'attn_norm_g': (1.0 + 0.1 * jax.random.normal(ks[0], (1, D))).astype(jnp.float32),
        'wqkv': nrm(ks[1], (D, 3 * D)),
        'bqkv': nrm(ks[2], (1, 3 * D)),
        'wo': nrm(ks[3], (D, D)),
        'bo': nrm(ks[4], (1, D)),
        'ffn_norm_g': (1.0 + 0.1 * jax.random.normal(ks[5], (1, D))).astype(jnp.float32),
        'wg': nrm(ks[6], (D, E)),
        'bg': nrm(ks[7], (1, E)),
        'w1': nrm(ks[8], (E, D, F)),
        'b1': nrm(ks[9], (E, 1, F)),
        'w2': nrm(ks[10], (E, F, D)),
        'b2': nrm(ks[11], (E, 1, D)),
    }

    x = jax.random.normal(jax.random.PRNGKey(1), (B, S, D), dtype=jnp.float32)

    ref = jax.block_until_ready(reference(x, params, num_heads=H))

    # fp32 compute path
    out_f32 = jax.block_until_ready(
        moe_encoder_block(x, params, num_heads=H, batch_tile=Bt,
                          compute_dtype=jnp.float32))
    assert out_f32.shape == (B, S, D)
    assert jnp.allclose(out_f32, ref, atol=2e-3, rtol=2e-3), "fp32 Pallas output mismatch"

    # bf16 matmuls with fp32 accumulation (recommended production path)
    out_bf16 = jax.block_until_ready(
        moe_encoder_block(x, params, num_heads=H, batch_tile=Bt,
                          compute_dtype=jnp.bfloat16))
    assert out_bf16.shape == (B, S, D)
    assert jnp.allclose(out_bf16, ref, atol=5e-2, rtol=5e-2), "bf16 Pallas output mismatch"

    print("KERNEL_OK")
</pallas_src>

<mosaic_0001>
module attributes {stable_mosaic.version = 11 : i64} {
  func.func @moe_encoder_kernel(%arg0: i32, %arg1: memref<2x16x128xf32, #tpu.memory_space<vmem>>, %arg2: memref<1x128xf32, #tpu.memory_space<vmem>>, %arg3: memref<128x384xf32, #tpu.memory_space<vmem>>, %arg4: memref<1x384xf32, #tpu.memory_space<vmem>>, %arg5: memref<128x128xf32, #tpu.memory_space<vmem>>, %arg6: memref<1x128xf32, #tpu.memory_space<vmem>>, %arg7: memref<1x128xf32, #tpu.memory_space<vmem>>, %arg8: memref<128x4xf32, #tpu.memory_space<vmem>>, %arg9: memref<1x4xf32, #tpu.memory_space<vmem>>, %arg10: memref<4x128x256xf32, #tpu.memory_space<vmem>>, %arg11: memref<4x1x256xf32, #tpu.memory_space<vmem>>, %arg12: memref<4x256x128xf32, #tpu.memory_space<vmem>>, %arg13: memref<4x1x128xf32, #tpu.memory_space<vmem>>, %arg14: memref<2x16x128xf32, #tpu.memory_space<vmem>>) attributes {dimension_semantics = [#tpu.dimension_semantics<parallel>], iteration_bounds = array<i64: 2>, scalar_prefetch = 0 : i64, scratch_operands = 0 : i64, tpu.core_type = #tpu.core_type<tc>, window_params = [{transform_indices = @transform_0, window_bounds = array<i64: 2, 16, 128>}, {pipeline_mode = #tpu.pipeline_mode<synchronous>, transform_indices = @transform_1, window_bounds = array<i64: 1, 128>}, {pipeline_mode = #tpu.pipeline_mode<synchronous>, transform_indices = @transform_2, window_bounds = array<i64: 128, 384>}, {pipeline_mode = #tpu.pipeline_mode<synchronous>, transform_indices = @transform_3, window_bounds = array<i64: 1, 384>}, {pipeline_mode = #tpu.pipeline_mode<synchronous>, transform_indices = @transform_4, window_bounds = array<i64: 128, 128>}, {pipeline_mode = #tpu.pipeline_mode<synchronous>, transform_indices = @transform_5, window_bounds = array<i64: 1, 128>}, {pipeline_mode = #tpu.pipeline_mode<synchronous>, transform_indices = @transform_6, window_bounds = array<i64: 1, 128>}, {pipeline_mode = #tpu.pipeline_mode<synchronous>, transform_indices = @transform_7, window_bounds = array<i64: 128, 4>}, {pipeline_mode = #tpu.pipeline_mode<synchronous>, transform_indices = @transform_8, window_bounds = array<i64: 1, 4>}, {pipeline_mode = #tpu.pipeline_mode<synchronous>, transform_indices = @transform_9, window_bounds = array<i64: 4, 128, 256>}, {pipeline_mode = #tpu.pipeline_mode<synchronous>, transform_indices = @transform_10, window_bounds = array<i64: 4, 1, 256>}, {pipeline_mode = #tpu.pipeline_mode<synchronous>, transform_indices = @transform_11, window_bounds = array<i64: 4, 256, 128>}, {pipeline_mode = #tpu.pipeline_mode<synchronous>, transform_indices = @transform_12, window_bounds = array<i64: 4, 1, 128>}, {transform_indices = @transform_13, window_bounds = array<i64: 2, 16, 128>}]} {
    %c0 = arith.constant 0 : index
    %c0_0 = arith.constant 0 : index
    %c0_1 = arith.constant 0 : index
    %0 = vector.load %arg1[%c0, %c0_0, %c0_1] : memref<2x16x128xf32, #tpu.memory_space<vmem>>, vector<2x16x128xf32>
    %1 = vector.shape_cast %0 : vector<2x16x128xf32> to vector<32x128xf32>
    %c0_2 = arith.constant 0 : index
    %c0_3 = arith.constant 0 : index
    %2 = vector.load %arg2[%c0_2, %c0_3] : memref<1x128xf32, #tpu.memory_space<vmem>>, vector<1x128xf32>
    %3 = arith.mulf %1, %1 : vector<32x128xf32>
    %cst = arith.constant dense<0.000000e+00> : vector<32xf32>
    %4 = vector.multi_reduction <add>, %3, %cst [1] : vector<32x128xf32> to vector<32xf32>
    %5 = vector.shape_cast %4 : vector<32xf32> to vector<32x1xf32>
    %cst_4 = arith.constant 1.280000e+02 : f32
    %6 = vector.broadcast %cst_4 : f32 to vector<32x1xf32>
    %7 = arith.divf %5, %6 : vector<32x1xf32>
    %cst_5 = arith.constant 9.99999997E-7 : f32
    %8 = vector.broadcast %cst_5 : f32 to vector<32x1xf32>
    %9 = arith.addf %7, %8 : vector<32x1xf32>
    %10 = math.rsqrt %9 : vector<32x1xf32>
    %11 = vector.broadcast %10 : vector<32x1xf32> to vector<32x128xf32>
    %12 = arith.mulf %1, %11 : vector<32x128xf32>
    %13 = vector.broadcast %2 : vector<1x128xf32> to vector<32x128xf32>
    %14 = arith.mulf %12, %13 : vector<32x128xf32>
    %c0_6 = arith.constant 0 : index
    %c0_7 = arith.constant 0 : index
    %15 = vector.load %arg3[%c0_6, %c0_7] : memref<128x384xf32, #tpu.memory_space<vmem>>, vector<128x384xf32>
    %cst_8 = arith.constant dense<0.000000e+00> : vector<32x384xf32>
    %16 = tpu.matmul %14, %15, %cst_8 {dimension_numbers = #tpu.dot_dimension_numbers<[1], [0], [0], [1], [0, 0, 1, 1], [], []>} : vector<32x128xf32>, vector<128x384xf32>, vector<32x384xf32> -> vector<32x384xf32>
    %c0_9 = arith.constant 0 : index
    %c0_10 = arith.constant 0 : index
    %17 = vector.load %arg4[%c0_9, %c0_10] : memref<1x384xf32, #tpu.memory_space<vmem>>, vector<1x384xf32>
    %18 = vector.broadcast %17 : vector<1x384xf32> to vector<32x384xf32>
    %19 = arith.addf %16, %18 : vector<32x384xf32>
    %20 = vector.extract_strided_slice %19 {offsets = [0, 0], sizes = [32, 128], strides = [1, 1]} : vector<32x384xf32> to vector<32x128xf32>
    %21 = vector.extract_strided_slice %19 {offsets = [0, 128], sizes = [32, 128], strides = [1, 1]} : vector<32x384xf32> to vector<32x128xf32>
    %22 = vector.extract_strided_slice %19 {offsets = [0, 256], sizes = [32, 128], strides = [1, 1]} : vector<32x384xf32> to vector<32x128xf32>
    %23 = vector.extract_strided_slice %20 {offsets = [0, 0], sizes = [16, 128], strides = [1, 1]} : vector<32x128xf32> to vector<16x128xf32>
    %24 = vector.extract_strided_slice %21 {offsets = [0, 0], sizes = [16, 128], strides = [1, 1]} : vector<32x128xf32> to vector<16x128xf32>
    %25 = vector.extract_strided_slice %22 {offsets = [0, 0], sizes = [16, 128], strides = [1, 1]} : vector<32x128xf32> to vector<16x128xf32>
    %26 = vector.extract_strided_slice %23 {offsets = [0, 0], sizes = [16, 32], strides = [1, 1]} : vector<16x128xf32> to vector<16x32xf32>
    %27 = vector.extract_strided_slice %24 {offsets = [0, 0], sizes = [16, 32], strides = [1, 1]} : vector<16x128xf32> to vector<16x32xf32>
    %28 = vector.extract_strided_slice %25 {offsets = [0, 0], sizes = [16, 32], strides = [1, 1]} : vector<16x128xf32> to vector<16x32xf32>
    "tpu.trace_start"() <{level = 10 : i32, message = "qd,kd->qk"}> : () -> ()
    %cst_11 = arith.constant dense<0.000000e+00> : vector<16x16xf32>
    %29 = tpu.matmul %26, %27, %cst_11 {dimension_numbers = #tpu.dot_dimension_numbers<[1], [1], [0], [0], [0, 0, 1, 0], [], []>} : vector<16x32xf32>, vector<16x32xf32>, vector<16x16xf32> -> vector<16x16xf32>
    "tpu.trace_stop"() : () -> ()
    %cst_12 = arith.constant 0.176776692 : f32
    %30 = vector.broadcast %cst_12 : f32 to vector<16x16xf32>
    %31 = arith.mulf %29, %30 : vector<16x16xf32>
    %cst_13 = arith.constant dense<0xFF800000> : vector<16xf32>
    %32 = vector.multi_reduction <maximumf>, %31, %cst_13 [1] : vector<16x16xf32> to vector<16xf32>
    %33 = vector.shape_cast %32 : vector<16xf32> to vector<16x1xf32>
    %34 = vector.broadcast %33 : vector<16x1xf32> to vector<16x16xf32>
    %35 = arith.subf %31, %34 : vector<16x16xf32>
    %36 = math.exp %35 : vector<16x16xf32>
    %cst_14 = arith.constant dense<0.000000e+00> : vector<16xf32>
    %37 = vector.multi_reduction <add>, %36, %cst_14 [1] : vector<16x16xf32> to vector<16xf32>
    %38 = vector.shape_cast %37 : vector<16xf32> to vector<16x1xf32>
    %39 = tpu.reciprocal %38 {approx = true} : vector<16x1xf32> -> vector<16x1xf32>
    %40 = vector.broadcast %39 : vector<16x1xf32> to vector<16x16xf32>
    %41 = arith.mulf %36, %40 : vector<16x16xf32>
    %cst_15 = arith.constant dense<0.000000e+00> : vector<16x32xf32>
    %42 = tpu.matmul %41, %28, %cst_15 {dimension_numbers = #tpu.dot_dimension_numbers<[1], [0], [0], [1], [0, 0, 1, 1], [], []>} : vector<16x16xf32>, vector<16x32xf32>, vector<16x32xf32> -> vector<16x32xf32>
    %43 = vector.extract_strided_slice %23 {offsets = [0, 32], sizes = [16, 32], strides = [1, 1]} : vector<16x128xf32> to vector<16x32xf32>
    %44 = vector.extract_strided_slice %24 {offsets = [0, 32], sizes = [16, 32], strides = [1, 1]} : vector<16x128xf32> to vector<16x32xf32>
    %45 = vector.extract_strided_slice %25 {offsets = [0, 32], sizes = [16, 32], strides = [1, 1]} : vector<16x128xf32> to vector<16x32xf32>
    "tpu.trace_start"() <{level = 10 : i32, message = "qd,kd->qk"}> : () -> ()
    %cst_16 = arith.constant dense<0.000000e+00> : vector<16x16xf32>
    %46 = tpu.matmul %43, %44, %cst_16 {dimension_numbers = #tpu.dot_dimension_numbers<[1], [1], [0], [0], [0, 0, 1, 0], [], []>} : vector<16x32xf32>, vector<16x32xf32>, vector<16x16xf32> -> vector<16x16xf32>
    "tpu.trace_stop"() : () -> ()
    %cst_17 = arith.constant 0.176776692 : f32
    %47 = vector.broadcast %cst_17 : f32 to vector<16x16xf32>
    %48 = arith.mulf %46, %47 : vector<16x16xf32>
    %cst_18 = arith.constant dense<0xFF800000> : vector<16xf32>
    %49 = vector.multi_reduction <maximumf>, %48, %cst_18 [1] : vector<16x16xf32> to vector<16xf32>
    %50 = vector.shape_cast %49 : vector<16xf32> to vector<16x1xf32>
    %51 = vector.broadcast %50 : vector<16x1xf32> to vector<16x16xf32>
    %52 = arith.subf %48, %51 : vector<16x16xf32>
    %53 = math.exp %52 : vector<16x16xf32>
    %cst_19 = arith.constant dense<0.000000e+00> : vector<16xf32>
    %54 = vector.multi_reduction <add>, %53, %cst_19 [1] : vector<16x16xf32> to vector<16xf32>
    %55 = vector.shape_cast %54 : vector<16xf32> to vector<16x1xf32>
    %56 = tpu.reciprocal %55 {approx = true} : vector<16x1xf32> -> vector<16x1xf32>
    %57 = vector.broadcast %56 : vector<16x1xf32> to vector<16x16xf32>
    %58 = arith.mulf %53, %57 : vector<16x16xf32>
    %cst_20 = arith.constant dense<0.000000e+00> : vector<16x32xf32>
    %59 = tpu.matmul %58, %45, %cst_20 {dimension_numbers = #tpu.dot_dimension_numbers<[1], [0], [0], [1], [0, 0, 1, 1], [], []>} : vector<16x16xf32>, vector<16x32xf32>, vector<16x32xf32> -> vector<16x32xf32>
    %60 = vector.extract_strided_slice %23 {offsets = [0, 64], sizes = [16, 32], strides = [1, 1]} : vector<16x128xf32> to vector<16x32xf32>
    %61 = vector.extract_strided_slice %24 {offsets = [0, 64], sizes = [16, 32], strides = [1, 1]} : vector<16x128xf32> to vector<16x32xf32>
    %62 = vector.extract_strided_slice %25 {offsets = [0, 64], sizes = [16, 32], strides = [1, 1]} : vector<16x128xf32> to vector<16x32xf32>
    "tpu.trace_start"() <{level = 10 : i32, message = "qd,kd->qk"}> : () -> ()
    %cst_21 = arith.constant dense<0.000000e+00> : vector<16x16xf32>
    %63 = tpu.matmul %60, %61, %cst_21 {dimension_numbers = #tpu.dot_dimension_numbers<[1], [1], [0], [0], [0, 0, 1, 0], [], []>} : vector<16x32xf32>, vector<16x32xf32>, vector<16x16xf32> -> vector<16x16xf32>
    "tpu.trace_stop"() : () -> ()
    %cst_22 = arith.constant 0.176776692 : f32
    %64 = vector.broadcast %cst_22 : f32 to vector<16x16xf32>
    %65 = arith.mulf %63, %64 : vector<16x16xf32>
    %cst_23 = arith.constant dense<0xFF800000> : vector<16xf32>
    %66 = vector.multi_reduction <maximumf>, %65, %cst_23 [1] : vector<16x16xf32> to vector<16xf32>
    %67 = vector.shape_cast %66 : vector<16xf32> to vector<16x1xf32>
    %68 = vector.broadcast %67 : vector<16x1xf32> to vector<16x16xf32>
    %69 = arith.subf %65, %68 : vector<16x16xf32>
    %70 = math.exp %69 : vector<16x16xf32>
    %cst_24 = arith.constant dense<0.000000e+00> : vector<16xf32>
    %71 = vector.multi_reduction <add>, %70, %cst_24 [1] : vector<16x16xf32> to vector<16xf32>
    %72 = vector.shape_cast %71 : vector<16xf32> to vector<16x1xf32>
    %73 = tpu.reciprocal %72 {approx = true} : vector<16x1xf32> -> vector<16x1xf32>
    %74 = vector.broadcast %73 : vector<16x1xf32> to vector<16x16xf32>
    %75 = arith.mulf %70, %74 : vector<16x16xf32>
    %cst_25 = arith.constant dense<0.000000e+00> : vector<16x32xf32>
    %76 = tpu.matmul %75, %62, %cst_25 {dimension_numbers = #tpu.dot_dimension_numbers<[1], [0], [0], [1], [0, 0, 1, 1], [], []>} : vector<16x16xf32>, vector<16x32xf32>, vector<16x32xf32> -> vector<16x32xf32>
    %77 = vector.extract_strided_slice %23 {offsets = [0, 96], sizes = [16, 32], strides = [1, 1]} : vector<16x128xf32> to vector<16x32xf32>
    %78 = vector.extract_strided_slice %24 {offsets = [0, 96], sizes = [16, 32], strides = [1, 1]} : vector<16x128xf32> to vector<16x32xf32>
    %79 = vector.extract_strided_slice %25 {offsets = [0, 96], sizes = [16, 32], strides = [1, 1]} : vector<16x128xf32> to vector<16x32xf32>
    "tpu.trace_start"() <{level = 10 : i32, message = "qd,kd->qk"}> : () -> ()
    %cst_26 = arith.constant dense<0.000000e+00> : vector<16x16xf32>
    %80 = tpu.matmul %77, %78, %cst_26 {dimension_numbers = #tpu.dot_dimension_numbers<[1], [1], [0], [0], [0, 0, 1, 0], [], []>} : vector<16x32xf32>, vector<16x32xf32>, vector<16x16xf32> -> vector<16x16xf32>
    "tpu.trace_stop"() : () -> ()
    %cst_27 = arith.constant 0.176776692 : f32
    %81 = vector.broadcast %cst_27 : f32 to vector<16x16xf32>
    %82 = arith.mulf %80, %81 : vector<16x16xf32>
    %cst_28 = arith.constant dense<0xFF800000> : vector<16xf32>
    %83 = vector.multi_reduction <maximumf>, %82, %cst_28 [1] : vector<16x16xf32> to vector<16xf32>
    %84 = vector.shape_cast %83 : vector<16xf32> to vector<16x1xf32>
    %85 = vector.broadcast %84 : vector<16x1xf32> to vector<16x16xf32>
    %86 = arith.subf %82, %85 : vector<16x16xf32>
    %87 = math.exp %86 : vector<16x16xf32>
    %cst_29 = arith.constant dense<0.000000e+00> : vector<16xf32>
    %88 = vector.multi_reduction <add>, %87, %cst_29 [1] : vector<16x16xf32> to vector<16xf32>
    %89 = vector.shape_cast %88 : vector<16xf32> to vector<16x1xf32>
    %90 = tpu.reciprocal %89 {approx = true} : vector<16x1xf32> -> vector<16x1xf32>
    %91 = vector.broadcast %90 : vector<16x1xf32> to vector<16x16xf32>
    %92 = arith.mulf %87, %91 : vector<16x16xf32>
    %cst_30 = arith.constant dense<0.000000e+00> : vector<16x32xf32>
    %93 = tpu.matmul %92, %79, %cst_30 {dimension_numbers = #tpu.dot_dimension_numbers<[1], [0], [0], [1], [0, 0, 1, 1], [], []>} : vector<16x16xf32>, vector<16x32xf32>, vector<16x32xf32> -> vector<16x32xf32>
    %94 = tpu.concatenate %42, %59, %76, %93 in 1 : vector<16x32xf32>, vector<16x32xf32>, vector<16x32xf32>, vector<16x32xf32> -> vector<16x128xf32>
    %95 = vector.extract_strided_slice %20 {offsets = [16, 0], sizes = [16, 128], strides = [1, 1]} : vector<32x128xf32> to vector<16x128xf32>
    %96 = vector.extract_strided_slice %21 {offsets = [16, 0], sizes = [16, 128], strides = [1, 1]} : vector<32x128xf32> to vector<16x128xf32>
    %97 = vector.extract_strided_slice %22 {offsets = [16, 0], sizes = [16, 128], strides = [1, 1]} : vector<32x128xf32> to vector<16x128xf32>
    %98 = vector.extract_strided_slice %95 {offsets = [0, 0], sizes = [16, 32], strides = [1, 1]} : vector<16x128xf32> to vector<16x32xf32>
    %99 = vector.extract_strided_slice %96 {offsets = [0, 0], sizes = [16, 32], strides = [1, 1]} : vector<16x128xf32> to vector<16x32xf32>
    %100 = vector.extract_strided_slice %97 {offsets = [0, 0], sizes = [16, 32], strides = [1, 1]} : vector<16x128xf32> to vector<16x32xf32>
    "tpu.trace_start"() <{level = 10 : i32, message = "qd,kd->qk"}> : () -> ()
    %cst_31 = arith.constant dense<0.000000e+00> : vector<16x16xf32>
    %101 = tpu.matmul %98, %99, %cst_31 {dimension_numbers = #tpu.dot_dimension_numbers<[1], [1], [0], [0], [0, 0, 1, 0], [], []>} : vector<16x32xf32>, vector<16x32xf32>, vector<16x16xf32> -> vector<16x16xf32>
    "tpu.trace_stop"() : () -> ()
    %cst_32 = arith.constant 0.176776692 : f32
    %102 = vector.broadcast %cst_32 : f32 to vector<16x16xf32>
    %103 = arith.mulf %101, %102 : vector<16x16xf32>
    %cst_33 = arith.constant dense<0xFF800000> : vector<16xf32>
    %104 = vector.multi_reduction <maximumf>, %103, %cst_33 [1] : vector<16x16xf32> to vector<16xf32>
    %105 = vector.shape_cast %104 : vector<16xf32> to vector<16x1xf32>
    %106 = vector.broadcast %105 : vector<16x1xf32> to vector<16x16xf32>
    %107 = arith.subf %103, %106 : vector<16x16xf32>
    %108 = math.exp %107 : vector<16x16xf32>
    %cst_34 = arith.constant dense<0.000000e+00> : vector<16xf32>
    %109 = vector.multi_reduction <add>, %108, %cst_34 [1] : vector<16x16xf32> to vector<16xf32>
    %110 = vector.shape_cast %109 : vector<16xf32> to vector<16x1xf32>
    %111 = tpu.reciprocal %110 {approx = true} : vector<16x1xf32> -> vector<16x1xf32>
    %112 = vector.broadcast %111 : vector<16x1xf32> to vector<16x16xf32>
    %113 = arith.mulf %108, %112 : vector<16x16xf32>
    %cst_35 = arith.constant dense<0.000000e+00> : vector<16x32xf32>
    %114 = tpu.matmul %113, %100, %cst_35 {dimension_numbers = #tpu.dot_dimension_numbers<[1], [0], [0], [1], [0, 0, 1, 1], [], []>} : vector<16x16xf32>, vector<16x32xf32>, vector<16x32xf32> -> vector<16x32xf32>
    %115 = vector.extract_strided_slice %95 {offsets = [0, 32], sizes = [16, 32], strides = [1, 1]} : vector<16x128xf32> to vector<16x32xf32>
    %116 = vector.extract_strided_slice %96 {offsets = [0, 32], sizes = [16, 32], strides = [1, 1]} : vector<16x128xf32> to vector<16x32xf32>
    %117 = vector.extract_strided_slice %97 {offsets = [0, 32], sizes = [16, 32], strides = [1, 1]} : vector<16x128xf32> to vector<16x32xf32>
    "tpu.trace_start"() <{level = 10 : i32, message = "qd,kd->qk"}> : () -> ()
    %cst_36 = arith.constant dense<0.000000e+00> : vector<16x16xf32>
    %118 = tpu.matmul %115, %116, %cst_36 {dimension_numbers = #tpu.dot_dimension_numbers<[1], [1], [0], [0], [0, 0, 1, 0], [], []>} : vector<16x32xf32>, vector<16x32xf32>, vector<16x16xf32> -> vector<16x16xf32>
    "tpu.trace_stop"() : () -> ()
    %cst_37 = arith.constant 0.176776692 : f32
    %119 = vector.broadcast %cst_37 : f32 to vector<16x16xf32>
    %120 = arith.mulf %118, %119 : vector<16x16xf32>
    %cst_38 = arith.constant dense<0xFF800000> : vector<16xf32>
    %121 = vector.multi_reduction <maximumf>, %120, %cst_38 [1] : vector<16x16xf32> to vector<16xf32>
    %122 = vector.shape_cast %121 : vector<16xf32> to vector<16x1xf32>
    %123 = vector.broadcast %122 : vector<16x1xf32> to vector<16x16xf32>
    %124 = arith.subf %120, %123 : vector<16x16xf32>
    %125 = math.exp %124 : vector<16x16xf32>
    %cst_39 = arith.constant dense<0.000000e+00> : vector<16xf32>
    %126 = vector.multi_reduction <add>, %125, %cst_39 [1] : vector<16x16xf32> to vector<16xf32>
    %127 = vector.shape_cast %126 : vector<16xf32> to vector<16x1xf32>
    %128 = tpu.reciprocal %127 {approx = true} : vector<16x1xf32> -> vector<16x1xf32>
    %129 = vector.broadcast %128 : vector<16x1xf32> to vector<16x16xf32>
    %130 = arith.mulf %125, %129 : vector<16x16xf32>
    %cst_40 = arith.constant dense<0.000000e+00> : vector<16x32xf32>
    %131 = tpu.matmul %130, %117, %cst_40 {dimension_numbers = #tpu.dot_dimension_numbers<[1], [0], [0], [1], [0, 0, 1, 1], [], []>} : vector<16x16xf32>, vector<16x32xf32>, vector<16x32xf32> -> vector<16x32xf32>
    %132 = vector.extract_strided_slice %95 {offsets = [0, 64], sizes = [16, 32], strides = [1, 1]} : vector<16x128xf32> to vector<16x32xf32>
    %133 = vector.extract_strided_slice %96 {offsets = [0, 64], sizes = [16, 32], strides = [1, 1]} : vector<16x128xf32> to vector<16x32xf32>
    %134 = vector.extract_strided_slice %97 {offsets = [0, 64], sizes = [16, 32], strides = [1, 1]} : vector<16x128xf32> to vector<16x32xf32>
    "tpu.trace_start"() <{level = 10 : i32, message = "qd,kd->qk"}> : () -> ()
    %cst_41 = arith.constant dense<0.000000e+00> : vector<16x16xf32>
    %135 = tpu.matmul %132, %133, %cst_41 {dimension_numbers = #tpu.dot_dimension_numbers<[1], [1], [0], [0], [0, 0, 1, 0], [], []>} : vector<16x32xf32>, vector<16x32xf32>, vector<16x16xf32> -> vector<16x16xf32>
    "tpu.trace_stop"() : () -> ()
    %cst_42 = arith.constant 0.176776692 : f32
    %136 = vector.broadcast %cst_42 : f32 to vector<16x16xf32>
    %137 = arith.mulf %135, %136 : vector<16x16xf32>
    %cst_43 = arith.constant dense<0xFF800000> : vector<16xf32>
    %138 = vector.multi_reduction <maximumf>, %137, %cst_43 [1] : vector<16x16xf32> to vector<16xf32>
    %139 = vector.shape_cast %138 : vector<16xf32> to vector<16x1xf32>
    %140 = vector.broadcast %139 : vector<16x1xf32> to vector<16x16xf32>
    %141 = arith.subf %137, %140 : vector<16x16xf32>
    %142 = math.exp %141 : vector<16x16xf32>
    %cst_44 = arith.constant dense<0.000000e+00> : vector<16xf32>
    %143 = vector.multi_reduction <add>, %142, %cst_44 [1] : vector<16x16xf32> to vector<16xf32>
    %144 = vector.shape_cast %143 : vector<16xf32> to vector<16x1xf32>
    %145 = tpu.reciprocal %144 {approx = true} : vector<16x1xf32> -> vector<16x1xf32>
    %146 = vector.broadcast %145 : vector<16x1xf32> to vector<16x16xf32>
    %147 = arith.mulf %142, %146 : vector<16x16xf32>
    %cst_45 = arith.constant dense<0.000000e+00> : vector<16x32xf32>
    %148 = tpu.matmul %147, %134, %cst_45 {dimension_numbers = #tpu.dot_dimension_numbers<[1], [0], [0], [1], [0, 0, 1, 1], [], []>} : vector<16x16xf32>, vector<16x32xf32>, vector<16x32xf32> -> vector<16x32xf32>
    %149 = vector.extract_strided_slice %95 {offsets = [0, 96], sizes = [16, 32], strides = [1, 1]} : vector<16x128xf32> to vector<16x32xf32>
    %150 = vector.extract_strided_slice %96 {offsets = [0, 96], sizes = [16, 32], strides = [1, 1]} : vector<16x128xf32> to vector<16x32xf32>
    %151 = vector.extract_strided_slice %97 {offsets = [0, 96], sizes = [16, 32], strides = [1, 1]} : vector<16x128xf32> to vector<16x32xf32>
    "tpu.trace_start"() <{level = 10 : i32, message = "qd,kd->qk"}> : () -> ()
    %cst_46 = arith.constant dense<0.000000e+00> : vector<16x16xf32>
    %152 = tpu.matmul %149, %150, %cst_46 {dimension_numbers = #tpu.dot_dimension_numbers<[1], [1], [0], [0], [0, 0, 1, 0], [], []>} : vector<16x32xf32>, vector<16x32xf32>, vector<16x16xf32> -> vector<16x16xf32>
    "tpu.trace_stop"() : () -> ()
    %cst_47 = arith.constant 0.176776692 : f32
    %153 = vector.broadcast %cst_47 : f32 to vector<16x16xf32>
    %154 = arith.mulf %152, %153 : vector<16x16xf32>
    %cst_48 = arith.constant dense<0xFF800000> : vector<16xf32>
    %155 = vector.multi_reduction <maximumf>, %154, %cst_48 [1] : vector<16x16xf32> to vector<16xf32>
    %156 = vector.shape_cast %155 : vector<16xf32> to vector<16x1xf32>
    %157 = vector.broadcast %156 : vector<16x1xf32> to vector<16x16xf32>
    %158 = arith.subf %154, %157 : vector<16x16xf32>
    %159 = math.exp %158 : vector<16x16xf32>
    %cst_49 = arith.constant dense<0.000000e+00> : vector<16xf32>
    %160 = vector.multi_reduction <add>, %159, %cst_49 [1] : vector<16x16xf32> to vector<16xf32>
    %161 = vector.shape_cast %160 : vector<16xf32> to vector<16x1xf32>
    %162 = tpu.reciprocal %161 {approx = true} : vector<16x1xf32> -> vector<16x1xf32>
    %163 = vector.broadcast %162 : vector<16x1xf32> to vector<16x16xf32>
    %164 = arith.mulf %159, %163 : vector<16x16xf32>
    %cst_50 = arith.constant dense<0.000000e+00> : vector<16x32xf32>
    %165 = tpu.matmul %164, %151, %cst_50 {dimension_numbers = #tpu.dot_dimension_numbers<[1], [0], [0], [1], [0, 0, 1, 1], [], []>} : vector<16x16xf32>, vector<16x32xf32>, vector<16x32xf32> -> vector<16x32xf32>
    %166 = tpu.concatenate %114, %131, %148, %165 in 1 : vector<16x32xf32>, vector<16x32xf32>, vector<16x32xf32>, vector<16x32xf32> -> vector<16x128xf32>
    %167 = tpu.concatenate %94, %166 in 0 : vector<16x128xf32>, vector<16x128xf32> -> vector<32x128xf32>
    %c0_51 = arith.constant 0 : index
    %c0_52 = arith.constant 0 : index
    %168 = vector.load %arg5[%c0_51, %c0_52] : memref<128x128xf32, #tpu.memory_space<vmem>>, vector<128x128xf32>
    %cst_53 = arith.constant dense<0.000000e+00> : vector<32x128xf32>
    %169 = tpu.matmul %167, %168, %cst_53 {dimension_numbers = #tpu.dot_dimension_numbers<[1], [0], [0], [1], [0, 0, 1, 1], [], []>} : vector<32x128xf32>, vector<128x128xf32>, vector<32x128xf32> -> vector<32x128xf32>
    %c0_54 = arith.constant 0 : index
    %c0_55 = arith.constant 0 : index
    %170 = vector.load %arg6[%c0_54, %c0_55] : memref<1x128xf32, #tpu.memory_space<vmem>>, vector<1x128xf32>
    %171 = vector.broadcast %170 : vector<1x128xf32> to vector<32x128xf32>
    %172 = arith.addf %169, %171 : vector<32x128xf32>
    %173 = arith.addf %1, %172 : vector<32x128xf32>
    %c0_56 = arith.constant 0 : index
    %c0_57 = arith.constant 0 : index
    %174 = vector.load %arg7[%c0_56, %c0_57] : memref<1x128xf32, #tpu.memory_space<vmem>>, vector<1x128xf32>
    %175 = arith.mulf %173, %173 : vector<32x128xf32>
    %cst_58 = arith.constant dense<0.000000e+00> : vector<32xf32>
    %176 = vector.multi_reduction <add>, %175, %cst_58 [1] : vector<32x128xf32> to vector<32xf32>
    %177 = vector.shape_cast %176 : vector<32xf32> to vector<32x1xf32>
    %cst_59 = arith.constant 1.280000e+02 : f32
    %178 = vector.broadcast %cst_59 : f32 to vector<32x1xf32>
    %179 = arith.divf %177, %178 : vector<32x1xf32>
    %cst_60 = arith.constant 9.99999997E-7 : f32
    %180 = vector.broadcast %cst_60 : f32 to vector<32x1xf32>
    %181 = arith.addf %179, %180 : vector<32x1xf32>
    %182 = math.rsqrt %181 : vector<32x1xf32>
    %183 = vector.broadcast %182 : vector<32x1xf32> to vector<32x128xf32>
    %184 = arith.mulf %173, %183 : vector<32x128xf32>
    %185 = vector.broadcast %174 : vector<1x128xf32> to vector<32x128xf32>
    %186 = arith.mulf %184, %185 : vector<32x128xf32>
    %c0_61 = arith.constant 0 : index
    %c0_62 = arith.constant 0 : index
    %187 = vector.load %arg8[%c0_61, %c0_62] : memref<128x4xf32, #tpu.memory_space<vmem>>, vector<128x4xf32>
    %cst_63 = arith.constant dense<0.000000e+00> : vector<32x4xf32>
    %188 = tpu.matmul %186, %187, %cst_63 {dimension_numbers = #tpu.dot_dimension_numbers<[1], [0], [0], [1], [0, 0, 1, 1], [], []>} : vector<32x128xf32>, vector<128x4xf32>, vector<32x4xf32> -> vector<32x4xf32>
    %c0_64 = arith.constant 0 : index
    %c0_65 = arith.constant 0 : index
    %189 = vector.load %arg9[%c0_64, %c0_65] : memref<1x4xf32, #tpu.memory_space<vmem>>, vector<1x4xf32>
    %190 = vector.broadcast %189 : vector<1x4xf32> to vector<32x4xf32>
    %191 = arith.addf %188, %190 : vector<32x4xf32>
    %cst_66 = arith.constant dense<0xFF800000> : vector<32xf32>
    %192 = vector.multi_reduction <maximumf>, %191, %cst_66 [1] : vector<32x4xf32> to vector<32xf32>
    %193 = vector.shape_cast %192 : vector<32xf32> to vector<32x1xf32>
    %194 = vector.broadcast %193 : vector<32x1xf32> to vector<32x4xf32>
    %195 = arith.subf %191, %194 : vector<32x4xf32>
    %196 = math.exp %195 : vector<32x4xf32>
    %cst_67 = arith.constant dense<0.000000e+00> : vector<32xf32>
    %197 = vector.multi_reduction <add>, %196, %cst_67 [1] : vector<32x4xf32> to vector<32xf32>
    %198 = vector.shape_cast %197 : vector<32xf32> to vector<32x1xf32>
    %199 = tpu.reciprocal %198 {approx = true} : vector<32x1xf32> -> vector<32x1xf32>
    %200 = vector.broadcast %199 : vector<32x1xf32> to vector<32x4xf32>
    %201 = arith.mulf %196, %200 : vector<32x4xf32>
    %cst_68 = arith.constant 0.000000e+00 : f32
    %202 = vector.broadcast %cst_68 : f32 to vector<32x128xf32>
    %c0_69 = arith.constant 0 : index
    %c0_70 = arith.constant 0 : index
    %c0_71 = arith.constant 0 : index
    %203 = vector.load %arg10[%c0_69, %c0_70, %c0_71] : memref<4x128x256xf32, #tpu.memory_space<vmem>>, vector<1x128x256xf32>
    %204 = vector.shape_cast %203 : vector<1x128x256xf32> to vector<128x256xf32>
    %cst_72 = arith.constant dense<0.000000e+00> : vector<32x256xf32>
    %205 = tpu.matmul %186, %204, %cst_72 {dimension_numbers = #tpu.dot_dimension_numbers<[1], [0], [0], [1], [0, 0, 1, 1], [], []>} : vector<32x128xf32>, vector<128x256xf32>, vector<32x256xf32> -> vector<32x256xf32>
    %c0_73 = arith.constant 0 : index
    %c0_74 = arith.constant 0 : index
    %c0_75 = arith.constant 0 : index
    %206 = vector.load %arg11[%c0_73, %c0_74, %c0_75] : memref<4x1x256xf32, #tpu.memory_space<vmem>>, vector<1x1x256xf32>
    %207 = vector.shape_cast %206 : vector<1x1x256xf32> to vector<1x256xf32>
    %208 = vector.broadcast %207 : vector<1x256xf32> to vector<32x256xf32>
    %209 = arith.addf %205, %208 : vector<32x256xf32>
    %cst_76 = arith.constant 5.000000e-01 : f32
    %210 = vector.broadcast %cst_76 : f32 to vector<32x256xf32>
    %211 = arith.mulf %210, %209 : vector<32x256xf32>
    %cst_77 = arith.constant 0.707106769 : f32
    %212 = vector.broadcast %cst_77 : f32 to vector<32x256xf32>
    %213 = arith.mulf %209, %212 : vector<32x256xf32>
    %214 = math.absf %213 : vector<32x256xf32>
    %cst_78 = arith.constant 0.327591091 : f32
    %215 = vector.broadcast %cst_78 : f32 to vector<32x256xf32>
    %216 = arith.mulf %215, %214 : vector<32x256xf32>
    %cst_79 = arith.constant 1.000000e+00 : f32
    %217 = vector.broadcast %cst_79 : f32 to vector<32x256xf32>
    %218 = arith.addf %217, %216 : vector<32x256xf32>
    %cst_80 = arith.constant 1.000000e+00 : f32
    %219 = vector.broadcast %cst_80 : f32 to vector<32x256xf32>
    %220 = arith.divf %219, %218 : vector<32x256xf32>
    %cst_81 = arith.constant 1.06140542 : f32
    %221 = vector.broadcast %cst_81 : f32 to vector<32x256xf32>
    %222 = arith.mulf %221, %220 : vector<32x256xf32>
    %cst_82 = arith.constant -1.45315206 : f32
    %223 = vector.broadcast %cst_82 : f32 to vector<32x256xf32>
    %224 = arith.addf %222, %223 : vector<32x256xf32>
    %225 = arith.mulf %224, %220 : vector<32x256xf32>
    %cst_83 = arith.constant 1.42141378 : f32
    %226 = vector.broadcast %cst_83 : f32 to vector<32x256xf32>
    %227 = arith.addf %225, %226 : vector<32x256xf32>
    %228 = arith.mulf %227, %220 : vector<32x256xf32>
    %cst_84 = arith.constant -0.284496725 : f32
    %229 = vector.broadcast %cst_84 : f32 to vector<32x256xf32>
    %230 = arith.addf %228, %229 : vector<32x256xf32>
    %231 = arith.mulf %230, %220 : vector<32x256xf32>
    %cst_85 = arith.constant 0.254829586 : f32
    %232 = vector.broadcast %cst_85 : f32 to vector<32x256xf32>
    %233 = arith.addf %231, %232 : vector<32x256xf32>
    %234 = arith.mulf %233, %220 : vector<32x256xf32>
    %cst_86 = arith.constant 0.000000e+00 : f32
    %235 = vector.broadcast %cst_86 : f32 to vector<32x256xf32>
    %236 = arith.subf %235, %214 : vector<32x256xf32>
    %237 = arith.mulf %236, %214 : vector<32x256xf32>
    %238 = math.exp %237 : vector<32x256xf32>
    %239 = arith.mulf %234, %238 : vector<32x256xf32>
    %cst_87 = arith.constant 1.000000e+00 : f32
    %240 = vector.broadcast %cst_87 : f32 to vector<32x256xf32>
    %241 = arith.subf %240, %239 : vector<32x256xf32>
    %cst_88 = arith.constant 0.000000e+00 : f32
    %242 = vector.broadcast %cst_88 : f32 to vector<32x256xf32>
    %243 = arith.cmpf olt, %213, %242 : vector<32x256xf32>
    %cst_89 = arith.constant 0.000000e+00 : f32
    %244 = vector.broadcast %cst_89 : f32 to vector<32x256xf32>
    %245 = arith.subf %244, %241 : vector<32x256xf32>
    %246 = arith.select %243, %245, %241 : vector<32x256xi1>, vector<32x256xf32>
    %cst_90 = arith.constant 1.000000e+00 : f32
    %247 = vector.broadcast %cst_90 : f32 to vector<32x256xf32>
    %248 = arith.addf %247, %246 : vector<32x256xf32>
    %249 = arith.mulf %211, %248 : vector<32x256xf32>
    %c0_91 = arith.constant 0 : index
    %c0_92 = arith.constant 0 : index
    %c0_93 = arith.constant 0 : index
    %250 = vector.load %arg12[%c0_91, %c0_92, %c0_93] : memref<4x256x128xf32, #tpu.memory_space<vmem>>, vector<1x256x128xf32>
    %251 = vector.shape_cast %250 : vector<1x256x128xf32> to vector<256x128xf32>
    %cst_94 = arith.constant dense<0.000000e+00> : vector<32x128xf32>
    %252 = tpu.matmul %249, %251, %cst_94 {dimension_numbers = #tpu.dot_dimension_numbers<[1], [0], [0], [1], [0, 0, 1, 1], [], []>} : vector<32x256xf32>, vector<256x128xf32>, vector<32x128xf32> -> vector<32x128xf32>
    %c0_95 = arith.constant 0 : index
    %c0_96 = arith.constant 0 : index
    %c0_97 = arith.constant 0 : index
    %253 = vector.load %arg13[%c0_95, %c0_96, %c0_97] : memref<4x1x128xf32, #tpu.memory_space<vmem>>, vector<1x1x128xf32>
    %254 = vector.shape_cast %253 : vector<1x1x128xf32> to vector<1x128xf32>
    %255 = vector.broadcast %254 : vector<1x128xf32> to vector<32x128xf32>
    %256 = arith.addf %252, %255 : vector<32x128xf32>
    %257 = vector.extract_strided_slice %201 {offsets = [0, 0], sizes = [32, 1], strides = [1, 1]} : vector<32x4xf32> to vector<32x1xf32>
    %258 = vector.broadcast %257 : vector<32x1xf32> to vector<32x128xf32>
    %259 = arith.mulf %258, %256 : vector<32x128xf32>
    %260 = arith.addf %202, %259 : vector<32x128xf32>
    %c1 = arith.constant 1 : index
    %c0_98 = arith.constant 0 : index
    %c0_99 = arith.constant 0 : index
    %261 = vector.load %arg10[%c1, %c0_98, %c0_99] : memref<4x128x256xf32, #tpu.memory_space<vmem>>, vector<1x128x256xf32>
    %262 = vector.shape_cast %261 : vector<1x128x256xf32> to vector<128x256xf32>
    %cst_100 = arith.constant dense<0.000000e+00> : vector<32x256xf32>
    %263 = tpu.matmul %186, %262, %cst_100 {dimension_numbers = #tpu.dot_dimension_numbers<[1], [0], [0], [1], [0, 0, 1, 1], [], []>} : vector<32x128xf32>, vector<128x256xf32>, vector<32x256xf32> -> vector<32x256xf32>
    %c1_101 = arith.constant 1 : index
    %c0_102 = arith.constant 0 : index
    %c0_103 = arith.constant 0 : index
    %264 = vector.load %arg11[%c1_101, %c0_102, %c0_103] : memref<4x1x256xf32, #tpu.memory_space<vmem>>, vector<1x1x256xf32>
    %265 = vector.shape_cast %264 : vector<1x1x256xf32> to vector<1x256xf32>
    %266 = vector.broadcast %265 : vector<1x256xf32> to vector<32x256xf32>
    %267 = arith.addf %263, %266 : vector<32x256xf32>
    %cst_104 = arith.constant 5.000000e-01 : f32
    %268 = vector.broadcast %cst_104 : f32 to vector<32x256xf32>
    %269 = arith.mulf %268, %267 : vector<32x256xf32>
    %cst_105 = arith.constant 0.707106769 : f32
    %270 = vector.broadcast %cst_105 : f32 to vector<32x256xf32>
    %271 = arith.mulf %267, %270 : vector<32x256xf32>
    %272 = math.absf %271 : vector<32x256xf32>
    %cst_106 = arith.constant 0.327591091 : f32
    %273 = vector.broadcast %cst_106 : f32 to vector<32x256xf32>
    %274 = arith.mulf %273, %272 : vector<32x256xf32>
    %cst_107 = arith.constant 1.000000e+00 : f32
    %275 = vector.broadcast %cst_107 : f32 to vector<32x256xf32>
    %276 = arith.addf %275, %274 : vector<32x256xf32>
    %cst_108 = arith.constant 1.000000e+00 : f32
    %277 = vector.broadcast %cst_108 : f32 to vector<32x256xf32>
    %278 = arith.divf %277, %276 : vector<32x256xf32>
    %cst_109 = arith.constant 1.06140542 : f32
    %279 = vector.broadcast %cst_109 : f32 to vector<32x256xf32>
    %280 = arith.mulf %279, %278 : vector<32x256xf32>
    %cst_110 = arith.constant -1.45315206 : f32
    %281 = vector.broadcast %cst_110 : f32 to vector<32x256xf32>
    %282 = arith.addf %280, %281 : vector<32x256xf32>
    %283 = arith.mulf %282, %278 : vector<32x256xf32>
    %cst_111 = arith.constant 1.42141378 : f32
    %284 = vector.broadcast %cst_111 : f32 to vector<32x256xf32>
    %285 = arith.addf %283, %284 : vector<32x256xf32>
    %286 = arith.mulf %285, %278 : vector<32x256xf32>
    %cst_112 = arith.constant -0.284496725 : f32
    %287 = vector.broadcast %cst_112 : f32 to vector<32x256xf32>
    %288 = arith.addf %286, %287 : vector<32x256xf32>
    %289 = arith.mulf %288, %278 : vector<32x256xf32>
    %cst_113 = arith.constant 0.254829586 : f32
    %290 = vector.broadcast %cst_113 : f32 to vector<32x256xf32>
    %291 = arith.addf %289, %290 : vector<32x256xf32>
    %292 = arith.mulf %291, %278 : vector<32x256xf32>
    %cst_114 = arith.constant 0.000000e+00 : f32
    %293 = vector.broadcast %cst_114 : f32 to vector<32x256xf32>
    %294 = arith.subf %293, %272 : vector<32x256xf32>
    %295 = arith.mulf %294, %272 : vector<32x256xf32>
    %296 = math.exp %295 : vector<32x256xf32>
    %297 = arith.mulf %292, %296 : vector<32x256xf32>
    %cst_115 = arith.constant 1.000000e+00 : f32
    %298 = vector.broadcast %cst_115 : f32 to vector<32x256xf32>
    %299 = arith.subf %298, %297 : vector<32x256xf32>
    %cst_116 = arith.constant 0.000000e+00 : f32
    %300 = vector.broadcast %cst_116 : f32 to vector<32x256xf32>
    %301 = arith.cmpf olt, %271, %300 : vector<32x256xf32>
    %cst_117 = arith.constant 0.000000e+00 : f32
    %302 = vector.broadcast %cst_117 : f32 to vector<32x256xf32>
    %303 = arith.subf %302, %299 : vector<32x256xf32>
    %304 = arith.select %301, %303, %299 : vector<32x256xi1>, vector<32x256xf32>
    %cst_118 = arith.constant 1.000000e+00 : f32
    %305 = vector.broadcast %cst_118 : f32 to vector<32x256xf32>
    %306 = arith.addf %305, %304 : vector<32x256xf32>
    %307 = arith.mulf %269, %306 : vector<32x256xf32>
    %c1_119 = arith.constant 1 : index
    %c0_120 = arith.constant 0 : index
    %c0_121 = arith.constant 0 : index
    %308 = vector.load %arg12[%c1_119, %c0_120, %c0_121] : memref<4x256x128xf32, #tpu.memory_space<vmem>>, vector<1x256x128xf32>
    %309 = vector.shape_cast %308 : vector<1x256x128xf32> to vector<256x128xf32>
    %cst_122 = arith.constant dense<0.000000e+00> : vector<32x128xf32>
    %310 = tpu.matmul %307, %309, %cst_122 {dimension_numbers = #tpu.dot_dimension_numbers<[1], [0], [0], [1], [0, 0, 1, 1], [], []>} : vector<32x256xf32>, vector<256x128xf32>, vector<32x128xf32> -> vector<32x128xf32>
    %c1_123 = arith.constant 1 : index
    %c0_124 = arith.constant 0 : index
    %c0_125 = arith.constant 0 : index
    %311 = vector.load %arg13[%c1_123, %c0_124, %c0_125] : memref<4x1x128xf32, #tpu.memory_space<vmem>>, vector<1x1x128xf32>
    %312 = vector.shape_cast %311 : vector<1x1x128xf32> to vector<1x128xf32>
    %313 = vector.broadcast %312 : vector<1x128xf32> to vector<32x128xf32>
    %314 = arith.addf %310, %313 : vector<32x128xf32>
    %315 = vector.extract_strided_slice %201 {offsets = [0, 1], sizes = [32, 1], strides = [1, 1]} : vector<32x4xf32> to vector<32x1xf32>
    %316 = vector.broadcast %315 : vector<32x1xf32> to vector<32x128xf32>
    %317 = arith.mulf %316, %314 : vector<32x128xf32>
    %318 = arith.addf %260, %317 : vector<32x128xf32>
    %c2 = arith.constant 2 : index
    %c0_126 = arith.constant 0 : index
    %c0_127 = arith.constant 0 : index
    %319 = vector.load %arg10[%c2, %c0_126, %c0_127] : memref<4x128x256xf32, #tpu.memory_space<vmem>>, vector<1x128x256xf32>
    %320 = vector.shape_cast %319 : vector<1x128x256xf32> to vector<128x256xf32>
    %cst_128 = arith.constant dense<0.000000e+00> : vector<32x256xf32>
    %321 = tpu.matmul %186, %320, %cst_128 {dimension_numbers = #tpu.dot_dimension_numbers<[1], [0], [0], [1], [0, 0, 1, 1], [], []>} : vector<32x128xf32>, vector<128x256xf32>, vector<32x256xf32> -> vector<32x256xf32>
    %c2_129 = arith.constant 2 : index
    %c0_130 = arith.constant 0 : index
    %c0_131 = arith.constant 0 : index
    %322 = vector.load %arg11[%c2_129, %c0_130, %c0_131] : memref<4x1x256xf32, #tpu.memory_space<vmem>>, vector<1x1x256xf32>
    %323 = vector.shape_cast %322 : vector<1x1x256xf32> to vector<1x256xf32>
    %324 = vector.broadcast %323 : vector<1x256xf32> to vector<32x256xf32>
    %325 = arith.addf %321, %324 : vector<32x256xf32>
    %cst_132 = arith.constant 5.000000e-01 : f32
    %326 = vector.broadcast %cst_132 : f32 to vector<32x256xf32>
    %327 = arith.mulf %326, %325 : vector<32x256xf32>
    %cst_133 = arith.constant 0.707106769 : f32
    %328 = vector.broadcast %cst_133 : f32 to vector<32x256xf32>
    %329 = arith.mulf %325, %328 : vector<32x256xf32>
    %330 = math.absf %329 : vector<32x256xf32>
    %cst_134 = arith.constant 0.327591091 : f32
    %331 = vector.broadcast %cst_134 : f32 to vector<32x256xf32>
    %332 = arith.mulf %331, %330 : vector<32x256xf32>
    %cst_135 = arith.constant 1.000000e+00 : f32
    %333 = vector.broadcast %cst_135 : f32 to vector<32x256xf32>
    %334 = arith.addf %333, %332 : vector<32x256xf32>
    %cst_136 = arith.constant 1.000000e+00 : f32
    %335 = vector.broadcast %cst_136 : f32 to vector<32x256xf32>
    %336 = arith.divf %335, %334 : vector<32x256xf32>
    %cst_137 = arith.constant 1.06140542 : f32
    %337 = vector.broadcast %cst_137 : f32 to vector<32x256xf32>
    %338 = arith.mulf %337, %336 : vector<32x256xf32>
    %cst_138 = arith.constant -1.45315206 : f32
    %339 = vector.broadcast %cst_138 : f32 to vector<32x256xf32>
    %340 = arith.addf %338, %339 : vector<32x256xf32>
    %341 = arith.mulf %340, %336 : vector<32x256xf32>
    %cst_139 = arith.constant 1.42141378 : f32
    %342 = vector.broadcast %cst_139 : f32 to vector<32x256xf32>
    %343 = arith.addf %341, %342 : vector<32x256xf32>
    %344 = arith.mulf %343, %336 : vector<32x256xf32>
    %cst_140 = arith.constant -0.284496725 : f32
    %345 = vector.broadcast %cst_140 : f32 to vector<32x256xf32>
    %346 = arith.addf %344, %345 : vector<32x256xf32>
    %347 = arith.mulf %346, %336 : vector<32x256xf32>
    %cst_141 = arith.constant 0.254829586 : f32
    %348 = vector.broadcast %cst_141 : f32 to vector<32x256xf32>
    %349 = arith.addf %347, %348 : vector<32x256xf32>
    %350 = arith.mulf %349, %336 : vector<32x256xf32>
    %cst_142 = arith.constant 0.000000e+00 : f32
    %351 = vector.broadcast %cst_142 : f32 to vector<32x256xf32>
    %352 = arith.subf %351, %330 : vector<32x256xf32>
    %353 = arith.mulf %352, %330 : vector<32x256xf32>
    %354 = math.exp %353 : vector<32x256xf32>
    %355 = arith.mulf %350, %354 : vector<32x256xf32>
    %cst_143 = arith.constant 1.000000e+00 : f32
    %356 = vector.broadcast %cst_143 : f32 to vector<32x256xf32>
    %357 = arith.subf %356, %355 : vector<32x256xf32>
    %cst_144 = arith.constant 0.000000e+00 : f32
    %358 = vector.broadcast %cst_144 : f32 to vector<32x256xf32>
    %359 = arith.cmpf olt, %329, %358 : vector<32x256xf32>
    %cst_145 = arith.constant 0.000000e+00 : f32
    %360 = vector.broadcast %cst_145 : f32 to vector<32x256xf32>
    %361 = arith.subf %360, %357 : vector<32x256xf32>
    %362 = arith.select %359, %361, %357 : vector<32x256xi1>, vector<32x256xf32>
    %cst_146 = arith.constant 1.000000e+00 : f32
    %363 = vector.broadcast %cst_146 : f32 to vector<32x256xf32>
    %364 = arith.addf %363, %362 : vector<32x256xf32>
    %365 = arith.mulf %327, %364 : vector<32x256xf32>
    %c2_147 = arith.constant 2 : index
    %c0_148 = arith.constant 0 : index
    %c0_149 = arith.constant 0 : index
    %366 = vector.load %arg12[%c2_147, %c0_148, %c0_149] : memref<4x256x128xf32, #tpu.memory_space<vmem>>, vector<1x256x128xf32>
    %367 = vector.shape_cast %366 : vector<1x256x128xf32> to vector<256x128xf32>
    %cst_150 = arith.constant dense<0.000000e+00> : vector<32x128xf32>
    %368 = tpu.matmul %365, %367, %cst_150 {dimension_numbers = #tpu.dot_dimension_numbers<[1], [0], [0], [1], [0, 0, 1, 1], [], []>} : vector<32x256xf32>, vector<256x128xf32>, vector<32x128xf32> -> vector<32x128xf32>
    %c2_151 = arith.constant 2 : index
    %c0_152 = arith.constant 0 : index
    %c0_153 = arith.constant 0 : index
    %369 = vector.load %arg13[%c2_151, %c0_152, %c0_153] : memref<4x1x128xf32, #tpu.memory_space<vmem>>, vector<1x1x128xf32>
    %370 = vector.shape_cast %369 : vector<1x1x128xf32> to vector<1x128xf32>
    %371 = vector.broadcast %370 : vector<1x128xf32> to vector<32x128xf32>
    %372 = arith.addf %368, %371 : vector<32x128xf32>
    %373 = vector.extract_strided_slice %201 {offsets = [0, 2], sizes = [32, 1], strides = [1, 1]} : vector<32x4xf32> to vector<32x1xf32>
    %374 = vector.broadcast %373 : vector<32x1xf32> to vector<32x128xf32>
    %375 = arith.mulf %374, %372 : vector<32x128xf32>
    %376 = arith.addf %318, %375 : vector<32x128xf32>
    %c3 = arith.constant 3 : index
    %c0_154 = arith.constant 0 : index
    %c0_155 = arith.constant 0 : index
    %377 = vector.load %arg10[%c3, %c0_154, %c0_155] : memref<4x128x256xf32, #tpu.memory_space<vmem>>, vector<1x128x256xf32>
    %378 = vector.shape_cast %377 : vector<1x128x256xf32> to vector<128x256xf32>
    %cst_156 = arith.constant dense<0.000000e+00> : vector<32x256xf32>
    %379 = tpu.matmul %186, %378, %cst_156 {dimension_numbers = #tpu.dot_dimension_numbers<[1], [0], [0], [1], [0, 0, 1, 1], [], []>} : vector<32x128xf32>, vector<128x256xf32>, vector<32x256xf32> -> vector<32x256xf32>
    %c3_157 = arith.constant 3 : index
    %c0_158 = arith.constant 0 : index
    %c0_159 = arith.constant 0 : index
    %380 = vector.load %arg11[%c3_157, %c0_158, %c0_159] : memref<4x1x256xf32, #tpu.memory_space<vmem>>, vector<1x1x256xf32>
    %381 = vector.shape_cast %380 : vector<1x1x256xf32> to vector<1x256xf32>
    %382 = vector.broadcast %381 : vector<1x256xf32> to vector<32x256xf32>
    %383 = arith.addf %379, %382 : vector<32x256xf32>
    %cst_160 = arith.constant 5.000000e-01 : f32
    %384 = vector.broadcast %cst_160 : f32 to vector<32x256xf32>
    %385 = arith.mulf %384, %383 : vector<32x256xf32>
    %cst_161 = arith.constant 0.707106769 : f32
    %386 = vector.broadcast %cst_161 : f32 to vector<32x256xf32>
    %387 = arith.mulf %383, %386 : vector<32x256xf32>
    %388 = math.absf %387 : vector<32x256xf32>
    %cst_162 = arith.constant 0.327591091 : f32
    %389 = vector.broadcast %cst_162 : f32 to vector<32x256xf32>
    %390 = arith.mulf %389, %388 : vector<32x256xf32>
    %cst_163 = arith.constant 1.000000e+00 : f32
    %391 = vector.broadcast %cst_163 : f32 to vector<32x256xf32>
    %392 = arith.addf %391, %390 : vector<32x256xf32>
    %cst_164 = arith.constant 1.000000e+00 : f32
    %393 = vector.broadcast %cst_164 : f32 to vector<32x256xf32>
    %394 = arith.divf %393, %392 : vector<32x256xf32>
    %cst_165 = arith.constant 1.06140542 : f32
    %395 = vector.broadcast %cst_165 : f32 to vector<32x256xf32>
    %396 = arith.mulf %395, %394 : vector<32x256xf32>
    %cst_166 = arith.constant -1.45315206 : f32
    %397 = vector.broadcast %cst_166 : f32 to vector<32x256xf32>
    %398 = arith.addf %396, %397 : vector<32x256xf32>
    %399 = arith.mulf %398, %394 : vector<32x256xf32>
    %cst_167 = arith.constant 1.42141378 : f32
    %400 = vector.broadcast %cst_167 : f32 to vector<32x256xf32>
    %401 = arith.addf %399, %400 : vector<32x256xf32>
    %402 = arith.mulf %401, %394 : vector<32x256xf32>
    %cst_168 = arith.constant -0.284496725 : f32
    %403 = vector.broadcast %cst_168 : f32 to vector<32x256xf32>
    %404 = arith.addf %402, %403 : vector<32x256xf32>
    %405 = arith.mulf %404, %394 : vector<32x256xf32>
    %cst_169 = arith.constant 0.254829586 : f32
    %406 = vector.broadcast %cst_169 : f32 to vector<32x256xf32>
    %407 = arith.addf %405, %406 : vector<32x256xf32>
    %408 = arith.mulf %407, %394 : vector<32x256xf32>
    %cst_170 = arith.constant 0.000000e+00 : f32
    %409 = vector.broadcast %cst_170 : f32 to vector<32x256xf32>
    %410 = arith.subf %409, %388 : vector<32x256xf32>
    %411 = arith.mulf %410, %388 : vector<32x256xf32>
    %412 = math.exp %411 : vector<32x256xf32>
    %413 = arith.mulf %408, %412 : vector<32x256xf32>
    %cst_171 = arith.constant 1.000000e+00 : f32
    %414 = vector.broadcast %cst_171 : f32 to vector<32x256xf32>
    %415 = arith.subf %414, %413 : vector<32x256xf32>
    %cst_172 = arith.constant 0.000000e+00 : f32
    %416 = vector.broadcast %cst_172 : f32 to vector<32x256xf32>
    %417 = arith.cmpf olt, %387, %416 : vector<32x256xf32>
    %cst_173 = arith.constant 0.000000e+00 : f32
    %418 = vector.broadcast %cst_173 : f32 to vector<32x256xf32>
    %419 = arith.subf %418, %415 : vector<32x256xf32>
    %420 = arith.select %417, %419, %415 : vector<32x256xi1>, vector<32x256xf32>
    %cst_174 = arith.constant 1.000000e+00 : f32
    %421 = vector.broadcast %cst_174 : f32 to vector<32x256xf32>
    %422 = arith.addf %421, %420 : vector<32x256xf32>
    %423 = arith.mulf %385, %422 : vector<32x256xf32>
    %c3_175 = arith.constant 3 : index
    %c0_176 = arith.constant 0 : index
    %c0_177 = arith.constant 0 : index
    %424 = vector.load %arg12[%c3_175, %c0_176, %c0_177] : memref<4x256x128xf32, #tpu.memory_space<vmem>>, vector<1x256x128xf32>
    %425 = vector.shape_cast %424 : vector<1x256x128xf32> to vector<256x128xf32>
    %cst_178 = arith.constant dense<0.000000e+00> : vector<32x128xf32>
    %426 = tpu.matmul %423, %425, %cst_178 {dimension_numbers = #tpu.dot_dimension_numbers<[1], [0], [0], [1], [0, 0, 1, 1], [], []>} : vector<32x256xf32>, vector<256x128xf32>, vector<32x128xf32> -> vector<32x128xf32>
    %c3_179 = arith.constant 3 : index
    %c0_180 = arith.constant 0 : index
    %c0_181 = arith.constant 0 : index
    %427 = vector.load %arg13[%c3_179, %c0_180, %c0_181] : memref<4x1x128xf32, #tpu.memory_space<vmem>>, vector<1x1x128xf32>
    %428 = vector.shape_cast %427 : vector<1x1x128xf32> to vector<1x128xf32>
    %429 = vector.broadcast %428 : vector<1x128xf32> to vector<32x128xf32>
    %430 = arith.addf %426, %429 : vector<32x128xf32>
    %431 = vector.extract_strided_slice %201 {offsets = [0, 3], sizes = [32, 1], strides = [1, 1]} : vector<32x4xf32> to vector<32x1xf32>
    %432 = vector.broadcast %431 : vector<32x1xf32> to vector<32x128xf32>
    %433 = arith.mulf %432, %430 : vector<32x128xf32>
    %434 = arith.addf %376, %433 : vector<32x128xf32>
    %435 = arith.addf %173, %434 : vector<32x128xf32>
    %436 = vector.shape_cast %435 : vector<32x128xf32> to vector<2x16x128xf32>
    %c0_182 = arith.constant 0 : index
    %c0_183 = arith.constant 0 : index
    %c0_184 = arith.constant 0 : index
    %437 = vector.load %arg14[%c0_182, %c0_183, %c0_184] : memref<2x16x128xf32, #tpu.memory_space<vmem>>, vector<2x16x128xf32>
    tpu.vector_store %arg14[%c0_182, %c0_183, %c0_184], %436 {strides = array<i32>} : memref<2x16x128xf32, #tpu.memory_space<vmem>>, vector<2x16x128xf32>,
    return
  }
  func.func @transform_0(%arg0: i32) -> (i32, i32, i32) {
    %c0_i32 = arith.constant 0 : i32
    %c0_i32_0 = arith.constant 0 : i32
    %c0_i32_1 = arith.constant 0 : i32
    return %arg0, %c0_i32, %c0_i32_0 : i32, i32, i32
  }
  func.func @transform_1(%arg0: i32) -> (i32, i32) {
    %c0_i32 = arith.constant 0 : i32
    %c0_i32_0 = arith.constant 0 : i32
    %c0_i32_1 = arith.constant 0 : i32
    return %c0_i32, %c0_i32_0 : i32, i32
  }
  func.func @transform_2(%arg0: i32) -> (i32, i32) {
    %c0_i32 = arith.constant 0 : i32
    %c0_i32_0 = arith.constant 0 : i32
    %c0_i32_1 = arith.constant 0 : i32
    return %c0_i32, %c0_i32_0 : i32, i32
  }
  func.func @transform_3(%arg0: i32) -> (i32, i32) {
    %c0_i32 = arith.constant 0 : i32
    %c0_i32_0 = arith.constant 0 : i32
    %c0_i32_1 = arith.constant 0 : i32
    return %c0_i32, %c0_i32_0 : i32, i32
  }
  func.func @transform_4(%arg0: i32) -> (i32, i32) {
    %c0_i32 = arith.constant 0 : i32
    %c0_i32_0 = arith.constant 0 : i32
    %c0_i32_1 = arith.constant 0 : i32
    return %c0_i32, %c0_i32_0 : i32, i32
  }
  func.func @transform_5(%arg0: i32) -> (i32, i32) {
    %c0_i32 = arith.constant 0 : i32
    %c0_i32_0 = arith.constant 0 : i32
    %c0_i32_1 = arith.constant 0 : i32
    return %c0_i32, %c0_i32_0 : i32, i32
  }
  func.func @transform_6(%arg0: i32) -> (i32, i32) {
    %c0_i32 = arith.constant 0 : i32
    %c0_i32_0 = arith.constant 0 : i32
    %c0_i32_1 = arith.constant 0 : i32
    return %c0_i32, %c0_i32_0 : i32, i32
  }
  func.func @transform_7(%arg0: i32) -> (i32, i32) {
    %c0_i32 = arith.constant 0 : i32
    %c0_i32_0 = arith.constant 0 : i32
    %c0_i32_1 = arith.constant 0 : i32
    return %c0_i32, %c0_i32_0 : i32, i32
  }
  func.func @transform_8(%arg0: i32) -> (i32, i32) {
    %c0_i32 = arith.constant 0 : i32
    %c0_i32_0 = arith.constant 0 : i32
    %c0_i32_1 = arith.constant 0 : i32
    return %c0_i32, %c0_i32_0 : i32, i32
  }
  func.func @transform_9(%arg0: i32) -> (i32, i32, i32) {
    %c0_i32 = arith.constant 0 : i32
    %c0_i32_0 = arith.constant 0 : i32
    %c0_i32_1 = arith.constant 0 : i32
    %c0_i32_2 = arith.constant 0 : i32
    return %c0_i32, %c0_i32_0, %c0_i32_1 : i32, i32, i32
  }
  func.func @transform_10(%arg0: i32) -> (i32, i32, i32) {
    %c0_i32 = arith.constant 0 : i32
    %c0_i32_0 = arith.constant 0 : i32
    %c0_i32_1 = arith.constant 0 : i32
    %c0_i32_2 = arith.constant 0 : i32
    return %c0_i32, %c0_i32_0, %c0_i32_1 : i32, i32, i32
  }
  func.func @transform_11(%arg0: i32) -> (i32, i32, i32) {
    %c0_i32 = arith.constant 0 : i32
    %c0_i32_0 = arith.constant 0 : i32
    %c0_i32_1 = arith.constant 0 : i32
    %c0_i32_2 = arith.constant 0 : i32
    return %c0_i32, %c0_i32_0, %c0_i32_1 : i32, i32, i32
  }
  func.func @transform_12(%arg0: i32) -> (i32, i32, i32) {
    %c0_i32 = arith.constant 0 : i32
    %c0_i32_0 = arith.constant 0 : i32
    %c0_i32_1 = arith.constant 0 : i32
    %c0_i32_2 = arith.constant 0 : i32
    return %c0_i32, %c0_i32_0, %c0_i32_1 : i32, i32, i32
  }
  func.func @transform_13(%arg0: i32) -> (i32, i32, i32) {
    %c0_i32 = arith.constant 0 : i32
    %c0_i32_0 = arith.constant 0 : i32
    %c0_i32_1 = arith.constant 0 : i32
    return %arg0, %c0_i32, %c0_i32_0 : i32, i32, i32
  }
}

</mosaic_0001>

<bundles_post_ra>
// kernel: tpu_custom_call.1
= control target key start
LH: loop header
LB: loop body
LE: loop exit
PB: predicated region body
PF: predicated region fallthrough
CT: control target
= control target key end

     0   :  { %s9132_s0 = inlined_call_operand.hbm [shape: f32[4,16,128], index: 0, kind: input, shape index: {}]   ;;  %s9133_s1 = inlined_call_operand.hbm [shape: f32[1,128], index: 1, kind: input, shape index: {}]   ;;  %s9134_s2 = inlined_call_operand.hbm [shape: f32[128,384], index: 2, kind: input, shape index: {}]   ;;  %s9135_s3 = inlined_call_operand.hbm [shape: f32[1,384], index: 3, kind: input, shape index: {}]   ;;  %s9136_s4 = inlined_call_operand.hbm [shape: f32[128,128], index: 4, kind: input, shape index: {}]   ;;  %s9137_s5 = inlined_call_operand.hbm [shape: f32[1,128], index: 5, kind: input, shape index: {}]   ;;  %s9138_s6 = inlined_call_operand.hbm [shape: f32[1,128], index: 6, kind: input, shape index: {}]   ;;  %s9139_s7 = inlined_call_operand.hbm [shape: f32[128,4], index: 7, kind: input, shape index: {}]   ;;  %s9140_s8 = inlined_call_operand.hbm [shape: f32[1,4], index: 8, kind: input, shape index: {}]   ;;  %s9141_s9 = inlined_call_operand.hbm [shape: f32[4,128,256], index: 9, kind: input, shape index: {}]   ;;  %s9142_s10 = inlined_call_operand.hbm [shape: f32[4,1,256], index: 10, kind: input, shape index: {}]   ;;  %s9143_s11 = inlined_call_operand.hbm [shape: f32[4,256,128], index: 11, kind: input, shape index: {}]   ;;  %s9144_s12 = inlined_call_operand.hbm [shape: f32[4,1,128], index: 12, kind: input, shape index: {}]   ;;  %s9145_s13 = inlined_call_operand.hbm [shape: f32[4,16,128], index: 13, kind: output, shape index: {}]  }
   0x1   :  { %9225 = sst [smem:[#allocation90_spill]] %s9132_s0 }
   0x2   :  { %9226 = sst [smem:[#allocation91_spill]] %s9133_s1 }
   0x3   :  { %9227 = sst [smem:[#allocation92_spill]] %s9135_s3 }
   0x4   :  { %9228 = sst [smem:[#allocation93_spill]] %s9137_s5 }
   0x5   :  { %9229 = sst [smem:[#allocation94_spill]] %s9139_s7 }
   0x6   :  { %9230 = sst [smem:[#allocation95_spill]] %s9141_s9 }
   0x7   :  { %9231 = sst [smem:[#allocation96_spill]] %s9143_s11 }
   0x8   :  { %9232 = sst [smem:[#allocation97_spill]] %s9145_s13 }
   0x9   :  { %18 = vsyncpa [#allocation3], 0 }
   0xa   :  { %20 = vsyncpa [#allocation3 + $0x1], 0 }
   0xb   :  { %21 = vsyncpa [#allocation6], 0 }
   0xc   :  { %22 = vsyncpa [#allocation9], 0 }
   0xd   :  { %23 = vsyncpa [#allocation12], 0 }
   0xe   :  { %24 = vsyncpa [#allocation15], 0 }
   0xf   :  { %25 = vsyncpa [#allocation18], 0 }
  0x10   :  { %26 = vsyncpa [#allocation21], 0 }
  0x11   :  { %27 = vsyncpa [#allocation4], 0 }
  0x12   :  { %29 = vsyncpa [#allocation4 + $0x1], 0  ;;  %s7260_s25 = smov 0   ;;  %s7262_s26 = smov 0  }
  0x13   :  { %s7264_s27 = smov 0   ;;  %s7266_s28 = smov 0  }
  0x14 LB: > { %s7157_s29 = smov [#allocation5]   ;;  %s7281_s14 = sadd.s32 4294967295, %s7155_s28   ;;  %s7155_s28 = sphi %s7266_s28, %s9464_s28   ;;  %s7151_s27 = sphi %s7264_s27, %s9463_s27   ;;  %s7147_s26 = sphi %s7262_s26, %s9462_s26   ;;  %s7143_s25 = sphi %s7260_s25, %s9461_s25  }
  0x15   : > { %s357_s30 = sshll.u32 %s7157_s29, 4  ;;  %p5092_p0 = scmp.ge.s32.totalorder %s7155_s28, 1  ;;  %s7286_s30 = int_to_ptr.vmem [resolvable:$true] %s357_s30 }
  0x16   : > { %p9149_p1 = scmp.eq.s32.totalorder %s7281_s14, 0  ;;  %p344_p2 = scmp.lt.s32.totalorder %s7155_s28, 3 }
  0x17   : > { %s7158_s16 = smov [#allocation8]   ;;  %s7159_s18 = smov [#allocation11]  }
  0x18   : > { %p7288_p3 = pnand %p5092_p0, %p344_p2  ;;  %s381_s17 = sshll.u32 %s7158_s16, 4  ;;  %s7295_s17 = int_to_ptr.vmem [resolvable:$true] %s381_s17 }
  0x19   : > { %s405_s19 = sshll.u32 %s7159_s18, 4  ;;  %s9236_s1 = sld [smem:[#allocation91_spill]]  ;;  %s7303_s19 = int_to_ptr.vmem [resolvable:$true] %s405_s19 }
  0x1a   : > { %s9233_s15 = scalar_select %p7288_p3, 1, 0 }
  0x1b   : > { %p6233_p5 = pneg %p7288_p3 }
  0x1c   : > { %9234 = sst [smem:[#allocation32_spill]] %s9233_s15 }
  0x1d   : > { %p7299_p6 = pnand %p6233_p5, %p9149_p1 }
  0x1f   : > { %s6699_s23 = scalar_lea.hbm %s9236_s1, 16  ;;  %p7313_p8 = pneg %p7299_p6 }
  0x20   : > { %p6700_p7 = scmp.ne.s32.totalorder %s9236_s1, %s6699_s23  ;;  %p6706_p11 = scmp.lt.u32.totalorder %s6699_s23, %s9236_s1 }
  0x22   : > { %p6702_p9 = pnand %p7313_p8, %p6700_p7 }
  0x24   : > { %p6703_p10 = pneg %p6702_p9 }
  0x26   : > { %p6708_p12 = pnand %p6706_p11, %p6703_p10 }
  0x28   : > { %6711 = shalt.err (!%p6708_p12)
}
  0x29   : > { %s6712_s21 = scalar_lea.vmem %s7286_s30, 16  ;;  %s6719_s22 = scalar_lea.vmem %s7286_s30, 32 }
  0x2a   : > { %p6713_p13 = scmp.ne.s32.totalorder %s7286_s30, %s6712_s21  ;;  %p6720_p5 = scmp.lt.s32.totalorder %s7286_s30, %s7286_s30 }
  0x2b   : > { %p6721_p7 = scmp.lt.s32.totalorder %s6719_s22, %s6712_s21 }
  0x2c   : > { %p6715_p0 = pnand %p6713_p13, %p7313_p8 }
  0x2d   : > { %p6722_p9 = por %p6721_p7, %p6720_p5 }
  0x2e   : > { %p6716_p2 = pneg %p6715_p0 }
  0x30   : > { %p6723_p4 = pnand %p6722_p9, %p6716_p2 }
  0x32   : > { %6726 = shalt.err (!%p6723_p4)
}
  0x33   : > { %6236 = dma.hbm_to_vmem [thread:$0]  (!%p7299_p6), %s9236_s1, 16, %s7286_s30, [#allocation6]  }
  0x34   : > { %s9238_s3 = sld [smem:[#allocation92_spill]] }
  0x3a   : > { %s6727_s18 = scalar_lea.hbm %s9238_s3, 48 }
  0x3b   : > { %p6728_p10 = scmp.ne.s32.totalorder %s9238_s3, %s6727_s18  ;;  %p6734_p4 = scmp.lt.u32.totalorder %s6727_s18, %s9238_s3 }
  0x3d   : > { %p6730_p11 = pnand %p6728_p10, %p7313_p8 }
  0x3f   : > { %p6731_p12 = pneg %p6730_p11 }
  0x41   : > { %p6736_p13 = pnand %p6734_p4, %p6731_p12 }
  0x43   : > { %6739 = shalt.err (!%p6736_p13)
}
  0x44   : > { %s6740_s30 = scalar_lea.vmem %s7295_s17, 48  ;;  %s6747_s0 = scalar_lea.vmem %s7295_s17, 64 }
  0x45   : > { %p6741_p0 = scmp.ne.s32.totalorder %s7295_s17, %s6740_s30  ;;  %p6748_p7 = scmp.lt.s32.totalorder %s7295_s17, %s7295_s17 }
  0x46   : > { %p6749_p9 = scmp.lt.s32.totalorder %s6747_s0, %s6740_s30 }
  0x47   : > { %p6743_p2 = pnand %p6741_p0, %p7313_p8 }
  0x48   : > { %p6750_p10 = por %p6749_p9, %p6748_p7 }
  0x49   : > { %p6744_p5 = pneg %p6743_p2 }
  0x4b   : > { %p6751_p11 = pnand %p6750_p10, %p6744_p5 }
  0x4d   : > { %6754 = shalt.err (!%p6751_p11)
}
  0x4e   : > { %6242 = dma.hbm_to_vmem [thread:$0]  (!%p7299_p6), %s9238_s3, 48, %s7295_s17, [#allocation9]  }
  0x4f   : > { %s9239_s5 = sld [smem:[#allocation93_spill]] }
  0x55   : > { %s6755_s29 = scalar_lea.hbm %s9239_s5, 16 }
  0x56   : > { %p6756_p12 = scmp.ne.s32.totalorder %s9239_s5, %s6755_s29  ;;  %p6762_p0 = scmp.lt.u32.totalorder %s6755_s29, %s9239_s5 }
  0x58   : > { %p6758_p4 = pnand %p6756_p12, %p7313_p8 }
  0x5a   : > { %p6759_p13 = pneg %p6758_p4 }
  0x5c   : > { %p6764_p2 = pnand %p6762_p0, %p6759_p13 }
  0x5e   : > { %6767 = shalt.err (!%p6764_p2)
}
  0x5f   : > { %s6768_s17 = scalar_lea.vmem %s7303_s19, 16  ;;  %s6775_s0 = scalar_lea.vmem %s7303_s19, 32 }
  0x60   : > { %p6769_p5 = scmp.ne.s32.totalorder %s7303_s19, %s6768_s17  ;;  %p6776_p10 = scmp.lt.s32.totalorder %s7303_s19, %s7303_s19 }
  0x61   : > { %p6777_p11 = scmp.lt.s32.totalorder %s6775_s0, %s6768_s17 }
  0x62   : > { %p6771_p7 = pnand %p6769_p5, %p7313_p8 }
  0x63   : > { %p6778_p12 = por %p6777_p11, %p6776_p10 }
  0x64   : > { %p6772_p9 = pneg %p6771_p7 }
  0x66   : > { %p6779_p4 = pnand %p6778_p12, %p6772_p9 }
  0x68   : > { %6782 = shalt.err (!%p6779_p4)
}
  0x69   : > { %6248 = dma.hbm_to_vmem [thread:$0]  (!%p7299_p6), %s9239_s5, 16, %s7303_s19, [#allocation12]  }
  0x6a   : > { %s7160_s23 = smov [#allocation14]   ;;  %s7161_s29 = smov [#allocation17]  }
  0x6b   : > { %s426_s24 = sshll.u32 %s7160_s23, 4  ;;  %s450_s18 = sshll.u32 %s7161_s29, 4  ;;  %s427_s24 = int_to_ptr.vmem [resolvable:$true] %s426_s24  ;;  %s451_s18 = int_to_ptr.vmem [resolvable:$true] %s450_s18 }
  0x6c   : > { %s9240_s7 = sld [smem:[#allocation94_spill]] }
  0x72   : > { %s6783_s30 = scalar_lea.hbm %s9240_s7, 2048 }
  0x73   : > { %p6784_p13 = scmp.ne.s32.totalorder %s9240_s7, %s6783_s30  ;;  %p6790_p5 = scmp.lt.u32.totalorder %s6783_s30, %s9240_s7 }
  0x75   : > { %p6786_p0 = pnand %p6784_p13, %p7313_p8 }
  0x77   : > { %p6787_p2 = pneg %p6786_p0 }
  0x79   : > { %p6792_p7 = pnand %p6790_p5, %p6787_p2 }
  0x7b   : > { %6795 = shalt.err (!%p6792_p7)
}
  0x7c   : > { %s6796_s19 = scalar_lea.vmem %s427_s24, 2048  ;;  %p6804_p12 = scmp.lt.s32.totalorder %s427_s24, %s427_s24 }
  0x7d   : > { %p6797_p9 = scmp.ne.s32.totalorder %s427_s24, %s6796_s19  ;;  %p6805_p4 = scmp.lt.s32.totalorder %s6796_s19, %s6796_s19 }
  0x7f   : > { %p6799_p10 = pnand %p6797_p9, %p7313_p8  ;;  %p6806_p1 = por %p6805_p4, %p6804_p12 }
  0x81   : > { %p6800_p11 = pneg %p6799_p10 }
  0x83   : > { %p6807_p3 = pnand %p6806_p1, %p6800_p11 }
  0x85   : > { %6810 = shalt.err (!%p6807_p3)
}
  0x86   : > { %s9151_s13 = smov 128   ;;  %s9153_s23 = smov 8  }
  0x87   : > { %6254 = dma.hbm_to_vmem [thread:$0]  (!%p7299_p6), %s9240_s7, 2048, %s427_s24, [#allocation15], %s9151_s13, %s9151_s13, %s9153_s23  }
  0x88   : > { %s9241_s9 = sld [smem:[#allocation95_spill]] }
  0x8e   : > { %s6811_s30 = scalar_lea.hbm %s9241_s9, 16384 }
  0x8f   : > { %p6812_p1 = scmp.ne.s32.totalorder %s9241_s9, %s6811_s30  ;;  %p6818_p0 = scmp.lt.u32.totalorder %s6811_s30, %s9241_s9 }
  0x91   : > { %p6814_p3 = pnand %p6812_p1, %p7313_p8 }
  0x93   : > { %p6815_p13 = pneg %p6814_p3 }
  0x95   : > { %p6820_p2 = pnand %p6818_p0, %p6815_p13 }
  0x97   : > { %6823 = shalt.err (!%p6820_p2)
}
  0x98   : > { %s6824_s1 = scalar_lea.vmem %s451_s18, 16384  ;;  %p6832_p10 = scmp.lt.s32.totalorder %s451_s18, %s451_s18 }
  0x99   : > { %p6825_p5 = scmp.ne.s32.totalorder %s451_s18, %s6824_s1  ;;  %p6833_p11 = scmp.lt.s32.totalorder %s6824_s1, %s6824_s1 }
  0x9b   : > { %p6827_p7 = pnand %p6825_p5, %p7313_p8  ;;  %p6834_p12 = por %p6833_p11, %p6832_p10 }
  0x9d   : > { %p6828_p9 = pneg %p6827_p7 }
  0x9f   : > { %p6835_p4 = pnand %p6834_p12, %p6828_p9 }
  0xa1   : > { %6838 = shalt.err (!%p6835_p4)
}
  0xa2   : > { %s7164_s24 = smov 256   ;;  %s9155_s29 = smov 16  }
  0xa3   : > { %6260 = dma.hbm_to_vmem [thread:$0]  (!%p7299_p6), %s9241_s9, 16384, %s451_s18, [#allocation18], %s7164_s24, %s7164_s24, %s9155_s29  }
  0xa4   : > { %s7166_s30 = smov [#allocation20]   ;;  %s7167_s0 = smov [#allocation7]  }
  0xa5   : > { %s476_s17 = sshll.u32 %s7166_s30, 4  ;;  %s367_s15 = sshll.u32 %s7167_s0, 4  ;;  %s477_s17 = int_to_ptr.vmem [resolvable:$true] %s476_s17  ;;  %s368_s15 = int_to_ptr.vmem [resolvable:$true] %s367_s15 }
  0xa6   : > { %s9242_s11 = sld [smem:[#allocation96_spill]] }
  0xac   : > { %s6839_s13 = scalar_lea.hbm %s9242_s11, 16384 }
  0xad   : > { %p6840_p1 = scmp.ne.s32.totalorder %s9242_s11, %s6839_s13  ;;  %p6846_p0 = scmp.lt.u32.totalorder %s6839_s13, %s9242_s11 }
  0xaf   : > { %p6842_p3 = pnand %p6840_p1, %p7313_p8 }
  0xb1   : > { %p6843_p13 = pneg %p6842_p3 }
  0xb3   : > { %p6848_p2 = pnand %p6846_p0, %p6843_p13 }
  0xb5   : > { %6851 = shalt.err (!%p6848_p2)
}
  0xb6   : > { %s6852_s18 = scalar_lea.vmem %s477_s17, 16384  ;;  %p6860_p10 = scmp.lt.s32.totalorder %s477_s17, %s477_s17 }
  0xb7   : > { %p6853_p5 = scmp.ne.s32.totalorder %s477_s17, %s6852_s18  ;;  %p6861_p11 = scmp.lt.s32.totalorder %s6852_s18, %s6852_s18 }
  0xb9   : > { %p6855_p7 = pnand %p6853_p5, %p7313_p8  ;;  %p6862_p12 = por %p6861_p11, %p6860_p10 }
  0xbb   : > { %p6856_p9 = pneg %p6855_p7 }
  0xbd   : > { %p6863_p4 = pnand %p6862_p12, %p6856_p9 }
  0xbf   : > { %6866 = shalt.err (!%p6863_p4)
}
  0xc0   : > { %s9243_s3 = smov 8   ;;  %s9244_s23 = smov 128  }
  0xc1   : > { %6266 = dma.hbm_to_vmem [thread:$0]  (!%p7299_p6), %s9242_s11, 16384, %s477_s17, [#allocation21], %s9244_s23, %s9244_s23, %s9243_s3  }
  0xc2   : > { %s6867_s21 = scalar_lea.hbm %s9134_s2, 6144 }
  0xc3   : > { %p6868_p1 = scmp.ne.s32.totalorder %s9134_s2, %s6867_s21  ;;  %p6874_p0 = scmp.lt.u32.totalorder %s6867_s21, %s9134_s2 }
  0xc5   : > { %p6870_p3 = pnand %p6868_p1, %p7313_p8 }
  0xc7   : > { %p6871_p13 = pneg %p6870_p3 }
  0xc9   : > { %p6876_p2 = pnand %p6874_p0, %p6871_p13 }
  0xcb   : > { %6879 = shalt.err (!%p6876_p2)
}
  0xcc   : > { %s6880_s1 = scalar_lea.vmem %s368_s15, 6144  ;;  %p6888_p10 = scmp.lt.s32.totalorder %s368_s15, %s368_s15 }
  0xcd   : > { %p6881_p5 = scmp.ne.s32.totalorder %s368_s15, %s6880_s1  ;;  %p6889_p11 = scmp.lt.s32.totalorder %s6880_s1, %s6880_s1 }
  0xcf   : > { %p6883_p7 = pnand %p6881_p5, %p7313_p8  ;;  %p6890_p12 = por %p6889_p11, %p6888_p10 }
  0xd1   : > { %p6884_p9 = pneg %p6883_p7 }
  0xd3   : > { %p6891_p4 = pnand %p6890_p12, %p6884_p9 }
  0xd5   : > { %6894 = shalt.err (!%p6891_p4)
}
  0xd6   : > { %s7168_s17 = smov 384   ;;  %s7169_s18 = smov 24  }
  0xd7   : > { %6239 = dma.hbm_to_vmem [thread:$0]  (!%p7299_p6), %s9134_s2, 6144, %s368_s15, [#allocation6], %s7168_s17, %s7168_s17, %s7169_s18  }
  0xd8   : > { %s7170_s13 = smov [#allocation10]   ;;  %s7171_s21 = smov [#allocation13]  }
  0xd9   : > { %s391_s24 = sshll.u32 %s7170_s13, 4  ;;  %s416_s22 = sshll.u32 %s7171_s21, 4  ;;  %s392_s24 = int_to_ptr.vmem [resolvable:$true] %s391_s24  ;;  %s417_s22 = int_to_ptr.vmem [resolvable:$true] %s416_s22 }
  0xda   : > { %s6895_s19 = scalar_lea.hbm %s9136_s4, 2048 }
  0xdb   : > { %p6896_p1 = scmp.ne.s32.totalorder %s9136_s4, %s6895_s19  ;;  %p6902_p0 = scmp.lt.u32.totalorder %s6895_s19, %s9136_s4 }
  0xdd   : > { %p6898_p3 = pnand %p6896_p1, %p7313_p8 }
  0xdf   : > { %p6899_p13 = pneg %p6898_p3 }
  0xe1   : > { %p6904_p2 = pnand %p6902_p0, %p6899_p13 }
  0xe3   : > { %6907 = shalt.err (!%p6904_p2)
}
  0xe4   : > { %s6908_s15 = scalar_lea.vmem %s392_s24, 2048  ;;  %p6916_p10 = scmp.lt.s32.totalorder %s392_s24, %s392_s24 }
  0xe5   : > { %p6909_p5 = scmp.ne.s32.totalorder %s392_s24, %s6908_s15  ;;  %p6917_p11 = scmp.lt.s32.totalorder %s6908_s15, %s6908_s15 }
  0xe7   : > { %p6911_p7 = pnand %p6909_p5, %p7313_p8  ;;  %p6918_p12 = por %p6917_p11, %p6916_p10 }
  0xe9   : > { %p6912_p9 = pneg %p6911_p7 }
  0xeb   : > { %p6919_p4 = pnand %p6918_p12, %p6912_p9 }
  0xed   : > { %6922 = shalt.err (!%p6919_p4)
}
  0xee   : > { %6245 = dma.hbm_to_vmem [thread:$0]  (!%p7299_p6), %s9136_s4, 2048, %s392_s24, [#allocation9], %s9244_s23, %s9244_s23, %s9243_s3  }
  0xef   : > { %s6923_s18 = scalar_lea.hbm %s9138_s6, 16 }
  0xf0   : > { %p6924_p1 = scmp.ne.s32.totalorder %s9138_s6, %s6923_s18  ;;  %p6930_p0 = scmp.lt.u32.totalorder %s6923_s18, %s9138_s6 }
  0xf2   : > { %p6926_p3 = pnand %p6924_p1, %p7313_p8 }
  0xf4   : > { %p6927_p13 = pneg %p6926_p3 }
  0xf6   : > { %p6932_p2 = pnand %p6930_p0, %p6927_p13 }
  0xf8   : > { %6935 = shalt.err (!%p6932_p2)
}
  0xf9   : > { %s6936_s30 = scalar_lea.vmem %s417_s22, 16  ;;  %s6943_s24 = scalar_lea.vmem %s417_s22, 32 }
  0xfa   : > { %p6937_p5 = scmp.ne.s32.totalorder %s417_s22, %s6936_s30  ;;  %p6944_p10 = scmp.lt.s32.totalorder %s417_s22, %s417_s22 }
  0xfb   : > { %p6945_p11 = scmp.lt.s32.totalorder %s6943_s24, %s6936_s30 }
  0xfc   : > { %p6939_p7 = pnand %p6937_p5, %p7313_p8 }
  0xfd   : > { %p6946_p12 = por %p6945_p11, %p6944_p10 }
  0xfe   : > { %p6940_p9 = pneg %p6939_p7 }
 0x100   : > { %p6947_p4 = pnand %p6946_p12, %p6940_p9 }
 0x102   : > { %6950 = shalt.err (!%p6947_p4)
}
 0x103   : > { %6251 = dma.hbm_to_vmem [thread:$0]  (!%p7299_p6), %s9138_s6, 16, %s417_s22, [#allocation12]  }
 0x104   : > { %s7172_s1 = smov [#allocation16]   ;;  %s7173_s9 = smov [#allocation19]  }
 0x105   : > { %s440_s15 = sshll.u32 %s7172_s1, 4  ;;  %s463_s11 = sshll.u32 %s7173_s9, 4  ;;  %s441_s15 = int_to_ptr.vmem [resolvable:$true] %s440_s15  ;;  %s464_s11 = int_to_ptr.vmem [resolvable:$true] %s463_s11 }
 0x106   : > { %s6951_s18 = scalar_lea.hbm %s9140_s8, 16 }
 0x107   : > { %p6952_p1 = scmp.ne.s32.totalorder %s9140_s8, %s6951_s18  ;;  %p6958_p0 = scmp.lt.u32.totalorder %s6951_s18, %s9140_s8 }
 0x109   : > { %p6954_p3 = pnand %p6952_p1, %p7313_p8 }
 0x10b   : > { %p6955_p13 = pneg %p6954_p3 }
 0x10d   : > { %p6960_p2 = pnand %p6958_p0, %p6955_p13 }
 0x10f   : > { %6963 = shalt.err (!%p6960_p2)
}
 0x110   : > { %s6964_s22 = scalar_lea.vmem %s441_s15, 16  ;;  %s6971_s30 = scalar_lea.vmem %s441_s15, 32 }
 0x111   : > { %p6965_p5 = scmp.ne.s32.totalorder %s441_s15, %s6964_s22  ;;  %p6972_p10 = scmp.lt.s32.totalorder %s441_s15, %s441_s15 }
 0x112   : > { %p6973_p11 = scmp.lt.s32.totalorder %s6971_s30, %s6964_s22 }
 0x113   : > { %p6967_p7 = pnand %p6965_p5, %p7313_p8 }
 0x114   : > { %p6974_p12 = por %p6973_p11, %p6972_p10 }
 0x115   : > { %p6968_p9 = pneg %p6967_p7 }
 0x117   : > { %p6975_p4 = pnand %p6974_p12, %p6968_p9 }
 0x119   : > { %6978 = shalt.err (!%p6975_p4)
}
 0x11a   : > { %6257 = dma.hbm_to_vmem [thread:$0]  (!%p7299_p6), %s9140_s8, 16, %s441_s15, [#allocation15]  }
 0x11b   : > { %s6979_s9 = scalar_lea.hbm %s9142_s10, 128 }
 0x11c   : > { %p6980_p1 = scmp.ne.s32.totalorder %s9142_s10, %s6979_s9  ;;  %p6986_p0 = scmp.lt.u32.totalorder %s6979_s9, %s9142_s10 }
 0x11e   : > { %p6982_p3 = pnand %p6980_p1, %p7313_p8 }
 0x120   : > { %p6983_p13 = pneg %p6982_p3 }
 0x122   : > { %p6988_p2 = pnand %p6986_p0, %p6983_p13 }
 0x124   : > { %6991 = shalt.err (!%p6988_p2)
}
 0x125   : > { %s6992_s7 = scalar_lea.vmem %s464_s11, 128  ;;  %p7000_p10 = scmp.lt.s32.totalorder %s464_s11, %s464_s11 }
 0x126   : > { %p6993_p5 = scmp.ne.s32.totalorder %s464_s11, %s6992_s7  ;;  %p7001_p11 = scmp.lt.s32.totalorder %s6992_s7, %s6992_s7 }
 0x128   : > { %p6995_p7 = pnand %p6993_p5, %p7313_p8  ;;  %p7002_p12 = por %p7001_p11, %p7000_p10 }
 0x12a   : > { %p6996_p9 = pneg %p6995_p7 }
 0x12c   : > { %p7003_p4 = pnand %p7002_p12, %p6996_p9 }
 0x12e   : > { %7006 = shalt.err (!%p7003_p4)
}
 0x12f   : > { %s7174_s15 = smov 32   ;;  %s7175_s13 = smov 2  }
 0x130   : > { %6263 = dma.hbm_to_vmem [thread:$0]  (!%p7299_p6), %s9142_s10, 128, %s464_s11, [#allocation18], %s7174_s15, %s7174_s15, %s7175_s13  }
 0x131   : > { %s7176_s30 = smov [#allocation22]   ;;  %s7007_s1 = scalar_lea.hbm %s9144_s12, 64 }
 0x132   : > { %s489_s24 = sshll.u32 %s7176_s30, 4  ;;  %p7008_p1 = scmp.ne.s32.totalorder %s9144_s12, %s7007_s1  ;;  %s490_s24 = int_to_ptr.vmem [resolvable:$true] %s489_s24 }
 0x133   : > { %p7014_p0 = scmp.lt.u32.totalorder %s7007_s1, %s9144_s12 }
 0x134   : > { %p7010_p3 = pnand %p7008_p1, %p7313_p8 }
 0x136   : > { %p7011_p13 = pneg %p7010_p3 }
 0x138   : > { %p7016_p2 = pnand %p7014_p0, %p7011_p13 }
 0x13a   : > { %7019 = shalt.err (!%p7016_p2)
}
 0x13b   : > { %s7020_s11 = scalar_lea.vmem %s490_s24, 64  ;;  %p7028_p10 = scmp.lt.s32.totalorder %s490_s24, %s490_s24 }
 0x13c   : > { %p7021_p5 = scmp.ne.s32.totalorder %s490_s24, %s7020_s11  ;;  %p7029_p11 = scmp.lt.s32.totalorder %s7020_s11, %s7020_s11 }
 0x13e   : > { %p7023_p7 = pnand %p7021_p5, %p7313_p8  ;;  %p7030_p12 = por %p7029_p11, %p7028_p10 }
 0x140   : > { %p7024_p9 = pneg %p7023_p7 }
 0x142   : > { %p7031_p4 = pnand %p7030_p12, %p7024_p9 }
 0x144   : > { %7034 = shalt.err (!%p7031_p4)
}
 0x145   : > { %s7177_s5 = smov 1   ;;  %s9245_s7 = smov 16  }
 0x146   : > { %6269 = dma.hbm_to_vmem [thread:$0]  (!%p7299_p6), %s9144_s12, 64, %s490_s24, [#allocation21], %s9245_s7, %s9245_s7, %s7177_s5  }
 0x147   : > { %s5091_s20 = sadd.s32 4294967294, %s7155_s28   ;;  %s7559_s16 = sadd.s32 1, %s7155_s28  }
 0x148   : > { %s42_s21 = sadd.s32 1, %s7151_s27  ;;  %s39_s22 = ssub.s32 %s7155_s28, %s7559_s16 }
 0x149   : > { %p49_p8 = scmp.ne.s32.totalorder %s7151_s27, %s7147_s26  ;;  %p40_p1 = scmp.eq.s32.totalorder %s39_s22, 0 }
 0x14a   : > { %p50_p3 = scmp.eq.s32.totalorder %s7155_s28, 0  ;;  %p55_p13 = scmp.ne.s32.totalorder %s7147_s26, %s7143_s25 }
 0x14b   : > { %p331_p0 = scmp.eq.s32.totalorder %s7281_s14, 1  ;;  %p9246_p5 = scmp.eq.s32.totalorder %s7281_s14, 0 }
 0x14c   : > { %s7571_s30 = scalar_select %p40_p1, %s7151_s27, %s42_s21  }
 0x14d   : > { %p51_p2 = por %p50_p3, %p49_p8  ;;  %p7575_p7 = por %p9246_p5, %p55_p13 }
 0x14e   : > { %p7579_p6 = por %p331_p0, %p49_p8  ;;  %p337_p9 = scmp.eq.s32.totalorder %s5091_s20, 1 }
 0x14f   : > { %p6290_p10 = scmp.lt.s32.totalorder %s7155_s28, 2  ;;  %s503_s19 = sand.u32 1, %s7151_s27  }
 0x150   : > { %s9248_s24 = scalar_select %p7579_p6, 1, 0 }
 0x151   : > { %p7585_p11 = por %p337_p9, %p55_p13  ;;  %s5106_s9 = sshll.u32 %s503_s19, 5 }
 0x152   : > { %s5188_s29 = sshll.u32 %s7155_s28, 9  ;;  %s9250_s11 = sld [smem:[#allocation90_spill]] }
 0x153   : > { %s9249_s1 = scalar_select %p7585_p11, 1, 0 }
 0x154   : > { %s507_s7 = scalar_lea.vmem [#allocation2], %s5106_s9  ;;  %p7595_p12 = pnand %p6290_p10, %p51_p2 }
 0x155   : > { %s515_s15 = sshll.u32 %s507_s7, 4  ;;  %s7601_s20 = scalar_lea.sflag [#allocation3], %s503_s19  ;;  %s7599_s15 = int_to_ptr.vmem [resolvable:$true] %s515_s15 }
 0x156   : > { %p7037_p8 = pneg %p7595_p12 }
 0x158   : > { %s7593_s5 = scalar_lea.hbm %s9250_s11, %s5188_s29  ;;  %s7040_s29 = scalar_lea.hbm %s9250_s11, 1024 }
 0x159   : > { %s7035_s21 = scalar_lea.hbm %s7593_s5, 512  ;;  %p7041_p13 = scmp.lt.u32.totalorder %s7593_s5, %s9250_s11 }
 0x15a   : > { %p7036_p4 = scmp.ne.s32.totalorder %s7593_s5, %s7035_s21  ;;  %p7042_p0 = scmp.lt.u32.totalorder %s7040_s29, %s7035_s21 }
 0x15b   : > { %p7044_p5 = scmp.lt.u32.totalorder %s7035_s21, %s7593_s5 }
 0x15c   : > { %p7038_p1 = pnand %p7037_p8, %p7036_p4  ;;  %p7043_p2 = por %p7042_p0, %p7041_p13 }
 0x15e   : > { %p7039_p3 = pneg %p7038_p1  ;;  %p7045_p9 = por %p7044_p5, %p7043_p2 }
 0x160   : > { %p7046_p10 = pnand %p7045_p9, %p7039_p3 }
 0x162   : > { %7049 = shalt.err (!%p7046_p10)
}
 0x163   : > { %s7050_s19 = scalar_lea.vmem %s7599_s15, 512  ;;  %s7178_s7 = smov [#allocation2]  }
 0x164   : > { %p7051_p4 = scmp.ne.s32.totalorder %s7599_s15, %s7050_s19  ;;  %s7055_s22 = sshll.u32 %s7178_s7, 4  ;;  %s7056_s22 = int_to_ptr.vmem [resolvable:$false] %s7055_s22 }
 0x165   : > { %s7057_s9 = scalar_lea.vmem %s7056_s22, 1024  ;;  %p7058_p6 = scmp.lt.s32.totalorder %s7599_s15, %s7056_s22 }
 0x166   : > { %p7053_p1 = pnand %p7051_p4, %p7037_p8  ;;  %p7059_p13 = scmp.lt.s32.totalorder %s7057_s9, %s7050_s19 }
 0x168   : > { %p7054_p11 = pneg %p7053_p1  ;;  %p7060_p0 = por %p7059_p13, %p7058_p6 }
 0x16a   : > { %p7061_p2 = pnand %p7060_p0, %p7054_p11 }
 0x16c   : > { %7064 = shalt.err (!%p7061_p2)
}
 0x16d   : > { %6273 = dma.hbm_to_vmem [thread:$0]  (!%p7595_p12), %s7593_s5, 512, %s7599_s15, %s7601_s20, %s9244_s23, %s9244_s23, %s9243_s3  }
 0x16e   : > { %s9252_s21 = sld [smem:[#allocation32_spill]] }
 0x174   : > { %p9253_p8 = scmp.ne.s32.totalorder %s9252_s21, 0 }
 0x176   : > { %527 = sbr.rel (%p9253_p8) target bundleno = 5627 (0x15fb), region = 72 }
 0x17d   : > { %s7635_s29 = sand.u32 1, %s7147_s26  }
 0x17e   : > { %s5111_s17 = sshll.u32 %s7635_s29, 5  ;;  %s530_s18 = scalar_lea.sflag [#allocation3], %s7635_s29 }
 0x17f   : > { %s7641_s13 = scalar_lea.vmem [#allocation2], %s5111_s17 }
 0x180   : > { %7110 = dma.done.wait (%p7575_p7), %s530_s18, 512  }
 0x181   : > { %7112 = vsyncadd (%p7575_p7), %s530_s18, 4294966784  ;;  %p9254_p6 = scmp.eq.s32.totalorder %s7281_s14, 0 }
 0x183   : > { %7114 = dma.done.wait (%p9254_p6), [#allocation6], 6160   ;;  %p9255_p11 = pmov %p9254_p6 }
 0x184   : > { %p9256_p12 = pmov %p9254_p6 }
 0x185   : > { %7116 = vsyncadd (%p9255_p11), [#allocation6], 4294961136 }
 0x186   : > { %7118 = dma.done.wait (%p9256_p12), [#allocation9], 2096   ;;  %p9257_p3 = pmov %p9254_p6 }
 0x188   : > { %7120 = vsyncadd (%p9257_p3), [#allocation9], 4294965200  ;;  %p9258_p5 = pmov %p9257_p3 }
 0x189   : > { %p9259_p9 = pmov %p9257_p3 }
 0x18a   : > { %7122 = dma.done.wait (%p9258_p5), [#allocation12], 32  }
 0x18b   : > { %7124 = vsyncadd (%p9259_p9), [#allocation12], 4294967264  ;;  %p9260_p7 = pmov %p9257_p3 }
 0x18c   : > { %p9261_p10 = pmov %p9257_p3 }
 0x18d   : > { %7126 = dma.done.wait (%p9260_p7), [#allocation15], 2064  }
 0x18e   : > { %7128 = vsyncadd (%p9261_p10), [#allocation15], 4294965232  ;;  %p9262_p4 = pmov %p9257_p3 }
 0x18f   : > { %p9263_p1 = pmov %p9257_p3 }
 0x190   : > { %7130 = dma.done.wait (%p9262_p4), [#allocation18], 16512  }
 0x191   : > { %7132 = vsyncadd (%p9263_p1), [#allocation18], 4294950784  ;;  %p9264_p13 = pmov %p9263_p1 }
 0x192   : > { %p9265_p0 = pmov %p9263_p1 }
 0x193   : > { %7134 = dma.done.wait (%p9264_p13), [#allocation21], 16448  }
 0x194   : > { %7136 = vsyncadd (%p9265_p0), [#allocation21], 4294950848  ;;  %v7672_v0 = vld [vmem:[%s7641_s13] sm:$0xff]  ;;  %v7675_v1 = vld [vmem:[%s7641_s13 + $0x8] sm:$0xff]  ;;  %v7179_v62 = vmov 0.0   ;;  %vm909_vm0 = vcmask 261120  }
 0x195   : > { %v671_v2 = vld [vmem:[#allocation7 + $0x8] sm:$0xff]  ;;  %v631_v3 = vmul.f32 %v7672_v0, %v7672_v0  ;;  %v674_v4 = vld [vmem:[#allocation7 + $0x20] sm:$0xff]  ;;  %v673_v6 = vld [vmem:[#allocation7 + $0x18] sm:$0xff]  ;;  %v632_v12 = vmul.f32 %v7675_v1, %v7675_v1  ;;  %799 = vmatprep.mubr.f32.mxu0 %v7179_v62  ;;  %s7180_s3 = smov 96   ;;  %s7181_s23 = smov 64   ;;  %vm999_vm2 = vcmask 130048  }
 0x196   : > { %v670_v5 = vld [vmem:[#allocation7] sm:$0xff]  ;;  %v5717_v7 = vpack.c.bf16 %v674_v4, %v671_v2  ;;  %v677_v9 = vld [vmem:[#allocation7 + $0x38] sm:$0xff]  ;;  %v680_v10 = vld [vmem:[#allocation7 + $0x50] sm:$0xff]  ;;  %s7182_s0 = smov 32   ;;  %vm1737_vm3 = vcmask 523264   ;;  %vm1740_vm4 = vcmask 785408  }
 0x197   : > { %v5719_v8 = vpack.c.bf16 %v673_v6, %v670_v5  ;;  %v672_v11 = vld [vmem:[#allocation7 + $0x10] sm:$0xff]  ;;  %635 = vadd.xlane.f32.xlu0 %v631_v3  ;;  %v5721_v13 = vpack.c.bf16 %v680_v10, %v677_v9  ;;  %v675_v14 = vld [vmem:[#allocation7 + $0x28] sm:$0xff]  ;;  %v686_v19 = vld [vmem:[#allocation7 + $0x80] sm:$0xff]  ;;  %vm2832_vm5 = vcmask 31744   ;;  %s9066_s5 = scalar_lea.vmem [#allocation23], %s5111_s17  ;;  %s5190_s15 = sshll.u32 %s7281_s14, 9 }
 0x198   : > { %v676_v15 = vld [vmem:[#allocation7 + $0x30] sm:$0xff]  ;;  %v679_v16 = vld [vmem:[#allocation7 + $0x48] sm:$0xff]  ;;  %5718 = vmatprep.subr.bf16.mxu0 %v5717_v7  ;;  %v5749_v17 = vpack.c.bf16 %v675_v14, %v672_v11  ;;  %v678_v20 = vld [vmem:[#allocation7 + $0x40] sm:$0xff]  ;;  %s4904_s20 = sshll.u32 %s9066_s5, 4  ;;  %s9456_s22 = sld [smem:[#allocation97_spill]]  ;;  %s9086_s20 = int_to_ptr.vmem [resolvable:$true] %s4904_s20 }
 0x199   : > { %v683_v18 = vld [vmem:[#allocation7 + $0x68] sm:$0xff]  ;;  %5720 = vmatpush1.bf16.msra.mxu0 %v5719_v8  ;;  %v5723_v21 = vpack.c.bf16 %v679_v16, %v676_v15  ;;  %v681_v22 = vld [vmem:[#allocation7 + $0x58] sm:$0xff]  ;;  %v682_v25 = vld [vmem:[#allocation7 + $0x60] sm:$0xff]  ;;  %s4890_s21 = scalar_lea.sflag [#allocation4], %s7635_s29  ;;  %s7065_s17 = scalar_lea.vmem %s9086_s20, 512 }
 0x19a   : > { %5722 = vmatprep.subr.bf16.mxu0 %v5721_v13  ;;  %5750 = vmatprep.subr.bf16.mxu1 %v5749_v17  ;;  %v5725_v23 = vpack.c.bf16 %v686_v19, %v683_v18  ;;  %v5753_v24 = vpack.c.bf16 %v681_v22, %v678_v20  ;;  %v685_v26 = vld [vmem:[#allocation7 + $0x78] sm:$0xff]  ;;  %v684_v27 = vld [vmem:[#allocation7 + $0x70] sm:$0xff]  ;;  %v687_v30 = vld [vmem:[#allocation7 + $0x88] sm:$0xff]  ;;  %p7066_p2 = scmp.ne.s32.totalorder %s9086_s20, %s7065_s17  ;;  %p9458_p8 = scmp.ne.s32.totalorder %s9248_s24, 0 }
 0x19b   : > { %637 = vadd.xlane.f32.xlu0 %v632_v12  ;;  %5752 = vmatpush3.bf16.msra.mxu1 %v5749_v17  ;;  %v689_v28 = vld [vmem:[#allocation7 + $0x98] sm:$0xff]  ;;  %v692_v29 = vld [vmem:[#allocation7 + $0xb0] sm:$0xff]  ;;  %v5757_v31 = vpack.c.bf16 %v687_v30, %v684_v27  ;;  %v5727_v32 = vpack.c.bf16 %v685_v26, %v682_v25  ;;  %v691_v35 = vld [vmem:[#allocation7 + $0xa8] sm:$0xff]  ;;  %s7187_s14 = smov [#allocation23]  }
 0x19c   : > { %5754 = vmatprep.subr.bf16.mxu1 %v5753_v24  ;;  %v5729_v33 = vpack.c.bf16 %v692_v29, %v689_v28  ;;  %v688_v34 = vld [vmem:[#allocation7 + $0x90] sm:$0xff]  ;;  %v695_v37 = vld [vmem:[#allocation7 + $0xc8] sm:$0xff]  ;;  %v698_v38 = vld [vmem:[#allocation7 + $0xe0] sm:$0xff]  ;;  %p7067_p6 = pnand %p7066_p2, %p9458_p8  ;;  %s7069_s18 = sshll.u32 %s7187_s14, 4  ;;  %s7070_s18 = int_to_ptr.vmem [resolvable:$false] %s7069_s18 }
 0x19d   : > { %5724 = vmatpush1.bf16.msra.mxu0 %v5723_v21  ;;  %v5731_v36 = vpack.c.bf16 %v691_v35, %v688_v34  ;;  %v690_v39 = vld [vmem:[#allocation7 + $0xa0] sm:$0xff]  ;;  %v5733_v40 = vpack.c.bf16 %v698_v38, %v695_v37  ;;  %v693_v41 = vld [vmem:[#allocation7 + $0xb8] sm:$0xff]  ;;  %v704_v47 = vld [vmem:[#allocation7 + $0x110] sm:$0xff]  ;;  %p7072_p12 = scmp.lt.s32.totalorder %s9086_s20, %s7070_s18 }
 0x19e   : > { %5726 = vmatprep.subr.bf16.mxu0 %v5725_v23  ;;  %v694_v42 = vld [vmem:[#allocation7 + $0xc0] sm:$0xff]  ;;  %v697_v43 = vld [vmem:[#allocation7 + $0xd8] sm:$0xff]  ;;  %v5761_v44 = vpack.c.bf16 %v693_v41, %v690_v39  ;;  %v696_v48 = vld [vmem:[#allocation7 + $0xd0] sm:$0xff]  ;;  %s9084_s9 = scalar_lea.hbm %s9456_s22, %s5190_s15  ;;  %p7068_p11 = pneg %p7067_p6 }
 0x19f   : > { %5756 = vmatpush3.bf16.msra.mxu1 %v5753_v24  ;;  %v5735_v45 = vpack.c.bf16 %v697_v43, %v694_v42  ;;  %v701_v46 = vld [vmem:[#allocation7 + $0xf8] sm:$0xff]  ;;  %v699_v50 = vld [vmem:[#allocation7 + $0xe8] sm:$0xff]  ;;  %v700_v51 = vld [vmem:[#allocation7 + $0xf0] sm:$0xff]  ;;  %v720_v42 = vlaneseq }
 0x1a0   : > { %5758 = vmatprep.subr.bf16.mxu1 %v5757_v31  ;;  %v5737_v49 = vpack.c.bf16 %v704_v47, %v701_v46  ;;  %v703_v52 = vld [vmem:[#allocation7 + $0x108] sm:$0xff]  ;;  %v5765_v53 = vpack.c.bf16 %v699_v50, %v696_v48  ;;  %v710_v56 = vld [vmem:[#allocation7 + $0x140] sm:$0xff]  ;;  %v705_v59 = vld [vmem:[#allocation7 + $0x118] sm:$0xff] }
 0x1a1   : > { %5728 = vmatpush1.bf16.msra.mxu0 %v5727_v32  ;;  %v5739_v54 = vpack.c.bf16 %v703_v52, %v700_v51  ;;  %v707_v55 = vld [vmem:[#allocation7 + $0x128] sm:$0xff]  ;;  %v702_v57 = vld [vmem:[#allocation7 + $0x100] sm:$0xff]  ;;  %v709_v61 = vld [vmem:[#allocation7 + $0x138] sm:$0xff]  ;;  %v721_v43 = vshrl.u32 %v720_v42, 7 }
 0x1a2   : > { %5730 = vmatprep.subr.bf16.mxu0 %v5729_v33  ;;  %v5741_v58 = vpack.c.bf16 %v710_v56, %v707_v55  ;;  %v706_v60 = vld [vmem:[#allocation7 + $0x120] sm:$0xff]  ;;  %v5769_v63 = vpack.c.bf16 %v705_v59, %v702_v57  ;;  %v713_v3 = vld [vmem:[#allocation7 + $0x158] sm:$0xff]  ;;  %v716_v4 = vld [vmem:[#allocation7 + $0x170] sm:$0xff] }
 0x1a3   : > { %5760 = vmatpush3.bf16.msra.mxu1 %v5757_v31  ;;  %v5743_v2 = vpack.c.bf16 %v709_v61, %v706_v60  ;;  %v708_v5 = vld [vmem:[#allocation7 + $0x130] sm:$0xff]  ;;  %v5745_v6 = vpack.c.bf16 %v716_v4, %v713_v3  ;;  %v711_v7 = vld [vmem:[#allocation7 + $0x148] sm:$0xff]  ;;  %v714_v12 = vld [vmem:[#allocation7 + $0x160] sm:$0xff]  ;;  %v730_v47 = vsub.s32 2, %v721_v43  ;;  %v7694_v48 = vsub.s32 1, %v721_v43 }
 0x1a4   : > { %5762 = vmatprep.subr.bf16.mxu1 %v5761_v44  ;;  %v712_v8 = vld [vmem:[#allocation7 + $0x150] sm:$0xff]  ;;  %v715_v9 = vld [vmem:[#allocation7 + $0x168] sm:$0xff]  ;;  %v5773_v10 = vpack.c.bf16 %v711_v7, %v708_v5  ;;  %v717_v13 = vld [vmem:[#allocation7 + $0x178] sm:$0xff] }
 0x1a5   : > { %5732 = vmatpush1.bf16.msra.mxu0 %v5731_v36  ;;  %v5747_v11 = vpack.c.bf16 %v715_v9, %v712_v8  ;;  %v5777_v14 = vpack.c.bf16 %v717_v13, %v714_v12  ;;  %v628_v15 = vld [vmem:[%s7641_s13 + $0x10] sm:$0xff]  ;;  %v629_v16 = vld [vmem:[%s7641_s13 + $0x18] sm:$0xff]  ;;  %v5125_v26 = vld [vmem:[#allocation5] ss:$0 sm:$0xff] }
 0x1a6   : > { %5734 = vmatprep.subr.bf16.mxu0 %v5733_v40  ;;  %v633_v17 = vmul.f32 %v628_v15, %v628_v15  ;;  %v634_v18 = vmul.f32 %v629_v16, %v629_v16  ;;  %vm7708_vm1 = vmpackc.low %vm909_vm0, %vm909_vm0 }
 0x1a7   : > { %5764 = vmatpush3.bf16.msra.mxu1 %v5761_v44  ;;  %v7689_v44 = vsub.s32 0, %v721_v43 }
 0x1a8   : > { %5766 = vmatprep.subr.bf16.mxu1 %v5765_v53  ;;  %639 = vadd.xlane.f32.xlu1 %v633_v17 }
 0x1a9   : > { %5736 = vmatpush1.bf16.msra.mxu0 %v5735_v45  ;;  %v718_v45 = vld [vmem:[#allocation8] sm:$0x7] }
 0x1aa   : > { %5738 = vmatprep.subr.bf16.mxu0 %v5737_v49  ;;  %v7692_v46 = vrot.slane %v718_v45, %v7689_v44  ;;  %v731_v52 = vrot.slane %v718_v45, %v730_v47 }
 0x1ab   : > { %5768 = vmatpush3.bf16.msra.mxu1 %v5765_v53  ;;  %v727_v53 = vrot.slane %v718_v45, %v7694_v48 }
 0x1ac   : > { %5770 = vmatprep.subr.bf16.mxu1 %v5769_v63  ;;  %641 = vadd.xlane.f32.xlu1 %v634_v18 }
 0x1ad   : > { %5740 = vmatpush1.bf16.msra.mxu0 %v5739_v54 }
 0x1ae   : > { %5742 = vmatprep.subr.bf16.mxu0 %v5741_v58 }
 0x1af   : > { %5772 = vmatpush3.bf16.msra.mxu1 %v5769_v63 }
 0x1b0   : > { %5774 = vmatprep.subr.bf16.mxu1 %v5773_v10 }
 0x1b1   : > { %5744 = vmatpush1.bf16.msra.mxu0 %v5743_v2 }
 0x1b2   : > { %5746 = vmatprep.subr.bf16.mxu0 %v5745_v6 }
 0x1b3   : > { %5776 = vmatpush3.bf16.msra.mxu1 %v5773_v10 }
 0x1b4   : > { %5778 = vmatprep.subr.bf16.mxu1 %v5777_v14 }
 0x1b5   : > { %5748 = vmatpush1.bf16.msra.mxu0 %v5747_v11 }
 0x1b7   : > { %5780 = vmatpush3.bf16.msra.mxu1 %v5777_v14 }
 0x224   : > { %v636_v19 = vpop.xlane.xlu0 %635 }
 0x225   : > { %v644_v20 = vmul.f32 0.0078125, %v636_v19 }
 0x227   : > { %v648_v21 = vadd.f32 1e-06, %v644_v20 }
 0x228   : > { %v638_v22 = vpop.xlane.xlu0 %637 }
 0x229   : > { %6471 = vrsqrt.f32 %v648_v21  ;;  %v645_v23 = vmul.f32 0.0078125, %v638_v22 }
 0x22b   : > { %v649_v24 = vadd.f32 1e-06, %v645_v23 }
 0x22d   : > { %6473 = vrsqrt.f32 %v649_v24 }
 0x233   : > { %v6472_v25 = vpop.eup %6471 }
 0x234   : > { %v656_v27 = vmul.f32 %v6472_v25, %v7672_v0 }
 0x235   : > { %v640_v32 = vpop.xlane.xlu1 %639 }
 0x236   : > { %v666_v28 = vmul.f32 %v5125_v26, %v656_v27  ;;  %v646_v34 = vmul.f32 0.0078125, %v640_v32 }
 0x237   : > { %v6474_v29 = vpop.eup %6473 }
 0x238   : > { %800 = vmatmul.mubr.f32.vlgmr.msra.gmra.mrb[0].mxu0 %v666_v28  ;;  %5523 = vmatprep.mubr.f32.mxu1 %v666_v28  ;;  %v657_v30 = vmul.f32 %v6474_v29, %v7675_v1  ;;  %v650_v36 = vadd.f32 1e-06, %v646_v34 }
 0x239   : > { %805 = vmatprep.mubr.f32.mxu0 %v7179_v62  ;;  %v642_v33 = vpop.xlane.xlu1 %641 }
 0x23a   : > { %v667_v31 = vmul.f32 %v5125_v26, %v657_v30  ;;  %v647_v35 = vmul.f32 0.0078125, %v642_v33  ;;  %6475 = vrsqrt.f32 %v650_v36 }
 0x23c   : > { %806 = vmatmul.mubr.f32.gmra.mrb[2].mxu0 %v667_v31  ;;  %5524 = vmatmul.mubr.f32.vlgmr.msra.gmra.mrb[0].mxu1 %v667_v31  ;;  %v651_v37 = vadd.f32 1e-06, %v647_v35 }
 0x23d   : > { %811 = vmatprep.mubr.f32.mxu0 %v7179_v62 }
 0x23e   : > { %6477 = vrsqrt.f32 %v651_v37 }
 0x244   : > { %v6476_v0 = vpop.eup %6475 }
 0x245   : > { %v658_v39 = vmul.f32 %v6476_v0, %v628_v15 }
 0x247   : > { %v668_v1 = vmul.f32 %v5125_v26, %v658_v39 }
 0x248   : > { %v6478_v38 = vpop.eup %6477 }
 0x249   : > { %v659_v40 = vmul.f32 %v6478_v38, %v629_v16  ;;  %5526 = vmatprep.mubr.f32.mxu1 %v668_v1  ;;  %812 = vmatmul.mubr.f32.gmra.mrb[4].mxu0 %v668_v1 }
 0x24a   : > { %817 = vmatprep.mubr.f32.mxu0 %v7179_v62 }
 0x24b   : > { %v669_v41 = vmul.f32 %v5125_v26, %v659_v40 }
 0x24d   : > { %5527 = vmatmul.mubr.f32.gmra.mrb[2].mxu1 %v669_v41  ;;  %818 = vmatmul.mubr.f32.gmra.mrb[6].mxu0 %v669_v41 }
 0x30b   : > { %v801_v49 = vpop.f32.mrb[0].mxu0 }
 0x30c   : > { %v7697_v50 = vadd.f32 %v801_v49, %v7692_v46  ;;  %v803_v51 = vpop.f32.mrb[1].mxu0 }
 0x30d   : > { %v804_v59 = vadd.f32 %v803_v51, %v727_v53 }
 0x30e   : > { %1103 = vrot.lane.b32.xlu1 %v7697_v50, %s7180_s3  ;;  %5533 = vmatprep.mubr.msk.f32.mxu1 %vm909_vm0, %v7697_v50 }
 0x30f   : > { %v807_v54 = vpop.f32.mrb[2].mxu0  ;;  %v5525_v55 = vpop.f32.mrb[0].mxu1 }
 0x310   : > { %v896_v56 = vadd.f32 %v5525_v55, %v731_v52  ;;  %v809_v57 = vpop.f32.mrb[3].mxu0  ;;  %v890_v58 = vpop.f32.mrb[1].mxu1  ;;  %v7721_v6 = vadd.f32 %v807_v54, %v7692_v46 }
 0x311   : > { %v810_v60 = vadd.f32 %v809_v57, %v727_v53  ;;  %v891_v61 = vadd.f32 %v890_v58, %v731_v52 }
 0x313   : > { %v7704_v63 = vpack.i.bf16 %v810_v60, %v804_v59  ;;  %v5781_v2 = vpack.c.bf16 %v810_v60, %v804_v59  ;;  %v5787_v4 = vpack.c.bf16 %v896_v56, %v891_v61  ;;  %v7712_v5 = vpack.i.bf16 %v896_v56, %v891_v61 }
 0x315   : > { %6373 = vrot.lane.b32.xlu1 %v7704_v63, %s7181_s23  ;;  %6368 = vrot.lane.b32.xlu0 %v7704_v63, %s7180_s3 }
 0x316   : > { %5783 = vmatprep.subr.msk.bf16.mxu1 %vm7708_vm1, %v5781_v2 }
 0x317   : > { %5786 = vmatpush3.bf16.xpose.msk.msra.mxu1 %vm7708_vm1, %v5781_v2 }
 0x318   : > { %5788 = vmatprep.subr.bf16.mxu1 %v5787_v4 }
 0x319   : > { %1307 = vrot.lane.b32.xlu0 %v7697_v50, %s7181_s23  ;;  %1105 = vrot.lane.b32.xlu1 %v7721_v6, %s7180_s3 }
 0x31c   : > { %v7733_v9 = vpop.f32.mrb[4].mxu0 }
 0x31d   : > { %1309 = vrot.lane.b32.xlu1 %v7721_v6, %s7181_s23  ;;  %v815_v10 = vpop.f32.mrb[5].mxu0 }
 0x31e   : > { %5534 = vmatmul.mubr.msk.f32.vlgmr.msra.gmra.mrb[4].mxu1 %vm909_vm0, %v7721_v6  ;;  %v816_v25 = vadd.f32 %v815_v10, %v727_v53 }
 0x31f   : > { %5790 = vmatpush3.bf16.msra.mxu1 %v5787_v4 }
 0x320   : > { %v5528_v7 = vpop.f32.mrb[2].mxu1  ;;  %v7735_v11 = vpop.f32.mrb[6].mxu0 }
 0x321   : > { %v900_v8 = vpop.f32.mrb[3].mxu1  ;;  %v821_v12 = vpop.f32.mrb[7].mxu0  ;;  %v906_v27 = vadd.f32 %v5528_v7, %v731_v52 }
 0x322   : > { %v822_v26 = vadd.f32 %v821_v12, %v727_v53  ;;  %v901_v28 = vadd.f32 %v900_v8, %v731_v52 }
 0x324   : > { %v7749_v29 = vpack.i.bf16 %v822_v26, %v816_v25  ;;  %v7751_v30 = vpack.c.bf16 %v822_v26, %v816_v25  ;;  %v7753_v31 = vpack.c.bf16 %v906_v27, %v901_v28  ;;  %v7755_v32 = vpack.i.bf16 %v906_v27, %v901_v28 }
 0x380   : > { %v1104_v13 = vpop.permute.xlu1 %1103 }
 0x381   : > { %5547 = vmatprep.mubr.msk.f32.mxu0 %vm909_vm0, %v1104_v13 }
 0x387   : > { %v6374_v14 = vpop.permute.xlu1 %6373  ;;  %v6369_v15 = vpop.permute.xlu0 %6368 }
 0x388   : > { %v6376_v16 = vunpack.i.h.bf16 %v6374_v14  ;;  %v6375_v17 = vunpack.i.l.bf16 %v6374_v14  ;;  %v6371_v18 = vunpack.i.h.bf16 %v6369_v15  ;;  %v6370_v19 = vunpack.i.l.bf16 %v6369_v15 }
 0x38a   : > { %v5791_v20 = vpack.c.bf16 %v6371_v18, %v6370_v19  ;;  %v5801_v21 = vpack.c.bf16 %v6376_v16, %v6375_v17 }
 0x38b   : > { %v1106_v22 = vpop.permute.xlu1 %1105  ;;  %v1308_v23 = vpop.permute.xlu0 %1307 }
 0x38c   : > { %5793 = vmatprep.subr.msk.bf16.mxu0 %vm7708_vm1, %v5791_v20 }
 0x38d   : > { %5796 = vmatpush3.bf16.xpose.msk.msra.mxu0 %vm7708_vm1, %v5791_v20 }
 0x38e   : > { %5803 = vmatprep.subr.msk.bf16.mxu0 %vm7708_vm1, %v5801_v21 }
 0x38f   : > { %v1310_v24 = vpop.permute.xlu1 %1309 }
 0x394   : > { %5548 = vmatmul.mubr.msk.f32.vlgmr.msra.gmra.mrb[8].mxu0 %vm909_vm0, %v1106_v22 }
 0x395   : > { %5806 = vmatpush3.bf16.xpose.msk.msra.mxu0 %vm7708_vm1, %v5801_v21  ;;  %5561 = vmatprep.mubr.msk.f32.mxu0 %vm909_vm0, %v1308_v23 }
 0x39c   : > { %5562 = vmatmul.mubr.msk.f32.vlgmr.msra.gmra.mrb[10].mxu0 %vm909_vm0, %v1310_v24 }
 0x3f1   : > { %v5535_v33 = vpop.f32.mrb[4].mxu1 }
 0x3f2   : > { %v998_v34 = vmul.f32 0.17677669, %v5535_v33  ;;  %v988_v35 = vpop.f32.mrb[5].mxu1 }
 0x3f3   : > { %v997_v36 = vmul.f32 0.17677669, %v988_v35 }
 0x3f4   : > { %v1003_v37 = vsel %vm999_vm2, %v998_v34, -inf }
 0x3f5   : > { %1004 = vmax.xlane.f32.xlu1 %v1003_v37  ;;  %v1000_v0 = vsel %vm999_vm2, %v997_v36, -inf }
 0x3f6   : > { %1001 = vmax.xlane.f32.xlu0 %v1000_v0 }
 0x467   : > { %v5549_v38 = vpop.f32.mrb[8].mxu0 }
 0x468   : > { %v1185_v39 = vpop.f32.mrb[9].mxu0  ;;  %v1195_v1 = vmul.f32 0.17677669, %v5549_v38 }
 0x469   : > { %v1194_v40 = vmul.f32 0.17677669, %v1185_v39 }
 0x46a   : > { %v1199_v43 = vsel %vm999_vm2, %v1195_v1, -inf }
 0x46b   : > { %v1196_v41 = vsel %vm999_vm2, %v1194_v40, -inf }
 0x46c   : > { %1197 = vmax.xlane.f32.xlu0 %v1196_v41 }
 0x46f   : > { %v5563_v42 = vpop.f32.mrb[10].mxu0 }
 0x470   : > { %v1399_v45 = vmul.f32 0.17677669, %v5563_v42  ;;  %v1389_v47 = vpop.f32.mrb[11].mxu0  ;;  %1200 = vmax.xlane.f32.xlu0 %v1199_v43 }
 0x471   : > { %v1398_v49 = vmul.f32 0.17677669, %v1389_v47 }
 0x472   : > { %v1403_v51 = vsel %vm999_vm2, %v1399_v45, -inf }
 0x473   : > { %1404 = vmax.xlane.f32.xlu1 %v1403_v51  ;;  %v1400_v52 = vsel %vm999_vm2, %v1398_v49, -inf }
 0x474   : > { %1401 = vmax.xlane.f32.xlu0 %v1400_v52 }
 0x482   : > { %v1005_v53 = vpop.xlane.xlu1 %1004 }
 0x483   : > { %v1007_v54 = vsub.f32 %v998_v34, %v1005_v53  ;;  %v1002_v55 = vpop.xlane.xlu0 %1001 }
 0x484   : > { %v1006_v56 = vsub.f32 %v997_v36, %v1002_v55 }
 0x485   : > { %v1010_v57 = vmul.f32 1.442695, %v1007_v54 }
 0x486   : > { %v1008_v58 = vmul.f32 1.442695, %v1006_v56 }
 0x487   : > { %6479 = vpow2.f32 %v1010_v57 }
 0x488   : > { %6481 = vpow2.f32 %v1008_v58 }
 0x491   : > { %v6480_v59 = vpop.eup %6479 }
 0x492   : > { %v6482_v60 = vpop.eup %6481  ;;  %v1015_v61 = vsel %vm999_vm2, %v6480_v59, 0.0 }
 0x493   : > { %1016 = vadd.xlane.f32.xlu1 %v1015_v61  ;;  %v1012_v2 = vsel %vm999_vm2, %v6482_v60, 0.0 }
 0x494   : > { %1013 = vadd.xlane.f32.xlu0 %v1012_v2 }
 0x4f9   : > { %v1198_v4 = vpop.xlane.xlu0 %1197 }
 0x4fa   : > { %v1202_v7 = vsub.f32 %v1194_v40, %v1198_v4 }
 0x4fc   : > { %v1204_v8 = vmul.f32 1.442695, %v1202_v7 }
 0x4fd   : > { %v1201_v10 = vpop.xlane.xlu0 %1200 }
 0x4fe   : > { %6483 = vpow2.f32 %v1204_v8  ;;  %v1203_v12 = vsub.f32 %v1195_v1, %v1201_v10 }
 0x500   : > { %v1206_v13 = vmul.f32 1.442695, %v1203_v12  ;;  %v1405_v14 = vpop.xlane.xlu1 %1404 }
 0x501   : > { %v1407_v15 = vsub.f32 %v1399_v45, %v1405_v14  ;;  %v1402_v16 = vpop.xlane.xlu0 %1401 }
 0x502   : > { %6485 = vpow2.f32 %v1206_v13  ;;  %v1406_v17 = vsub.f32 %v1398_v49, %v1402_v16 }
 0x503   : > { %v1410_v18 = vmul.f32 1.442695, %v1407_v15 }
 0x504   : > { %v1408_v19 = vmul.f32 1.442695, %v1406_v17 }
 0x505   : > { %6487 = vpow2.f32 %v1410_v18 }
 0x506   : > { %6489 = vpow2.f32 %v1408_v19 }
 0x508   : > { %v6484_v20 = vpop.eup %6483 }
 0x509   : > { %v1208_v21 = vsel %vm999_vm2, %v6484_v20, 0.0 }
 0x50a   : > { %1209 = vadd.xlane.f32.xlu0 %v1208_v21  ;;  %v7817_v21 = vadd.f32 %v7735_v11, %v7692_v46 }
 0x50c   : > { %v6486_v22 = vpop.eup %6485 }
 0x50d   : > { %v1211_v23 = vsel %vm999_vm2, %v6486_v22, 0.0 }
 0x50e   : > { %1212 = vadd.xlane.f32.xlu1 %v1211_v23 }
 0x50f   : > { %v6488_v24 = vpop.eup %6487 }
 0x510   : > { %v6490_v25 = vpop.eup %6489  ;;  %v1415_v26 = vsel %vm999_vm2, %v6488_v24, 0.0 }
 0x511   : > { %v1412_v27 = vsel %vm999_vm2, %v6490_v25, 0.0 }
 0x512   : > { %1416 = vadd.xlane.f32.xlu1 %v1415_v26  ;;  %1413 = vadd.xlane.f32.xlu0 %v1412_v27 }
 0x520   : > { %v1017_v28 = vpop.xlane.xlu1 %1016 }
 0x521   : > { %6491 = vrcp.f32 %v1017_v28  ;;  %v1014_v33 = vpop.xlane.xlu0 %1013 }
 0x522   : > { %6493 = vrcp.f32 %v1014_v33 }
 0x523   : > { %6383 = vrot.lane.b32.xlu1 %v7712_v5, %s7181_s23 }
 0x527   : > { %6388 = vrot.lane.b32.xlu1 %v7704_v63, %s7182_s0 }
 0x528   : > { %6378 = vrot.lane.b32.xlu0 %v7712_v5, %s7180_s3 }
 0x52b   : > { %v6492_v34 = vpop.eup %6491  ;;  %1509 = vrot.lane.b32.xlu1 %v7697_v50, %s7182_s0 }
 0x52c   : > { %v6494_v35 = vpop.eup %6493  ;;  %1511 = vrot.lane.b32.xlu0 %v7721_v6, %s7182_s0  ;;  %v1021_v37 = vmul.f32 %v6492_v34, %v6480_v59 }
 0x52d   : > { %v1020_v36 = vmul.f32 %v6494_v35, %v6482_v60 }
 0x52f   : > { %5540 = vmatprep.mubr.msk.f32.mxu1 %vm999_vm2, %v1020_v36 }
 0x530   : > { %5541 = vmatmul.mubr.msk.f32.vlgmr.msra.gmra.mrb[6].mxu1 %vm999_vm2, %v1021_v37 }
 0x597   : > { %v1210_v0 = vpop.xlane.xlu0 %1209 }
 0x598   : > { %6495 = vrcp.f32 %v1210_v0 }
 0x59b   : > { %v1213_v63 = vpop.xlane.xlu1 %1212 }
 0x59c   : > { %6497 = vrcp.f32 %v1213_v63 }
 0x59f   : > { %v1417_v38 = vpop.xlane.xlu1 %1416  ;;  %v1414_v39 = vpop.xlane.xlu0 %1413 }
 0x5a0   : > { %6499 = vrcp.f32 %v1417_v38 }
 0x5a1   : > { %6501 = vrcp.f32 %v1414_v39 }
 0x5a2   : > { %v6496_v40 = vpop.eup %6495 }
 0x5a3   : > { %v6384_v50 = vpop.permute.xlu1 %6383  ;;  %v6379_v1 = vpop.permute.xlu0 %6378  ;;  %v1216_v41 = vmul.f32 %v6496_v40, %v6484_v20 }
 0x5a4   : > { %v6386_v42 = vunpack.i.h.bf16 %v6384_v50  ;;  %v6385_v6 = vunpack.i.l.bf16 %v6384_v50  ;;  %v6381_v43 = vunpack.i.h.bf16 %v6379_v1  ;;  %v6380_v45 = vunpack.i.l.bf16 %v6379_v1 }
 0x5a5   : > { %5554 = vmatprep.mubr.msk.f32.mxu1 %vm999_vm2, %v1216_v41 }
 0x5a6   : > { %v5797_v47 = vpack.c.bf16 %v6381_v43, %v6380_v45  ;;  %v6498_v49 = vpop.eup %6497  ;;  %v5807_v52 = vpack.c.bf16 %v6386_v42, %v6385_v6  ;;  %v7831_v43 = vadd.f32 %v7733_v9, %v7692_v46 }
 0x5a7   : > { %v6389_v51 = vpop.permute.xlu1 %6388  ;;  %v1217_v56 = vmul.f32 %v6498_v49, %v6486_v22  ;;  %v1512_v2 = vpop.permute.xlu0 %1511 }
 0x5a8   : > { %v6391_v53 = vunpack.i.h.bf16 %v6389_v51  ;;  %v6390_v54 = vunpack.i.l.bf16 %v6389_v51  ;;  %5798 = vmatprep.subr.bf16.mxu1 %v5797_v47 }
 0x5a9   : > { %5800 = vmatpush3.bf16.msra.mxu1 %v5797_v47 }
 0x5aa   : > { %v6500_v55 = vpop.eup %6499  ;;  %5808 = vmatprep.subr.bf16.mxu1 %v5807_v52  ;;  %v5811_v58 = vpack.c.bf16 %v6391_v53, %v6390_v54 }
 0x5ab   : > { %v6502_v57 = vpop.eup %6501  ;;  %v1421_v60 = vmul.f32 %v6500_v55, %v6488_v24  ;;  %v1510_v61 = vpop.permute.xlu1 %1509 }
 0x5ac   : > { %5555 = vmatmul.mubr.msk.f32.vlgmr.msra.gmra.mrb[8].mxu1 %vm999_vm2, %v1217_v56  ;;  %v1420_v59 = vmul.f32 %v6502_v57, %v6490_v25 }
 0x5ad   : > { %5810 = vmatpush3.bf16.msra.mxu1 %v5807_v52 }
 0x5ae   : > { %5568 = vmatprep.mubr.msk.f32.mxu1 %vm999_vm2, %v1420_v59  ;;  %5813 = vmatprep.subr.msk.bf16.mxu1 %vm7708_vm1, %v5811_v58 }
 0x5b0   : > { %5569 = vmatmul.mubr.msk.f32.vlgmr.msra.gmra.mrb[10].mxu1 %vm999_vm2, %v1421_v60 }
 0x5b1   : > { %5575 = vmatprep.mubr.msk.f32.mxu1 %vm909_vm0, %v1510_v61 }
 0x5b6   : > { %5816 = vmatpush3.bf16.xpose.msk.msra.mxu1 %vm7708_vm1, %v5811_v58 }
 0x5b7   : > { %5828 = vmatprep.subr.bf16.mxu1 %v7753_v31 }
 0x5bd   : > { %5576 = vmatmul.mubr.msk.f32.vlgmr.msra.gmra.mrb[12].mxu1 %vm909_vm0, %v1512_v2 }
 0x5be   : > { %5830 = vmatpush3.bf16.msra.mxu1 %v7753_v31 }
 0x603   : > { %v7793_v4 = vpop.f32.mrb[6].mxu1 }
 0x604   : > { %v7795_v7 = vpop.f32.mrb[7].mxu1 }
 0x67f   : > { %v7797_v8 = vpop.f32.mrb[8].mxu1 }
 0x680   : > { %v7799_v10 = vpop.f32.mrb[9].mxu1 }
 0x681   : > { %v6427_v12 = vpack.i.bf16 %v7797_v8, %v7799_v10 }
 0x683   : > { %v7803_v13 = vpop.f32.mrb[10].mxu1 }
 0x684   : > { %v7805_v14 = vpop.f32.mrb[11].mxu1 }
 0x685   : > { %v6432_v15 = vpack.i.bf16 %v7803_v13, %v7805_v14 }
 0x690   : > { %v5577_v16 = vpop.f32.mrb[12].mxu1 }
 0x691   : > { %v1601_v31 = vmul.f32 0.17677669, %v5577_v16  ;;  %v1591_v17 = vpop.f32.mrb[13].mxu1 }
 0x692   : > { %v1600_v18 = vmul.f32 0.17677669, %v1591_v17 }
 0x693   : > { %v1605_v19 = vsel %vm999_vm2, %v1601_v31, -inf }
 0x694   : > { %1606 = vmax.xlane.f32.xlu0 %v1605_v19  ;;  %v1602_v20 = vsel %vm999_vm2, %v1600_v18, -inf }
 0x695   : > { %1603 = vmax.xlane.f32.xlu1 %v1602_v20 }
 0x6a6   : > { %6393 = vrot.lane.b32.xlu1 %v7712_v5, %s7182_s0 }
 0x6aa   : > { %6398 = vrot.lane.b32.xlu1 %v7749_v29, %s7180_s3 }
 0x6ae   : > { %1937 = vrot.lane.b32.xlu1 %v7817_v21, %s7180_s3 }
 0x721   : > { %v1607_v22 = vpop.xlane.xlu0 %1606 }
 0x722   : > { %v1609_v23 = vsub.f32 %v1601_v31, %v1607_v22  ;;  %v1604_v24 = vpop.xlane.xlu1 %1603 }
 0x723   : > { %v1608_v25 = vsub.f32 %v1600_v18, %v1604_v24 }
 0x724   : > { %v1612_v26 = vmul.f32 1.442695, %v1609_v23 }
 0x725   : > { %v1610_v27 = vmul.f32 1.442695, %v1608_v25 }
 0x726   : > { %v6394_v28 = vpop.permute.xlu1 %6393 }
 0x727   : > { %6503 = vpow2.f32 %v1610_v27  ;;  %v6396_v33 = vunpack.i.h.bf16 %v6394_v28  ;;  %v6395_v5 = vunpack.i.l.bf16 %v6394_v28 }
 0x728   : > { %6505 = vpow2.f32 %v1612_v26 }
 0x729   : > { %v5817_v34 = vpack.c.bf16 %v6396_v33, %v6395_v5 }
 0x72a   : > { %v6399_v35 = vpop.permute.xlu1 %6398 }
 0x72b   : > { %v6401_v36 = vunpack.i.h.bf16 %v6399_v35  ;;  %v6400_v37 = vunpack.i.l.bf16 %v6399_v35  ;;  %5818 = vmatprep.subr.bf16.mxu0 %v5817_v34 }
 0x72c   : > { %5820 = vmatpush3.bf16.msra.mxu0 %v5817_v34 }
 0x72d   : > { %v5831_v11 = vpack.c.bf16 %v6401_v36, %v6400_v37  ;;  %5823 = vmatprep.subr.msk.bf16.mxu0 %vm7708_vm1, %v7751_v30 }
 0x72e   : > { %v1938_v24 = vpop.permute.xlu1 %1937 }
 0x72f   : > { %5833 = vmatprep.subr.msk.bf16.mxu1 %vm7708_vm1, %v5831_v11 }
 0x731   : > { %v6504_v0 = vpop.eup %6503 }
 0x732   : > { %v1614_v63 = vsel %vm999_vm2, %v6504_v0, 0.0  ;;  %v6506_v38 = vpop.eup %6505 }
 0x733   : > { %1615 = vadd.xlane.f32.xlu0 %v1614_v63  ;;  %v1617_v39 = vsel %vm999_vm2, %v6506_v38, 0.0 }
 0x737   : > { %1618 = vadd.xlane.f32.xlu0 %v1617_v39 }
 0x7c0   : > { %v1616_v40 = vpop.xlane.xlu0 %1615 }
 0x7c1   : > { %6507 = vrcp.f32 %v1616_v40 }
 0x7c4   : > { %v1619_v50 = vpop.xlane.xlu0 %1618 }
 0x7c5   : > { %6509 = vrcp.f32 %v1619_v50 }
 0x7cb   : > { %v6508_v1 = vpop.eup %6507 }
 0x7cc   : > { %v1622_v41 = vmul.f32 %v6508_v1, %v6504_v0 }
 0x7ce   : > { %5582 = vmatprep.mubr.msk.f32.mxu0 %vm999_vm2, %v1622_v41 }
 0x7cf   : > { %v6510_v42 = vpop.eup %6509 }
 0x7d0   : > { %v1623_v6 = vmul.f32 %v6510_v42, %v6506_v38 }
 0x7d2   : > { %5583 = vmatmul.mubr.msk.f32.vlgmr.msra.gmra.mrb[12].mxu0 %vm999_vm2, %v1623_v6 }
 0x7d3   : > { %5826 = vmatpush3.bf16.xpose.msk.msra.mxu0 %vm7708_vm1, %v7751_v30  ;;  %5589 = vmatprep.mubr.msk.f32.mxu0 %vm909_vm0, %v7831_v43 }
 0x7da   : > { %5590 = vmatmul.mubr.msk.f32.vlgmr.msra.gmra.mrb[14].mxu0 %vm909_vm0, %v7817_v21 }
 0x8a5   : > { %v7841_v45 = vpop.f32.mrb[12].mxu0 }
 0x8a6   : > { %v7843_v47 = vpop.f32.mrb[13].mxu0 }
 0x8a7   : > { %v6437_v46 = vpack.i.bf16 %v7841_v45, %v7843_v47 }
 0x8ad   : > { %v5591_v9 = vpop.f32.mrb[14].mxu0 }
 0x8ae   : > { %v1821_v49 = vpop.f32.mrb[15].mxu0  ;;  %v1831_v52 = vmul.f32 0.17677669, %v5591_v9 }
 0x8af   : > { %v1830_v51 = vmul.f32 0.17677669, %v1821_v49 }
 0x8b0   : > { %v1835_v30 = vsel %vm999_vm2, %v1831_v52, -inf }
 0x8b1   : > { %v1832_v53 = vsel %vm999_vm2, %v1830_v51, -inf }
 0x8b2   : > { %1833 = vmax.xlane.f32.xlu0 %v1832_v53 }
 0x8b6   : > { %1836 = vmax.xlane.f32.xlu0 %v1835_v30 }
 0x93f   : > { %v1834_v54 = vpop.xlane.xlu0 %1833 }
 0x940   : > { %v1838_v55 = vsub.f32 %v1830_v51, %v1834_v54 }
 0x942   : > { %v1840_v56 = vmul.f32 1.442695, %v1838_v55 }
 0x943   : > { %v1837_v57 = vpop.xlane.xlu0 %1836 }
 0x944   : > { %6511 = vpow2.f32 %v1840_v56  ;;  %v1839_v58 = vsub.f32 %v1831_v52, %v1837_v57 }
 0x946   : > { %v1842_v59 = vmul.f32 1.442695, %v1839_v58 }
 0x948   : > { %6513 = vpow2.f32 %v1842_v59 }
 0x94e   : > { %v6512_v60 = vpop.eup %6511 }
 0x94f   : > { %v1844_v61 = vsel %vm999_vm2, %v6512_v60, 0.0 }
 0x950   : > { %1845 = vadd.xlane.f32.xlu0 %v1844_v61 }
 0x952   : > { %v6514_v2 = vpop.eup %6513 }
 0x953   : > { %v1847_v16 = vsel %vm999_vm2, %v6514_v2, 0.0 }
 0x954   : > { %1848 = vadd.xlane.f32.xlu0 %v1847_v16 }
 0x96a   : > { %1935 = vrot.lane.b32.xlu0 %v7831_v43, %s7180_s3 }
 0x9dd   : > { %v1846_v31 = vpop.xlane.xlu0 %1845 }
 0x9de   : > { %6515 = vrcp.f32 %v1846_v31 }
 0x9e1   : > { %v1849_v17 = vpop.xlane.xlu0 %1848 }
 0x9e2   : > { %6517 = vrcp.f32 %v1849_v17 }
 0x9e5   : > { %v1936_v23 = vpop.permute.xlu0 %1935 }
 0x9e8   : > { %v6516_v18 = vpop.eup %6515 }
 0x9e9   : > { %v1852_v19 = vmul.f32 %v6516_v18, %v6512_v60 }
 0x9eb   : > { %5596 = vmatprep.mubr.msk.f32.mxu1 %vm999_vm2, %v1852_v19 }
 0x9ec   : > { %v6518_v20 = vpop.eup %6517 }
 0x9ed   : > { %v1853_v22 = vmul.f32 %v6518_v20, %v6514_v2 }
 0x9ef   : > { %5597 = vmatmul.mubr.msk.f32.vlgmr.msra.gmra.mrb[14].mxu1 %vm999_vm2, %v1853_v22 }
 0x9f0   : > { %5836 = vmatpush3.bf16.xpose.msk.msra.mxu1 %vm7708_vm1, %v5831_v11  ;;  %5603 = vmatprep.mubr.msk.f32.mxu1 %vm909_vm0, %v1936_v23 }
 0x9f7   : > { %5604 = vmatmul.mubr.msk.f32.vlgmr.msra.gmra.mrb[16].mxu1 %vm909_vm0, %v1938_v24 }
 0xac2   : > { %v7859_v25 = vpop.f32.mrb[14].mxu1 }
 0xac3   : > { %v7861_v26 = vpop.f32.mrb[15].mxu1 }
 0xaca   : > { %v5605_v27 = vpop.f32.mrb[16].mxu1 }
 0xacb   : > { %v2027_v28 = vmul.f32 0.17677669, %v5605_v27  ;;  %v2017_v33 = vpop.f32.mrb[17].mxu1 }
 0xacc   : > { %v2026_v5 = vmul.f32 0.17677669, %v2017_v33 }
 0xacd   : > { %v2031_v34 = vsel %vm999_vm2, %v2027_v28, -inf }
 0xace   : > { %2032 = vmax.xlane.f32.xlu0 %v2031_v34  ;;  %v2028_v35 = vsel %vm999_vm2, %v2026_v5, -inf }
 0xacf   : > { %2029 = vmax.xlane.f32.xlu1 %v2028_v35 }
 0xae0   : > { %6403 = vrot.lane.b32.xlu1 %v7755_v32, %s7180_s3 }
 0xae4   : > { %6408 = vrot.lane.b32.xlu0 %v7749_v29, %s7181_s23  ;;  %2139 = vrot.lane.b32.xlu1 %v7831_v43, %s7181_s23 }
 0xb5b   : > { %v2033_v36 = vpop.xlane.xlu0 %2032 }
 0xb5c   : > { %v2035_v37 = vsub.f32 %v2027_v28, %v2033_v36  ;;  %v2030_v11 = vpop.xlane.xlu1 %2029 }
 0xb5d   : > { %v2034_v0 = vsub.f32 %v2026_v5, %v2030_v11 }
 0xb5e   : > { %v2038_v63 = vmul.f32 1.442695, %v2035_v37 }
 0xb5f   : > { %v2036_v38 = vmul.f32 1.442695, %v2034_v0  ;;  %v6409_v39 = vpop.permute.xlu0 %6408 }
 0xb60   : > { %6519 = vpow2.f32 %v2038_v63  ;;  %v6404_v40 = vpop.permute.xlu1 %6403  ;;  %v6411_v50 = vunpack.i.h.bf16 %v6409_v39  ;;  %v6410_v1 = vunpack.i.l.bf16 %v6409_v39 }
 0xb61   : > { %v6406_v41 = vunpack.i.h.bf16 %v6404_v40  ;;  %v6405_v42 = vunpack.i.l.bf16 %v6404_v40  ;;  %6521 = vpow2.f32 %v2036_v38 }
 0xb62   : > { %v5841_v9 = vpack.c.bf16 %v6411_v50, %v6410_v1 }
 0xb63   : > { %v5837_v6 = vpack.c.bf16 %v6406_v41, %v6405_v42 }
 0xb64   : > { %v2140_v30 = vpop.permute.xlu1 %2139 }
 0xb65   : > { %5838 = vmatprep.subr.bf16.mxu0 %v5837_v6 }
 0xb66   : > { %5840 = vmatpush3.bf16.msra.mxu0 %v5837_v6 }
 0xb67   : > { %5843 = vmatprep.subr.msk.bf16.mxu0 %vm7708_vm1, %v5841_v9 }
 0xb6a   : > { %v6520_v49 = vpop.eup %6519 }
 0xb6b   : > { %v2043_v51 = vsel %vm999_vm2, %v6520_v49, 0.0  ;;  %v6522_v52 = vpop.eup %6521 }
 0xb6c   : > { %2044 = vadd.xlane.f32.xlu1 %v2043_v51  ;;  %v2040_v53 = vsel %vm999_vm2, %v6522_v52, 0.0 }
 0xb70   : > { %2041 = vadd.xlane.f32.xlu1 %v2040_v53 }
 0xb81   : > { %2141 = vrot.lane.b32.xlu1 %v7817_v21, %s7181_s23 }
 0xbf9   : > { %v2045_v54 = vpop.xlane.xlu1 %2044 }
 0xbfa   : > { %6523 = vrcp.f32 %v2045_v54 }
 0xbfd   : > { %v2042_v55 = vpop.xlane.xlu1 %2041 }
 0xbfe   : > { %6525 = vrcp.f32 %v2042_v55 }
 0xc01   : > { %v2142_v60 = vpop.permute.xlu1 %2141 }
 0xc04   : > { %v6524_v56 = vpop.eup %6523 }
 0xc05   : > { %v2049_v59 = vmul.f32 %v6524_v56, %v6520_v49 }
 0xc08   : > { %v6526_v57 = vpop.eup %6525 }
 0xc09   : > { %v2048_v58 = vmul.f32 %v6526_v57, %v6522_v52 }
 0xc0b   : > { %5610 = vmatprep.mubr.msk.f32.mxu0 %vm999_vm2, %v2048_v58 }
 0xc0c   : > { %5611 = vmatmul.mubr.msk.f32.vlgmr.msra.gmra.mrb[16].mxu0 %vm999_vm2, %v2049_v59 }
 0xc0d   : > { %5846 = vmatpush3.bf16.xpose.msk.msra.mxu0 %vm7708_vm1, %v5841_v9  ;;  %5617 = vmatprep.mubr.msk.f32.mxu0 %vm909_vm0, %v2140_v30 }
 0xc14   : > { %5618 = vmatmul.mubr.msk.f32.vlgmr.msra.gmra.mrb[18].mxu0 %vm909_vm0, %v2142_v60 }
 0xcdf   : > { %v7883_v61 = vpop.f32.mrb[16].mxu0 }
 0xce0   : > { %v7885_v2 = vpop.f32.mrb[17].mxu0 }
 0xce1   : > { %v6442_v16 = vpack.i.bf16 %v7883_v61, %v7885_v2  ;;  %v2573_v2 = vld [vmem:[#allocation10] sm:$0xff] }
 0xce7   : > { %v5619_v31 = vpop.f32.mrb[18].mxu0 }
 0xce8   : > { %v2231_v17 = vmul.f32 0.17677669, %v5619_v31  ;;  %v2221_v18 = vpop.f32.mrb[19].mxu0 }
 0xce9   : > { %v2230_v19 = vmul.f32 0.17677669, %v2221_v18 }
 0xcea   : > { %v2235_v20 = vsel %vm999_vm2, %v2231_v17, -inf }
 0xceb   : > { %2236 = vmax.xlane.f32.xlu0 %v2235_v20  ;;  %v2232_v22 = vsel %vm999_vm2, %v2230_v19, -inf }
 0xcec   : > { %2233 = vmax.xlane.f32.xlu1 %v2232_v22 }
 0xcfd   : > { %6413 = vrot.lane.b32.xlu1 %v7755_v32, %s7181_s23 }
 0xd01   : > { %2341 = vrot.lane.b32.xlu1 %v7831_v43, %s7182_s0 }
 0xd05   : > { %2343 = vrot.lane.b32.xlu1 %v7817_v21, %s7182_s0 }
 0xd78   : > { %v2237_v23 = vpop.xlane.xlu0 %2236 }
 0xd79   : > { %v2239_v24 = vsub.f32 %v2231_v17, %v2237_v23  ;;  %v2234_v27 = vpop.xlane.xlu1 %2233 }
 0xd7a   : > { %v2238_v28 = vsub.f32 %v2230_v19, %v2234_v27 }
 0xd7b   : > { %v2242_v33 = vmul.f32 1.442695, %v2239_v24 }
 0xd7c   : > { %v2240_v5 = vmul.f32 1.442695, %v2238_v28 }
 0xd7d   : > { %6527 = vpow2.f32 %v2242_v33  ;;  %v6414_v34 = vpop.permute.xlu1 %6413 }
 0xd7e   : > { %v6416_v35 = vunpack.i.h.bf16 %v6414_v34  ;;  %v6415_v36 = vunpack.i.l.bf16 %v6414_v34  ;;  %6529 = vpow2.f32 %v2240_v5 }
 0xd80   : > { %v5847_v37 = vpack.c.bf16 %v6416_v35, %v6415_v36 }
 0xd81   : > { %v2342_v49 = vpop.permute.xlu1 %2341 }
 0xd82   : > { %5848 = vmatprep.subr.bf16.mxu1 %v5847_v37 }
 0xd83   : > { %5850 = vmatpush3.bf16.msra.mxu1 %v5847_v37 }
 0xd87   : > { %v6528_v11 = vpop.eup %6527 }
 0xd88   : > { %v2247_v43 = vsel %vm999_vm2, %v6528_v11, 0.0  ;;  %v6530_v0 = vpop.eup %6529 }
 0xd89   : > { %2248 = vadd.xlane.f32.xlu0 %v2247_v43  ;;  %v2244_v21 = vsel %vm999_vm2, %v6530_v0, 0.0  ;;  %v2575_v43 = vld [vmem:[#allocation10 + $0x10] sm:$0xff] }
 0xd8d   : > { %2245 = vadd.xlane.f32.xlu0 %v2244_v21 }
 0xda3   : > { %6418 = vrot.lane.b32.xlu0 %v7749_v29, %s7182_s0  ;;  %v2344_v29 = vpop.permute.xlu1 %2343 }
 0xe16   : > { %v2249_v63 = vpop.xlane.xlu0 %2248 }
 0xe17   : > { %6531 = vrcp.f32 %v2249_v63 }
 0xe1a   : > { %v2246_v38 = vpop.xlane.xlu0 %2245 }
 0xe1b   : > { %6533 = vrcp.f32 %v2246_v38 }
 0xe1e   : > { %v6419_v39 = vpop.permute.xlu0 %6418 }
 0xe1f   : > { %v6421_v40 = vunpack.i.h.bf16 %v6419_v39  ;;  %v6420_v50 = vunpack.i.l.bf16 %v6419_v39 }
 0xe21   : > { %v5851_v1 = vpack.c.bf16 %v6421_v40, %v6420_v50  ;;  %v6532_v41 = vpop.eup %6531 }
 0xe22   : > { %v2253_v9 = vmul.f32 %v6532_v41, %v6528_v11 }
 0xe23   : > { %5853 = vmatprep.subr.msk.bf16.mxu1 %vm7708_vm1, %v5851_v1 }
 0xe25   : > { %v6534_v42 = vpop.eup %6533 }
 0xe26   : > { %v2252_v6 = vmul.f32 %v6534_v42, %v6530_v0  ;;  %v2576_v0 = vld [vmem:[#allocation10 + $0x18] sm:$0xff]  ;;  %v2577_v42 = vld [vmem:[#allocation10 + $0x20] sm:$0xff] }
 0xe27   : > { %v5865_v41 = vpack.c.bf16 %v2576_v0, %v2575_v43 }
 0xe28   : > { %5624 = vmatprep.mubr.msk.f32.mxu1 %vm999_vm2, %v2252_v6  ;;  %v2578_v6 = vld [vmem:[#allocation10 + $0x28] sm:$0xff] }
 0xe29   : > { %5625 = vmatmul.mubr.msk.f32.vlgmr.msra.gmra.mrb[18].mxu1 %vm999_vm2, %v2253_v9  ;;  %v2579_v9 = vld [vmem:[#allocation10 + $0x30] sm:$0xff] }
 0xe2a   : > { %5856 = vmatpush3.bf16.xpose.msk.msra.mxu1 %vm7708_vm1, %v5851_v1  ;;  %5631 = vmatprep.mubr.msk.f32.mxu1 %vm909_vm0, %v2342_v49  ;;  %v2580_v49 = vld [vmem:[#allocation10 + $0x38] sm:$0xff] }
 0xe31   : > { %5632 = vmatmul.mubr.msk.f32.vlgmr.msra.gmra.mrb[20].mxu1 %vm909_vm0, %v2344_v29  ;;  %v5873_v29 = vpack.c.bf16 %v2580_v49, %v2579_v9  ;;  %v6695_v9 = vld [vmem:[%s7641_s13 + $0x8] sm:$0xff] }
 0xefc   : > { %v5626_v51 = vpop.f32.mrb[18].mxu1 }
 0xefd   : > { %v2332_v52 = vpop.f32.mrb[19].mxu1 }
 0xefe   : > { %v6447_v53 = vpack.i.bf16 %v5626_v51, %v2332_v52  ;;  %v2581_v51 = vld [vmem:[#allocation10 + $0x40] sm:$0xff]  ;;  %v2582_v52 = vld [vmem:[#allocation10 + $0x48] sm:$0xff] }
 0xf04   : > { %v5633_v30 = vpop.f32.mrb[20].mxu1 }
 0xf05   : > { %v2433_v54 = vmul.f32 0.17677669, %v5633_v30  ;;  %v2423_v55 = vpop.f32.mrb[21].mxu1  ;;  %v2583_v30 = vld [vmem:[#allocation10 + $0x50] sm:$0xff] }
 0xf06   : > { %v2432_v56 = vmul.f32 0.17677669, %v2423_v55 }
 0xf07   : > { %v2437_v57 = vsel %vm999_vm2, %v2433_v54, -inf }
 0xf08   : > { %2438 = vmax.xlane.f32.xlu0 %v2437_v57  ;;  %v2434_v58 = vsel %vm999_vm2, %v2432_v56, -inf  ;;  %v2586_v57 = vld [vmem:[#allocation10 + $0x68] sm:$0xff] }
 0xf09   : > { %2435 = vmax.xlane.f32.xlu1 %v2434_v58 }
 0xf1a   : > { %6423 = vrot.lane.b32.xlu1 %v7755_v32, %s7182_s0 }
 0xf1e   : > { %6433 = vrot.lane.b32.xlu1 %v6432_v15, %s7181_s23 }
 0xf22   : > { %6438 = vrot.lane.b32.xlu1 %v6437_v46, %s7180_s3 }
 0xf26   : > { %6443 = vrot.lane.b32.xlu1 %v6442_v16, %s7182_s0  ;;  %v2574_v16 = vld [vmem:[#allocation10 + $0x8] sm:$0xff] }
 0xf27   : > { %v5861_v19 = vpack.c.bf16 %v2574_v16, %v2573_v2  ;;  %v2877_v2 = vld [vmem:[#allocation17] sm:$0xff]  ;;  %v2879_v16 = vld [vmem:[#allocation17 + $0x10] sm:$0xff] }
 0xf95   : > { %v2439_v3 = vpop.xlane.xlu0 %2438 }
 0xf96   : > { %v2441_v59 = vsub.f32 %v2433_v54, %v2439_v3  ;;  %v2436_v60 = vpop.xlane.xlu1 %2435  ;;  %v2584_v54 = vld [vmem:[#allocation10 + $0x58] sm:$0xff]  ;;  %v2587_v3 = vld [vmem:[#allocation10 + $0x70] sm:$0xff] }
 0xf97   : > { %v2440_v31 = vsub.f32 %v2432_v56, %v2436_v60  ;;  %v5881_v55 = vpack.c.bf16 %v2584_v54, %v2583_v30  ;;  %v2585_v56 = vld [vmem:[#allocation10 + $0x60] sm:$0xff]  ;;  %v2730_v30 = vld [vmem:[#allocation14 + $0x30] sm:$0xff] }
 0xf98   : > { %v2444_v32 = vmul.f32 1.442695, %v2441_v59  ;;  %v5885_v58 = vpack.c.bf16 %v2586_v57, %v2585_v56  ;;  %v2588_v59 = vld [vmem:[#allocation10 + $0x78] sm:$0xff] }
 0xf99   : > { %v2442_v17 = vmul.f32 1.442695, %v2440_v31  ;;  %v5889_v31 = vpack.c.bf16 %v2588_v59, %v2587_v3  ;;  %v2731_v54 = vld [vmem:[#allocation14 + $0x38] sm:$0xff]  ;;  %v2894_v3 = vld [vmem:[#allocation17 + $0x88] sm:$0xff] }
 0xf9a   : > { %v6424_v18 = vpop.permute.xlu1 %6423  ;;  %v5905_v56 = vpack.c.bf16 %v2731_v54, %v2730_v30  ;;  %v2891_v57 = vld [vmem:[#allocation17 + $0x70] sm:$0xff]  ;;  %v2896_v59 = vld [vmem:[#allocation17 + $0x98] sm:$0xff] }
 0xf9b   : > { %6535 = vpow2.f32 %v2442_v17  ;;  %v6426_v13 = vunpack.i.h.bf16 %v6424_v18  ;;  %v6425_v14 = vunpack.i.l.bf16 %v6424_v18 }
 0xf9c   : > { %6537 = vpow2.f32 %v2444_v32 }
 0xf9d   : > { %v5857_v15 = vpack.c.bf16 %v6426_v13, %v6425_v14 }
 0xf9e   : > { %v7932_v20 = vpop.permute.xlu1 %6433 }
 0xf9f   : > { %5858 = vmatprep.subr.bf16.mxu0 %v5857_v15  ;;  %v6435_v36 = vunpack.i.l.bf16 %v7932_v20  ;;  %v6436_v17 = vunpack.i.h.bf16 %v7932_v20  ;;  %v2884_v20 = vld [vmem:[#allocation17 + $0x38] sm:$0xff] }
 0xfa0   : > { %5860 = vmatpush3.bf16.msra.mxu0 %v5857_v15  ;;  %v2878_v15 = vld [vmem:[#allocation17 + $0x8] sm:$0xff] }
 0xfa1   : > { %5862 = vmatprep.subr.bf16.mxu0 %v5861_v19 }
 0xfa2   : > { %v7934_v23 = vpop.permute.xlu1 %6438 }
 0xfa3   : > { %v6440_v50 = vunpack.i.l.bf16 %v7934_v23  ;;  %v6441_v13 = vunpack.i.h.bf16 %v7934_v23  ;;  %v2881_v23 = vld [vmem:[#allocation17 + $0x20] sm:$0xff] }
 0xfa5   : > { %v6536_v45 = vpop.eup %6535 }
 0xfa6   : > { %v2446_v47 = vsel %vm999_vm2, %v6536_v45, 0.0  ;;  %v6538_v46 = vpop.eup %6537  ;;  %v6444_v27 = vpop.permute.xlu1 %6443 }
 0xfa7   : > { %2447 = vadd.xlane.f32.xlu0 %v2446_v47  ;;  %v2449_v61 = vsel %vm999_vm2, %v6538_v46, 0.0  ;;  %v6446_v5 = vunpack.i.h.bf16 %v6444_v27  ;;  %v6445_v8 = vunpack.i.l.bf16 %v6444_v27  ;;  %v2724_v47 = vld [vmem:[#allocation14] sm:$0xff] }
 0xfa9   : > { %v2567_v21 = vsel %vm909_vm0, %v7861_v26, %v6445_v8  ;;  %v2568_v63 = vsel %vm909_vm0, %v7859_v25, %v6446_v5  ;;  %v5869_v26 = vpack.c.bf16 %v2578_v6, %v2577_v42 }
 0xfab   : > { %2450 = vadd.xlane.f32.xlu0 %v2449_v61  ;;  %v2725_v61 = vld [vmem:[#allocation14 + $0x8] sm:$0xff] }
 0xfc1   : > { %6428 = vrot.lane.b32.xlu0 %v6427_v12, %s7182_s0 }
 0xfc5   : > { %6448 = vrot.lane.b32.xlu0 %v6447_v53, %s7181_s23  ;;  %v5877_v53 = vpack.c.bf16 %v2582_v52, %v2581_v51 }
0x1034   : > { %v2448_v22 = vpop.xlane.xlu0 %2447 }
0x1035   : > { %6539 = vrcp.f32 %v2448_v22  ;;  %v2882_v22 = vld [vmem:[#allocation17 + $0x28] sm:$0xff] }
0x1036   : > { %v5929_v27 = vpack.c.bf16 %v2884_v20, %v2882_v22  ;;  %v2902_v22 = vld [vmem:[#allocation17 + $0xc8] sm:$0xff]  ;;  %v2904_v20 = vld [vmem:[#allocation17 + $0xd8] sm:$0xff] }
0x1038   : > { %v2451_v24 = vpop.xlane.xlu0 %2450 }
0x1039   : > { %6541 = vrcp.f32 %v2451_v24  ;;  %v2726_v24 = vld [vmem:[#allocation14 + $0x10] sm:$0xff] }
0x103c   : > { %v6429_v28 = vpop.permute.xlu0 %6428 }
0x103d   : > { %v6430_v33 = vunpack.i.l.bf16 %v6429_v28  ;;  %v6431_v60 = vunpack.i.h.bf16 %v6429_v28  ;;  %v2727_v28 = vld [vmem:[#allocation14 + $0x18] sm:$0xff] }
0x103e   : > { %v5897_v5 = vpack.c.bf16 %v2727_v28, %v2726_v24  ;;  %v5949_v24 = vpack.c.bf16 %v2904_v20, %v2902_v22  ;;  %v2737_v28 = vld [vmem:[#allocation14 + $0x68] sm:$0xff]  ;;  %v3385_v20 = vld [vmem:[#allocation17 + $0x130] sm:$0xff] }
0x103f   : > { %v6540_v10 = vpop.eup %6539  ;;  %v1735_v35 = vsel %vm909_vm0, %v7795_v7, %v6430_v33  ;;  %v1736_v32 = vsel %vm909_vm0, %v7793_v4, %v6431_v60  ;;  %v5893_v4 = vpack.c.bf16 %v2725_v61, %v2724_v47  ;;  %v2883_v33 = vld [vmem:[#allocation17 + $0x30] sm:$0xff]  ;;  %v5941_v60 = vpack.c.bf16 %v2896_v59, %v2894_v3  ;;  %v3383_v22 = vld [vmem:[#allocation17 + $0x120] sm:$0xff] }
0x1040   : > { %v6449_v12 = vpop.permute.xlu0 %6448  ;;  %v2454_v34 = vmul.f32 %v6540_v10, %v6536_v45  ;;  %v1738_v39 = vsel %vm1737_vm3, %v1735_v35, %v6435_v36  ;;  %v1739_v18 = vsel %vm1737_vm3, %v1736_v32, %v6436_v17  ;;  %v2880_v45 = vld [vmem:[#allocation17 + $0x18] sm:$0xff]  ;;  %v5931_v8 = vpack.c.bf16 %v2883_v33, %v2881_v23  ;;  %v2886_v10 = vld [vmem:[#allocation17 + $0x48] sm:$0xff]  ;;  %v2893_v17 = vld [vmem:[#allocation17 + $0x80] sm:$0xff] }
0x1041   : > { %v6451_v37 = vunpack.i.h.bf16 %v6449_v12  ;;  %v6450_v11 = vunpack.i.l.bf16 %v6449_v12  ;;  %v1741_v25 = vsel %vm1740_vm4, %v1738_v39, %v6440_v50  ;;  %v1742_v14 = vsel %vm1740_vm4, %v1739_v18, %v6441_v13  ;;  %5894 = vmatprep.subr.bf16.mxu1 %v5893_v4  ;;  %v2888_v12 = vld [vmem:[#allocation17 + $0x58] sm:$0xff]  ;;  %v2729_v36 = vld [vmem:[#allocation14 + $0x28] sm:$0xff]  ;;  %v2895_v13 = vld [vmem:[#allocation17 + $0x90] sm:$0xff] }
0x1042   : > { %5638 = vmatprep.mubr.msk.f32.mxu0 %vm999_vm2, %v2454_v34  ;;  %v2728_v34 = vld [vmem:[#allocation14 + $0x20] sm:$0xff]  ;;  %5896 = vmatpush3.bf16.msra.mxu1 %v5893_v4  ;;  %v5933_v0 = vpack.c.bf16 %v2888_v12, %v2886_v10  ;;  %v2733_v32 = vld [vmem:[#allocation14 + $0x48] sm:$0xff]  ;;  %v2735_v61 = vld [vmem:[#allocation14 + $0x58] sm:$0xff] }
0x1043   : > { %v6542_v38 = vpop.eup %6541  ;;  %v7946_v7 = vsel %vm1737_vm3, %v2567_v21, %v6450_v11  ;;  %v7949_v40 = vsel %vm1737_vm3, %v2568_v63, %v6451_v37  ;;  %v2885_v37 = vld [vmem:[#allocation17 + $0x40] sm:$0xff]  ;;  %v2887_v11 = vld [vmem:[#allocation17 + $0x50] sm:$0xff]  ;;  %5898 = vmatprep.subr.bf16.mxu1 %v5897_v5  ;;  %v5901_v21 = vpack.c.bf16 %v2729_v36, %v2728_v34  ;;  %v2890_v63 = vld [vmem:[#allocation17 + $0x68] sm:$0xff] }
0x1044   : > { %v2455_v1 = vmul.f32 %v6542_v38, %v6538_v46  ;;  %v5925_v46 = vpack.c.bf16 %v2880_v45, %v2878_v15  ;;  %v2892_v38 = vld [vmem:[#allocation17 + $0x78] sm:$0xff]  ;;  %v5935_v50 = vpack.c.bf16 %v2887_v11, %v2885_v37  ;;  %v2898_v15 = vld [vmem:[#allocation17 + $0xa8] sm:$0xff]  ;;  %v2899_v4 = vld [vmem:[#allocation17 + $0xb0] sm:$0xff] }
0x1045   : > { %v2900_v45 = vld [vmem:[#allocation17 + $0xb8] sm:$0xff]  ;;  %v2901_v23 = vld [vmem:[#allocation17 + $0xc0] sm:$0xff]  ;;  %v2906_v10 = vld [vmem:[#allocation17 + $0xe8] sm:$0xff] }
0x1046   : > { %5639 = vmatmul.mubr.msk.f32.vlgmr.msra.gmra.mrb[20].mxu0 %vm999_vm2, %v2455_v1  ;;  %5900 = vmatpush3.bf16.msra.mxu1 %v5897_v5  ;;  %v5937_v1 = vpack.c.bf16 %v2892_v38, %v2890_v63  ;;  %v5945_v47 = vpack.c.bf16 %v2900_v45, %v2898_v15  ;;  %v2903_v5 = vld [vmem:[#allocation17 + $0xd0] sm:$0xff]  ;;  %v2908_v12 = vld [vmem:[#allocation17 + $0xf8] sm:$0xff]  ;;  %v2905_v37 = vld [vmem:[#allocation17 + $0xe0] sm:$0xff] }
0x1047   : > { %5864 = vmatpush3.bf16.msra.mxu0 %v5861_v19  ;;  %5673 = vmatprep.mubr.f32.mxu0 %v1741_v25  ;;  %v5927_v19 = vpack.c.bf16 %v2879_v16, %v2877_v2  ;;  %v2897_v2 = vld [vmem:[#allocation17 + $0xa0] sm:$0xff]  ;;  %v5953_v34 = vpack.c.bf16 %v2908_v12, %v2906_v10  ;;  %v2739_v36 = vld [vmem:[#allocation14 + $0x78] sm:$0xff]  ;;  %v3384_v15 = vld [vmem:[#allocation17 + $0x128] sm:$0xff] }
0x1048   : > { %5866 = vmatprep.subr.bf16.mxu0 %v5865_v41  ;;  %5902 = vmatprep.subr.bf16.mxu1 %v5901_v21  ;;  %v3243_v59 = vld [vmem:[#allocation20 + $0x88] sm:$0xff]  ;;  %v3229_v10 = vld [vmem:[#allocation20 + $0x18] sm:$0xff] }
0x104a   : > { %5904 = vmatpush3.bf16.msra.mxu1 %v5901_v21 }
0x104b   : > { %5868 = vmatpush3.bf16.msra.mxu0 %v5865_v41  ;;  %v7961_v41 = vld [vmem:[#allocation11] ss:$0 sm:$0xff]  ;;  %5906 = vmatprep.subr.bf16.mxu1 %v5905_v56 }
0x104c   : > { %5870 = vmatprep.subr.bf16.mxu0 %v5869_v26 }
0x104e   : > { %5908 = vmatpush3.bf16.msra.mxu1 %v5905_v56  ;;  %v3382_v56 = vld [vmem:[#allocation17 + $0x118] sm:$0xff] }
0x104f   : > { %5872 = vmatpush3.bf16.msra.mxu0 %v5869_v26 }
0x1050   : > { %5874 = vmatprep.subr.bf16.mxu0 %v5873_v29 }
0x1053   : > { %5876 = vmatpush3.bf16.msra.mxu0 %v5873_v29  ;;  %v6696_v29 = vld [vmem:[%s7641_s13] sm:$0xff] }
0x1054   : > { %5878 = vmatprep.subr.bf16.mxu0 %v5877_v53 }
0x1057   : > { %5880 = vmatpush3.bf16.msra.mxu0 %v5877_v53 }
0x1058   : > { %5882 = vmatprep.subr.bf16.mxu0 %v5881_v55 }
0x105b   : > { %5884 = vmatpush3.bf16.msra.mxu0 %v5881_v55  ;;  %v2889_v55 = vld [vmem:[#allocation17 + $0x60] sm:$0xff] }
0x105c   : > { %5886 = vmatprep.subr.bf16.mxu0 %v5885_v58 }
0x105f   : > { %5888 = vmatpush3.bf16.msra.mxu0 %v5885_v58  ;;  %v5939_v58 = vpack.c.bf16 %v2891_v57, %v2889_v55  ;;  %v3380_v55 = vld [vmem:[#allocation17 + $0x108] sm:$0xff] }
0x1060   : > { %5890 = vmatprep.subr.bf16.mxu0 %v5889_v31  ;;  %v3242_v57 = vld [vmem:[#allocation20 + $0x80] sm:$0xff]  ;;  %v5989_v3 = vpack.c.bf16 %v3382_v56, %v3380_v55 }
0x1063   : > { %5892 = vmatpush3.bf16.msra.mxu0 %v5889_v31  ;;  %v2732_v31 = vld [vmem:[#allocation14 + $0x40] sm:$0xff] }
0x1064   : > { %5926 = vmatprep.subr.bf16.mxu0 %v5925_v46  ;;  %v5909_v18 = vpack.c.bf16 %v2733_v32, %v2732_v31  ;;  %v2734_v46 = vld [vmem:[#allocation14 + $0x50] sm:$0xff] }
0x1065   : > { %v5913_v16 = vpack.c.bf16 %v2735_v61, %v2734_v46  ;;  %v3381_v31 = vld [vmem:[#allocation17 + $0x110] sm:$0xff]  ;;  %v3386_v61 = vld [vmem:[#allocation17 + $0x138] sm:$0xff] }
0x1066   : > { %5674 = vmatmul.mubr.f32.vlgmr.msra.gmra.mrb[22].mxu0 %v1742_v14  ;;  %v5943_v14 = vpack.c.bf16 %v2895_v13, %v2893_v17  ;;  %5910 = vmatprep.subr.bf16.mxu1 %v5909_v18  ;;  %v5957_v17 = vpack.c.bf16 %v3243_v59, %v3242_v57  ;;  %v3226_v13 = vld [vmem:[#allocation20] sm:$0xff] }
0x1067   : > { %5928 = vmatpush1.bf16.msra.mxu0 %v5927_v19  ;;  %5912 = vmatpush3.bf16.msra.mxu1 %v5909_v18  ;;  %v5947_v19 = vpack.c.bf16 %v2899_v4, %v2897_v2  ;;  %v3244_v2 = vld [vmem:[#allocation20 + $0x90] sm:$0xff]  ;;  %v5993_v4 = vpack.c.bf16 %v3386_v61, %v3384_v15  ;;  %v3396_v57 = vld [vmem:[#allocation17 + $0x188] sm:$0xff] }
0x1068   : > { %5930 = vmatprep.subr.bf16.mxu0 %v5929_v27  ;;  %5914 = vmatprep.subr.bf16.mxu1 %v5913_v16  ;;  %v2736_v27 = vld [vmem:[#allocation14 + $0x60] sm:$0xff]  ;;  %v3250_v59 = vld [vmem:[#allocation20 + $0xc0] sm:$0xff] }
0x1069   : > { %v5917_v33 = vpack.c.bf16 %v2737_v28, %v2736_v27  ;;  %v5995_v28 = vpack.c.bf16 %v3385_v20, %v3383_v22  ;;  %v3252_v61 = vld [vmem:[#allocation20 + $0xd0] sm:$0xff]  ;;  %v3237_v20 = vld [vmem:[#allocation20 + $0x58] sm:$0xff] }
0x106a   : > { %v3236_v22 = vld [vmem:[#allocation20 + $0x50] sm:$0xff] }
0x106b   : > { %5932 = vmatpush1.bf16.msra.mxu0 %v5931_v8  ;;  %5916 = vmatpush3.bf16.msra.mxu1 %v5913_v16  ;;  %v5951_v8 = vpack.c.bf16 %v2903_v5, %v2901_v23  ;;  %v3245_v16 = vld [vmem:[#allocation20 + $0x98] sm:$0xff] }
0x106c   : > { %5934 = vmatprep.subr.bf16.mxu0 %v5933_v0  ;;  %5918 = vmatprep.subr.bf16.mxu1 %v5917_v33 }
0x106f   : > { %5936 = vmatpush1.bf16.msra.mxu0 %v5935_v50  ;;  %5920 = vmatpush3.bf16.msra.mxu1 %v5917_v33 }
0x1070   : > { %5938 = vmatprep.subr.bf16.mxu0 %v5937_v1 }
0x1073   : > { %5940 = vmatpush1.bf16.msra.mxu0 %v5939_v58 }
0x1074   : > { %5942 = vmatprep.subr.bf16.mxu0 %v5941_v60  ;;  %v3379_v60 = vld [vmem:[#allocation17 + $0x100] sm:$0xff] }
0x1075   : > { %v5991_v18 = vpack.c.bf16 %v3381_v31, %v3379_v60  ;;  %v3251_v60 = vld [vmem:[#allocation20 + $0xc8] sm:$0xff]  ;;  %v3395_v31 = vld [vmem:[#allocation17 + $0x180] sm:$0xff] }
0x1077   : > { %5944 = vmatpush1.bf16.msra.mxu0 %v5943_v14  ;;  %v3227_v14 = vld [vmem:[#allocation20 + $0x8] sm:$0xff] }
0x1078   : > { %5946 = vmatprep.subr.bf16.mxu0 %v5945_v47  ;;  %v5959_v46 = vpack.c.bf16 %v3227_v14, %v3226_v13  ;;  %v3235_v13 = vld [vmem:[#allocation20 + $0x48] sm:$0xff] }
0x107b   : > { %5948 = vmatpush1.bf16.msra.mxu0 %v5947_v19  ;;  %v5961_v19 = vpack.c.bf16 %v3245_v16, %v3244_v2  ;;  %v3253_v2 = vld [vmem:[#allocation20 + $0xd8] sm:$0xff] }
0x107c   : > { %5950 = vmatprep.subr.bf16.mxu0 %v5949_v24  ;;  %v6697_v24 = vld [vmem:[%s7641_s13 + $0x10] sm:$0xff] }
0x107d   : > { %v3399_v16 = vld [vmem:[#allocation17 + $0x1a0] sm:$0xff] }
0x107f   : > { %5952 = vmatpush1.bf16.msra.mxu0 %v5951_v8  ;;  %v3228_v8 = vld [vmem:[#allocation20 + $0x10] sm:$0xff] }
0x1080   : > { %5954 = vmatprep.subr.bf16.mxu0 %v5953_v34  ;;  %v5963_v12 = vpack.c.bf16 %v3229_v10, %v3228_v8  ;;  %v3388_v34 = vld [vmem:[#allocation17 + $0x148] sm:$0xff]  ;;  %v3255_v10 = vld [vmem:[#allocation20 + $0xe8] sm:$0xff] }
0x1081   : > { %v3254_v8 = vld [vmem:[#allocation20 + $0xe0] sm:$0xff] }
0x1119   : > { %v5640_v35 = vpop.f32.mrb[20].mxu0 }
0x111a   : > { %v2534_v43 = vpop.f32.mrb[21].mxu0 }
0x111b   : > { %v6452_v39 = vpack.i.bf16 %v5640_v35, %v2534_v43  ;;  %v2738_v35 = vld [vmem:[#allocation14 + $0x70] sm:$0xff] }
0x111c   : > { %v5921_v11 = vpack.c.bf16 %v2739_v36, %v2738_v35  ;;  %v2907_v43 = vld [vmem:[#allocation17 + $0xf0] sm:$0xff]  ;;  %v3390_v35 = vld [vmem:[#allocation17 + $0x158] sm:$0xff] }
0x111d   : > { %6453 = vrot.lane.b32.xlu1 %v6452_v39, %s7180_s3  ;;  %v5955_v0 = vpack.c.bf16 %v2907_v43, %v2905_v37  ;;  %v5997_v36 = vpack.c.bf16 %v3390_v35, %v3388_v34  ;;  %v3246_v37 = vld [vmem:[#allocation20 + $0xa0] sm:$0xff]  ;;  %v3387_v43 = vld [vmem:[#allocation17 + $0x140] sm:$0xff]  ;;  %v5981_v34 = vpack.c.bf16 %v3255_v10, %v3254_v8  ;;  %v3405_v35 = vld [vmem:[#allocation17 + $0x1d0] sm:$0xff] }
0x111e   : > { %5922 = vmatprep.subr.bf16.mxu1 %v5921_v11 }
0x111f   : > { %5956 = vmatpush1.bf16.msra.mxu0 %v5955_v0  ;;  %5924 = vmatpush3.bf16.msra.mxu1 %v5921_v11  ;;  %v3247_v11 = vld [vmem:[#allocation20 + $0xa8] sm:$0xff] }
0x1120   : > { %5990 = vmatprep.subr.bf16.mxu0 %v5989_v3  ;;  %5958 = vmatprep.subr.bf16.mxu1 %v5957_v17  ;;  %v5965_v0 = vpack.c.bf16 %v3247_v11, %v3246_v37  ;;  %v3397_v17 = vld [vmem:[#allocation17 + $0x190] sm:$0xff] }
0x1121   : > { %v6007_v14 = vpack.c.bf16 %v3397_v17, %v3395_v31  ;;  %v3239_v37 = vld [vmem:[#allocation20 + $0x68] sm:$0xff] }
0x1139   : > { %v5675_v42 = vpop.f32.mrb[22].mxu0 }
0x113a   : > { %v2668_v6 = vadd.f32 %v5675_v42, %v7961_v41  ;;  %v2662_v25 = vpop.f32.mrb[23].mxu0 }
0x113b   : > { %v2663_v26 = vadd.f32 %v7961_v41, %v2662_v25 }
0x113c   : > { %v7966_v49 = vadd.f32 %v6695_v9, %v2668_v6 }
0x113d   : > { %v7969_v51 = vadd.f32 %v6696_v29, %v2663_v26 }
0x113e   : > { %9268 = vst [vmem:[#allocation33_spill] sm:$0xff] %v7966_v49  ;;  %v2687_v53 = vmul.f32 %v7966_v49, %v7966_v49 }
0x113f   : > { %9269 = vst [vmem:[#allocation34_spill] sm:$0xff] %v7969_v51  ;;  %v2686_v52 = vmul.f32 %v7969_v51, %v7969_v51 }
0x1141   : > { %2690 = vadd.xlane.f32.xlu0 %v2686_v52  ;;  %2692 = vadd.xlane.f32.xlu1 %v2687_v53  ;;  %v7980_v52 = vld [vmem:[#allocation13] ss:$0 sm:$0xff] }
0x118f   : > { %v6454_v21 = vpop.permute.xlu1 %6453 }
0x1190   : > { %v6456_v63 = vunpack.i.h.bf16 %v6454_v21  ;;  %v6455_v38 = vunpack.i.l.bf16 %v6454_v21  ;;  %v3389_v21 = vld [vmem:[#allocation17 + $0x150] sm:$0xff] }
0x1192   : > { %v2571_v39 = vsel %vm1740_vm4, %v7946_v7, %v6455_v38  ;;  %v2572_v50 = vsel %vm1740_vm4, %v7949_v40, %v6456_v63  ;;  %v3230_v63 = vld [vmem:[#allocation20 + $0x20] sm:$0xff]  ;;  %v3231_v38 = vld [vmem:[#allocation20 + $0x28] sm:$0xff] }
0x1193   : > { %5676 = vmatprep.mubr.f32.mxu0 %v2571_v39  ;;  %v5999_v39 = vpack.c.bf16 %v3389_v21, %v3387_v43  ;;  %v3410_v21 = vld [vmem:[#allocation17 + $0x1f8] sm:$0xff] }
0x1194   : > { %5677 = vmatmul.mubr.f32.gmra.mrb[24].mxu0 %v2572_v50  ;;  %v5967_v50 = vpack.c.bf16 %v3231_v38, %v3230_v63  ;;  %v3256_v38 = vld [vmem:[#allocation20 + $0xf0] sm:$0xff] }
0x1195   : > { %2985 = vmatprep.mubr.f32.mxu0 %v7179_v62 }
0x11ce   : > { %v2691_v1 = vpop.xlane.xlu0 %2690  ;;  %v2693_v42 = vpop.xlane.xlu1 %2692 }
0x11cf   : > { %v2698_v6 = vmul.f32 0.0078125, %v2691_v1  ;;  %v2699_v25 = vmul.f32 0.0078125, %v2693_v42  ;;  %v3392_v1 = vld [vmem:[#allocation17 + $0x168] sm:$0xff]  ;;  %v3394_v42 = vld [vmem:[#allocation17 + $0x178] sm:$0xff] }
0x11d1   : > { %v2702_v26 = vadd.f32 1e-06, %v2698_v6  ;;  %v2703_v9 = vadd.f32 1e-06, %v2699_v25  ;;  %v6001_v6 = vpack.c.bf16 %v3394_v42, %v3392_v1  ;;  %v3248_v25 = vld [vmem:[#allocation20 + $0xb0] sm:$0xff]  ;;  %v3409_v42 = vld [vmem:[#allocation17 + $0x1f0] sm:$0xff] }
0x11d3   : > { %6543 = vrsqrt.f32 %v2702_v26  ;;  %v3249_v26 = vld [vmem:[#allocation20 + $0xb8] sm:$0xff] }
0x11d4   : > { %6545 = vrsqrt.f32 %v2703_v9  ;;  %v3391_v9 = vld [vmem:[#allocation17 + $0x160] sm:$0xff] }
0x11dd   : > { %v6544_v29 = vpop.eup %6543 }
0x11de   : > { %v6546_v53 = vpop.eup %6545  ;;  %v2710_v7 = vmul.f32 %v6544_v29, %v7969_v51  ;;  %v5969_v29 = vpack.c.bf16 %v3249_v26, %v3248_v25  ;;  %v3241_v25 = vld [vmem:[#allocation20 + $0x78] sm:$0xff] }
0x11df   : > { %v2711_v40 = vmul.f32 %v6546_v53, %v7966_v49  ;;  %v3393_v53 = vld [vmem:[#allocation17 + $0x170] sm:$0xff] }
0x11e0   : > { %v7985_v30 = vmul.f32 %v7980_v52, %v2710_v7  ;;  %v3232_v7 = vld [vmem:[#allocation20 + $0x30] sm:$0xff]  ;;  %v6003_v55 = vpack.c.bf16 %v3393_v53, %v3391_v9 }
0x11e1   : > { %v7988_v54 = vmul.f32 %v7980_v52, %v2711_v40  ;;  %v3233_v40 = vld [vmem:[#allocation20 + $0x38] sm:$0xff]  ;;  %v3883_v53 = vld [vmem:[#allocation17 + $0x218] sm:$0xff] }
0x11e2   : > { %5711 = vmatprep.mubr.f32.mxu1 %v7985_v30  ;;  %2986 = vmatmul.mubr.f32.vlgmr.msra.gmra.mrb[26].mxu0 %v7985_v30  ;;  %v5971_v56 = vpack.c.bf16 %v3233_v40, %v3232_v7  ;;  %v2909_v40 = vld [vmem:[#allocation19] sm:$0x3] }
0x11e3   : > { %5712 = vmatmul.mubr.f32.vlgmr.msra.gmra.mrb[22].mxu1 %v7988_v54  ;;  %2991 = vmatprep.mubr.f32.mxu0 %v7179_v62 }
0x11e4   : > { %5992 = vmatpush1.bf16.msra.mxu0 %v5991_v18  ;;  %5960 = vmatpush3.bf16.msra.mxu1 %v5959_v46  ;;  %v3234_v18 = vld [vmem:[#allocation20 + $0x40] sm:$0xff] }
0x11e5   : > { %5994 = vmatprep.subr.bf16.mxu0 %v5993_v4  ;;  %5962 = vmatprep.subr.bf16.mxu1 %v5961_v19  ;;  %v5975_v15 = vpack.c.bf16 %v3235_v13, %v3234_v18  ;;  %v5977_v4 = vpack.c.bf16 %v3253_v2, %v3252_v61  ;;  %v3401_v19 = vld [vmem:[#allocation17 + $0x1b0] sm:$0xff]  ;;  %v8022_v18 = vrot.slane %v2909_v40, %v7689_v44 }
0x11e6   : > { %2992 = vmatmul.mubr.f32.gmra.mrb[28].mxu0 %v7988_v54 }
0x11e7   : > { %2997 = vmatprep.mubr.f32.mxu0 %v7179_v62 }
0x11e8   : > { %5996 = vmatpush1.bf16.msra.mxu0 %v5995_v28  ;;  %5964 = vmatpush3.bf16.msra.mxu1 %v5963_v12  ;;  %v5979_v28 = vpack.c.bf16 %v3237_v20, %v3236_v22  ;;  %v3403_v12 = vld [vmem:[#allocation17 + $0x1c0] sm:$0xff] }
0x11e9   : > { %5998 = vmatprep.subr.bf16.mxu0 %v5997_v36  ;;  %5966 = vmatprep.subr.bf16.mxu1 %v5965_v0  ;;  %v3238_v36 = vld [vmem:[#allocation20 + $0x60] sm:$0xff]  ;;  %v6015_v11 = vpack.c.bf16 %v3405_v35, %v3403_v12 }
0x11ea   : > { %v5983_v43 = vpack.c.bf16 %v3239_v37, %v3238_v36  ;;  %v3408_v0 = vld [vmem:[#allocation17 + $0x1e8] sm:$0xff] }
0x11eb   : > { %v6017_v63 = vpack.c.bf16 %v3410_v21, %v3408_v0 }
0x11ec   : > { %6000 = vmatpush1.bf16.msra.mxu0 %v5999_v39  ;;  %5968 = vmatpush3.bf16.msra.mxu1 %v5967_v50  ;;  %v3257_v39 = vld [vmem:[#allocation20 + $0xf8] sm:$0xff] }
0x11ed   : > { %6002 = vmatprep.subr.bf16.mxu0 %v6001_v6  ;;  %5970 = vmatprep.subr.bf16.mxu1 %v5969_v29  ;;  %v3407_v50 = vld [vmem:[#allocation17 + $0x1e0] sm:$0xff]  ;;  %v5985_v1 = vpack.c.bf16 %v3257_v39, %v3256_v38  ;;  %v3240_v6 = vld [vmem:[#allocation20 + $0x70] sm:$0xff]  ;;  %v3881_v29 = vld [vmem:[#allocation17 + $0x208] sm:$0xff] }
0x11ee   : > { %v6019_v26 = vpack.c.bf16 %v3409_v42, %v3407_v50  ;;  %v5987_v9 = vpack.c.bf16 %v3241_v25, %v3240_v6  ;;  %v6053_v7 = vpack.c.bf16 %v3883_v53, %v3881_v29 }
0x11f0   : > { %6004 = vmatpush1.bf16.msra.mxu0 %v6003_v55  ;;  %5972 = vmatpush3.bf16.msra.mxu1 %v5971_v56  ;;  %v8008_v55 = vld [vmem:[#allocation16] ss:$0 sm:$0xff] }
0x1267   : > { %v5678_v58 = vpop.f32.mrb[24].mxu0 }
0x1268   : > { %v2672_v32 = vpop.f32.mrb[25].mxu0  ;;  %v2678_v45 = vadd.f32 %v5678_v58, %v7961_v41  ;;  %v3398_v58 = vld [vmem:[#allocation17 + $0x198] sm:$0xff] }
0x1269   : > { %v2673_v47 = vadd.f32 %v7961_v41, %v2672_v32  ;;  %v6698_v41 = vld [vmem:[%s7641_s13 + $0x18] sm:$0xff]  ;;  %v6005_v3 = vpack.c.bf16 %v3398_v58, %v3396_v57  ;;  %v5973_v32 = vpack.c.bf16 %v3251_v60, %v3250_v59  ;;  %v8014_v59 = vrot.slane %v2909_v40, %v7694_v48  ;;  %s7071_s13 = scalar_lea.vmem %s7070_s18, 1024 }
0x126a   : > { %v8002_v23 = vadd.f32 %v6698_v41, %v2678_v45  ;;  %v3400_v45 = vld [vmem:[#allocation17 + $0x1a8] sm:$0xff]  ;;  %p7073_p3 = scmp.lt.s32.totalorder %s7071_s13, %s7065_s17 }
0x126b   : > { %v7999_v27 = vadd.f32 %v6697_v24, %v2673_v47  ;;  %6006 = vmatprep.subr.bf16.mxu0 %v6005_v3  ;;  %5974 = vmatprep.subr.bf16.mxu1 %v5973_v32  ;;  %v3402_v47 = vld [vmem:[#allocation17 + $0x1b8] sm:$0xff]  ;;  %v6011_v24 = vpack.c.bf16 %v3401_v19, %v3399_v16  ;;  %v3404_v41 = vld [vmem:[#allocation17 + $0x1c8] sm:$0xff] }
0x126c   : > { %9271 = vst [vmem:[#allocation36_spill] sm:$0xff] %v8002_v23  ;;  %v2689_v5 = vmul.f32 %v8002_v23, %v8002_v23  ;;  %6008 = vmatpush1.bf16.msra.mxu0 %v6007_v14  ;;  %5976 = vmatpush3.bf16.msra.mxu1 %v5975_v15  ;;  %v6009_v46 = vpack.c.bf16 %v3402_v47, %v3400_v45  ;;  %p7074_p5 = por %p7073_p3, %p7072_p12 }
0x126d   : > { %9270 = vst [vmem:[#allocation35_spill] sm:$0xff] %v7999_v27  ;;  %v2688_v33 = vmul.f32 %v7999_v27, %v7999_v27  ;;  %5978 = vmatprep.subr.bf16.mxu1 %v5977_v4 }
0x126e   : > { %6010 = vmatprep.subr.bf16.mxu0 %v6009_v46  ;;  %p7075_p9 = pnand %p7074_p5, %p7068_p11 }
0x126f   : > { %2694 = vadd.xlane.f32.xlu0 %v2688_v33  ;;  %v3406_v33 = vld [vmem:[#allocation17 + $0x1d8] sm:$0xff] }
0x1270   : > { %6012 = vmatpush1.bf16.msra.mxu0 %v6011_v24  ;;  %5980 = vmatpush3.bf16.msra.mxu1 %v5979_v28 }
0x1271   : > { %5982 = vmatprep.subr.bf16.mxu1 %v5981_v34 }
0x1273   : > { %2696 = vadd.xlane.f32.xlu0 %v2689_v5  ;;  %v6013_v5 = vpack.c.bf16 %v3406_v33, %v3404_v41 }
0x1274   : > { %5984 = vmatpush3.bf16.msra.mxu1 %v5983_v43 }
0x1275   : > { %6014 = vmatprep.subr.bf16.mxu0 %v6013_v5  ;;  %5986 = vmatprep.subr.bf16.mxu1 %v5985_v1 }
0x1276   : > { %6016 = vmatpush1.bf16.msra.mxu0 %v6015_v11 }
0x1277   : > { %6018 = vmatprep.subr.bf16.mxu0 %v6017_v63 }
0x1278   : > { %5988 = vmatpush3.bf16.msra.mxu1 %v5987_v9 }
0x127a   : > { %6020 = vmatpush1.bf16.msra.mxu0 %v6019_v26 }
0x127b   : > { %6054 = vmatprep.subr.bf16.mxu0 %v6053_v7 }
0x12b5   : > { %v2987_v56 = vpop.f32.mrb[26].mxu0 }
0x12b6   : > { %v5713_v57 = vpop.f32.mrb[22].mxu1  ;;  %v2989_v58 = vpop.f32.mrb[27].mxu0  ;;  %v8030_v45 = vadd.f32 %v2987_v56, %v8022_v18 }
0x12b7   : > { %v8011_v3 = vadd.f32 %v5713_v57, %v8008_v55  ;;  %v2813_v60 = vpop.f32.mrb[23].mxu1  ;;  %v8027_v15 = vadd.f32 %v2989_v58, %v8014_v59 }
0x12b8   : > { %v8017_v31 = vadd.f32 %v8008_v55, %v2813_v60  ;;  %v8039_v61 = vmul.f32 0.70710677, %v8030_v45 }
0x12b9   : > { %v2993_v32 = vpop.f32.mrb[28].mxu0  ;;  %v2836_v17 = vsel %vm2832_vm5, %v8011_v3, -inf  ;;  %v8033_v47 = vmul.f32 0.70710677, %v8027_v15 }
0x12ba   : > { %v2995_v13 = vpop.f32.mrb[29].mxu0  ;;  %2837 = vmax.xlane.f32.xlu1 %v2836_v17  ;;  %v2833_v14 = vsel %vm2832_vm5, %v8017_v31, -inf  ;;  %v8042_v2 = vadd.f32 %v2993_v32, %v8022_v18  ;;  %v3026_v19 = vand.u32 2147483647, %v8039_v61  ;;  %vm3186_vm7 = vcmp.lt.f32.partialorder %v8039_v61, 0.0 }
0x12bb   : > { %2834 = vmax.xlane.f32.xlu0 %v2833_v14  ;;  %v8036_v46 = vadd.f32 %v2995_v13, %v8014_v59  ;;  %v3027_v16 = vand.u32 2147483647, %v8033_v47  ;;  %vm3187_vm6 = vcmp.lt.f32.partialorder %v8033_v47, 0.0 }
0x12bc   : > { %v8050_v22 = vmul.f32 0.70710677, %v8042_v2  ;;  %v3034_v28 = vmul.f32 0.3275911, %v3026_v19  ;;  %v3138_v7 = vsub.f32 0.0, %v3026_v19 }
0x12bd   : > { %v8046_v4 = vmul.f32 0.70710677, %v8036_v46  ;;  %v3035_v20 = vmul.f32 0.3275911, %v3027_v16  ;;  %v3139_v9 = vsub.f32 0.0, %v3027_v16 }
0x12be   : > { %v3028_v41 = vand.u32 2147483647, %v8050_v22  ;;  %v3042_v8 = vadd.f32 1.0, %v3034_v28  ;;  %v3146_v17 = vmul.f32 %v3138_v7, %v3026_v19  ;;  %vm3188_vm9 = vcmp.lt.f32.partialorder %v8050_v22, 0.0 }
0x12bf   : > { %v3029_v24 = vand.u32 2147483647, %v8046_v4  ;;  %v3043_v33 = vadd.f32 1.0, %v3035_v20  ;;  %v3147_v57 = vmul.f32 %v3139_v9, %v3027_v16  ;;  %vm3189_vm8 = vcmp.lt.f32.partialorder %v8046_v4, 0.0  ;;  %v3880_v4 = vld [vmem:[#allocation17 + $0x200] sm:$0xff] }
0x12c0   : > { %v3036_v10 = vmul.f32 0.3275911, %v3028_v41  ;;  %v3140_v13 = vsub.f32 0.0, %v3028_v41 }
0x12c1   : > { %v3037_v5 = vmul.f32 0.3275911, %v3029_v24  ;;  %6547 = vrcp.f32 %v3043_v33  ;;  %v3141_v58 = vsub.f32 0.0, %v3029_v24  ;;  %v3156_v28 = vmul.f32 1.442695, %v3147_v57 }
0x12c2   : > { %6549 = vrcp.f32 %v3042_v8  ;;  %v3044_v34 = vadd.f32 1.0, %v3036_v10  ;;  %v3154_v10 = vmul.f32 1.442695, %v3146_v17 }
0x12c3   : > { %v3045_v12 = vadd.f32 1.0, %v3037_v5  ;;  %v3149_v33 = vmul.f32 %v3141_v58, %v3029_v24 }
0x12c5   : > { %6551 = vrcp.f32 %v3045_v12  ;;  %v3148_v12 = vmul.f32 %v3140_v13, %v3028_v41 }
0x12c6   : > { %6553 = vrcp.f32 %v3044_v34 }
0x12c7   : > { %6555 = vpow2.f32 %v3156_v28  ;;  %v3158_v16 = vmul.f32 1.442695, %v3148_v12 }
0x12c8   : > { %6557 = vpow2.f32 %v3154_v10 }
0x12cb   : > { %v6548_v35 = vpop.eup %6547 }
0x12cc   : > { %v6550_v36 = vpop.eup %6549  ;;  %v3067_v37 = vmul.f32 1.0614054, %v6548_v35 }
0x12cd   : > { %v3066_v43 = vmul.f32 1.0614054, %v6550_v36 }
0x12ce   : > { %v3075_v21 = vadd.f32 -1.4531521, %v3067_v37 }
0x12cf   : > { %v6552_v11 = vpop.eup %6551  ;;  %v3074_v38 = vadd.f32 -1.4531521, %v3066_v43  ;;  %v3160_v43 = vmul.f32 1.442695, %v3149_v33 }
0x12d0   : > { %v6554_v0 = vpop.eup %6553  ;;  %v3069_v63 = vmul.f32 1.0614054, %v6552_v11  ;;  %v3083_v50 = vmul.f32 %v6548_v35, %v3075_v21 }
0x12d1   : > { %v3068_v39 = vmul.f32 1.0614054, %v6554_v0  ;;  %v3082_v42 = vmul.f32 %v6550_v36, %v3074_v38  ;;  %6559 = vpow2.f32 %v3160_v43 }
0x12d2   : > { %v3077_v1 = vadd.f32 -1.4531521, %v3069_v63  ;;  %v3091_v25 = vadd.f32 1.4214138, %v3083_v50  ;;  %6561 = vpow2.f32 %v3158_v16  ;;  %v3011_v16 = vmul.f32 0.5, %v8027_v15 }
0x12d3   : > { %v3076_v6 = vadd.f32 -1.4531521, %v3068_v39  ;;  %v3090_v29 = vadd.f32 1.4214138, %v3082_v42  ;;  %v3013_v15 = vmul.f32 0.5, %v8036_v46 }
0x12d4   : > { %v3085_v26 = vmul.f32 %v6552_v11, %v3077_v1  ;;  %v3099_v40 = vmul.f32 %v6548_v35, %v3091_v25  ;;  %v6556_v25 = vpop.eup %6555 }
0x12d5   : > { %v3084_v53 = vmul.f32 %v6554_v0, %v3076_v6  ;;  %v3098_v60 = vmul.f32 %v6550_v36, %v3090_v29 }
0x12d6   : > { %v3093_v56 = vadd.f32 1.4214138, %v3085_v26  ;;  %v3107_v14 = vadd.f32 -0.28449672, %v3099_v40 }
0x12d7   : > { %v3092_v32 = vadd.f32 1.4214138, %v3084_v53  ;;  %v3106_v5 = vadd.f32 -0.28449672, %v3098_v60 }
0x12d8   : > { %v3101_v20 = vmul.f32 %v6552_v11, %v3093_v56  ;;  %v3115_v34 = vmul.f32 %v6548_v35, %v3107_v14  ;;  %v6558_v56 = vpop.eup %6557 }
0x12d9   : > { %v3100_v8 = vmul.f32 %v6554_v0, %v3092_v32  ;;  %v3114_v21 = vmul.f32 %v6550_v36, %v3106_v5 }
0x12da   : > { %v3109_v37 = vadd.f32 -0.28449672, %v3101_v20  ;;  %v3123_v38 = vadd.f32 0.2548296, %v3115_v34 }
0x12db   : > { %v3108_v63 = vadd.f32 -0.28449672, %v3100_v8  ;;  %v3122_v19 = vadd.f32 0.2548296, %v3114_v21  ;;  %v6560_v57 = vpop.eup %6559 }
0x12dc   : > { %v3117_v39 = vmul.f32 %v6552_v11, %v3109_v37  ;;  %v3131_v24 = vmul.f32 %v6548_v35, %v3123_v38  ;;  %v6562_v35 = vpop.eup %6561 }
0x12dd   : > { %v3116_v50 = vmul.f32 %v6554_v0, %v3108_v63  ;;  %v3130_v41 = vmul.f32 %v6550_v36, %v3122_v19 }
0x12de   : > { %v3125_v42 = vadd.f32 0.2548296, %v3117_v39  ;;  %v3171_v53 = vmul.f32 %v6556_v25, %v3131_v24  ;;  %v3882_v39 = vld [vmem:[#allocation17 + $0x210] sm:$0xff]  ;;  %v3887_v24 = vld [vmem:[#allocation17 + $0x238] sm:$0xff] }
0x12df   : > { %v3124_v9 = vadd.f32 0.2548296, %v3116_v50  ;;  %v3170_v58 = vmul.f32 %v6558_v56, %v3130_v41 }
0x12e0   : > { %v3133_v7 = vmul.f32 %v6552_v11, %v3125_v42  ;;  %v3179_v17 = vsub.f32 1.0, %v3171_v53  ;;  %v3889_v53 = vld [vmem:[#allocation17 + $0x248] sm:$0xff] }
0x12e1   : > { %v3132_v32 = vmul.f32 %v6554_v0, %v3124_v9  ;;  %v3178_v14 = vsub.f32 1.0, %v3170_v58  ;;  %v3886_v9 = vld [vmem:[#allocation17 + $0x230] sm:$0xff] }
0x12e2   : > { %v3173_v13 = vmul.f32 %v6560_v57, %v3133_v7  ;;  %v3195_v28 = vsub.f32 0.0, %v3179_v17  ;;  %v3891_v7 = vld [vmem:[#allocation17 + $0x258] sm:$0xff]  ;;  %v3888_v57 = vld [vmem:[#allocation17 + $0x240] sm:$0xff]  ;;  %v3890_v58 = vld [vmem:[#allocation17 + $0x250] sm:$0xff] }
0x12e3   : > { %v3172_v20 = vmul.f32 %v6562_v35, %v3132_v32  ;;  %v3194_v5 = vsub.f32 0.0, %v3178_v14  ;;  %v6061_v56 = vpack.c.bf16 %v3891_v7, %v3889_v53  ;;  %v3895_v32 = vld [vmem:[#allocation17 + $0x278] sm:$0xff]  ;;  %v3894_v35 = vld [vmem:[#allocation17 + $0x270] sm:$0xff]  ;;  %v4385_v53 = vld [vmem:[#allocation17 + $0x320] sm:$0xff] }
0x12e4   : > { %v3181_v36 = vsub.f32 1.0, %v3173_v13  ;;  %v3203_v10 = vsel %vm3187_vm6, %v3195_v28, %v3179_v17  ;;  %v3892_v13 = vld [vmem:[#allocation17 + $0x260] sm:$0xff]  ;;  %v4387_v7 = vld [vmem:[#allocation17 + $0x330] sm:$0xff] }
0x12e5   : > { %v3180_v11 = vsub.f32 1.0, %v3172_v20  ;;  %v3202_v37 = vsel %vm3186_vm7, %v3194_v5, %v3178_v14  ;;  %v3211_v43 = vadd.f32 1.0, %v3203_v10  ;;  %v3897_v14 = vld [vmem:[#allocation17 + $0x288] sm:$0xff]  ;;  %v3899_v20 = vld [vmem:[#allocation17 + $0x298] sm:$0xff]  ;;  %v6067_v28 = vpack.c.bf16 %v3894_v35, %v3892_v13  ;;  %v3898_v5 = vld [vmem:[#allocation17 + $0x290] sm:$0xff] }
0x12e6   : > { %v3197_v12 = vsub.f32 0.0, %v3181_v36  ;;  %v3210_v61 = vadd.f32 1.0, %v3202_v37  ;;  %v3902_v37 = vld [vmem:[#allocation17 + $0x2b0] sm:$0xff]  ;;  %v4393_v13 = vld [vmem:[#allocation17 + $0x360] sm:$0xff] }
0x12e7   : > { %v3196_v21 = vsub.f32 0.0, %v3180_v11  ;;  %v3219_v19 = vmul.f32 %v3211_v43, %v3011_v16  ;;  %v3905_v43 = vld [vmem:[#allocation17 + $0x2c8] sm:$0xff]  ;;  %v3904_v16 = vld [vmem:[#allocation17 + $0x2c0] sm:$0xff]  ;;  %v4395_v35 = vld [vmem:[#allocation17 + $0x370] sm:$0xff] }
0x12e8   : > { %v3205_v47 = vsel %vm3189_vm8, %v3197_v12, %v3181_v36  ;;  %v6069_v36 = vpack.c.bf16 %v3899_v20, %v3897_v14  ;;  %v4398_v14 = vld [vmem:[#allocation17 + $0x388] sm:$0xff]  ;;  %v4400_v20 = vld [vmem:[#allocation17 + $0x398] sm:$0xff] }
0x12e9   : > { %v3213_v50 = vadd.f32 1.0, %v3205_v47  ;;  %v3204_v42 = vsel %vm3188_vm9, %v3196_v21, %v3180_v11  ;;  %v3901_v11 = vld [vmem:[#allocation17 + $0x2a8] sm:$0xff]  ;;  %v3907_v21 = vld [vmem:[#allocation17 + $0x2d8] sm:$0xff] }
0x12ea   : > { %v3212_v41 = vadd.f32 1.0, %v3204_v42  ;;  %v6077_v47 = vpack.c.bf16 %v3907_v21, %v3905_v43  ;;  %v4382_v42 = vld [vmem:[#allocation17 + $0x308] sm:$0xff]  ;;  %v4408_v21 = vld [vmem:[#allocation17 + $0x3d8] sm:$0xff] }
0x12eb   : > { %v4406_v43 = vld [vmem:[#allocation17 + $0x3c8] sm:$0xff] }
0x12fc   : > { %v2695_v1 = vpop.xlane.xlu0 %2694 }
0x12fd   : > { %v2700_v6 = vmul.f32 0.0078125, %v2695_v1  ;;  %v3885_v1 = vld [vmem:[#allocation17 + $0x228] sm:$0xff] }
0x12fe   : > { %v6057_v25 = vpack.c.bf16 %v3887_v24, %v3885_v1  ;;  %v3908_v1 = vld [vmem:[#allocation17 + $0x2e0] sm:$0xff]  ;;  %v3910_v24 = vld [vmem:[#allocation17 + $0x2f0] sm:$0xff] }
0x12ff   : > { %v2704_v26 = vadd.f32 1e-06, %v2700_v6  ;;  %v3010_v6 = vmul.f32 0.5, %v8030_v45  ;;  %v3012_v45 = vmul.f32 0.5, %v8042_v2  ;;  %v6063_v2 = vpack.c.bf16 %v3890_v58, %v3888_v57  ;;  %v4389_v57 = vld [vmem:[#allocation17 + $0x340] sm:$0xff]  ;;  %v4391_v58 = vld [vmem:[#allocation17 + $0x350] sm:$0xff] }
0x1300   : > { %v2697_v29 = vpop.xlane.xlu0 %2696 }
0x1301   : > { %6563 = vrsqrt.f32 %v2704_v26  ;;  %v2701_v40 = vmul.f32 0.0078125, %v2697_v29  ;;  %v3218_v22 = vmul.f32 %v3210_v61, %v3010_v6  ;;  %v3884_v26 = vld [vmem:[#allocation17 + $0x220] sm:$0xff]  ;;  %v3221_v29 = vmul.f32 %v3213_v50, %v3013_v15  ;;  %v3906_v61 = vld [vmem:[#allocation17 + $0x2d0] sm:$0xff]  ;;  %v4384_v6 = vld [vmem:[#allocation17 + $0x318] sm:$0xff] }
0x1302   : > { %v6059_v46 = vpack.c.bf16 %v3886_v9, %v3884_v26  ;;  %v6083_v15 = vpack.c.bf16 %v3910_v24, %v3908_v1  ;;  %v4388_v26 = vld [vmem:[#allocation17 + $0x338] sm:$0xff]  ;;  %v4409_v1 = vld [vmem:[#allocation17 + $0x3e0] sm:$0xff]  ;;  %v4411_v24 = vld [vmem:[#allocation17 + $0x3f0] sm:$0xff] }
0x1303   : > { %v2705_v60 = vadd.f32 1e-06, %v2701_v40  ;;  %v3220_v40 = vmul.f32 %v3212_v41, %v3012_v45  ;;  %v4386_v41 = vld [vmem:[#allocation17 + $0x328] sm:$0xff] }
0x1304   : > { %v4390_v45 = vld [vmem:[#allocation17 + $0x348] sm:$0xff] }
0x1305   : > { %6565 = vrsqrt.f32 %v2705_v60  ;;  %v3893_v60 = vld [vmem:[#allocation17 + $0x268] sm:$0xff] }
0x1306   : > { %v6065_v17 = vpack.c.bf16 %v3895_v32, %v3893_v60  ;;  %v4394_v60 = vld [vmem:[#allocation17 + $0x368] sm:$0xff]  ;;  %v4396_v32 = vld [vmem:[#allocation17 + $0x378] sm:$0xff] }
0x130b   : > { %v6564_v33 = vpop.eup %6563 }
0x130c   : > { %v2712_v8 = vmul.f32 %v6564_v33, %v7999_v27  ;;  %v3896_v33 = vld [vmem:[#allocation17 + $0x280] sm:$0xff]  ;;  %v8214_v27 = vld [vmem:[#allocation20 + $0x2b0] sm:$0xff] }
0x130d   : > { %v6071_v10 = vpack.c.bf16 %v3898_v5, %v3896_v33  ;;  %v4397_v33 = vld [vmem:[#allocation17 + $0x380] sm:$0xff]  ;;  %v4399_v5 = vld [vmem:[#allocation17 + $0x390] sm:$0xff]  ;;  %9288 = vst [vmem:[#allocation53_spill] sm:$0xff] %v8214_v27 }
0x130e   : > { %v8058_v0 = vmul.f32 %v7980_v52, %v2712_v8  ;;  %v3903_v8 = vld [vmem:[#allocation17 + $0x2b8] sm:$0xff] }
0x130f   : > { %v6566_v34 = vpop.eup %6565  ;;  %v6073_v12 = vpack.c.bf16 %v3903_v8, %v3901_v11  ;;  %v4402_v11 = vld [vmem:[#allocation17 + $0x3a8] sm:$0xff]  ;;  %v4404_v8 = vld [vmem:[#allocation17 + $0x3b8] sm:$0xff] }
0x1310   : > { %v2713_v63 = vmul.f32 %v6566_v34, %v8002_v23  ;;  %5714 = vmatprep.mubr.f32.mxu1 %v8058_v0  ;;  %2998 = vmatmul.mubr.f32.gmra.mrb[30].mxu0 %v8058_v0  ;;  %v3900_v34 = vld [vmem:[#allocation17 + $0x2a0] sm:$0xff] }
0x1311   : > { %3003 = vmatprep.mubr.f32.mxu0 %v7179_v62 }
0x1312   : > { %v8068_v38 = vmul.f32 %v7980_v52, %v2713_v63  ;;  %v6055_v52 = vpack.c.bf16 %v3882_v39, %v3880_v4  ;;  %v6075_v63 = vpack.c.bf16 %v3902_v37, %v3900_v34  ;;  %v3909_v4 = vld [vmem:[#allocation17 + $0x2e8] sm:$0xff]  ;;  %v3911_v39 = vld [vmem:[#allocation17 + $0x2f8] sm:$0xff]  ;;  %v4401_v34 = vld [vmem:[#allocation17 + $0x3a0] sm:$0xff] }
0x1313   : > { %v6081_v50 = vpack.c.bf16 %v3911_v39, %v3909_v4  ;;  %v4403_v37 = vld [vmem:[#allocation17 + $0x3b0] sm:$0xff]  ;;  %v4410_v4 = vld [vmem:[#allocation17 + $0x3e8] sm:$0xff]  ;;  %v4412_v39 = vld [vmem:[#allocation17 + $0x3f8] sm:$0xff] }
0x1314   : > { %5715 = vmatmul.mubr.f32.gmra.mrb[24].mxu1 %v8068_v38  ;;  %3004 = vmatmul.mubr.f32.gmra.mrb[32].mxu0 %v8068_v38 }
0x1315   : > { %3329 = vmatprep.mubr.f32.mxu1 %v3219_v19  ;;  %3488 = vmatprep.mubr.f32.mxu0 %v7179_v62  ;;  %v6079_v19 = vpack.c.bf16 %v3906_v61, %v3904_v16  ;;  %v4405_v16 = vld [vmem:[#allocation17 + $0x3c0] sm:$0xff]  ;;  %v4407_v61 = vld [vmem:[#allocation17 + $0x3d0] sm:$0xff] }
0x1318   : > { %3330 = vmatmul.mubr.f32.vlgmr.msra.gmra.mrb[26].mxu1 %v3218_v22  ;;  %3489 = vmatmul.mubr.f32.vlgmr.msra.gmra.mrb[34].mxu0 %v7985_v30  ;;  %v4381_v22 = vld [vmem:[#allocation17 + $0x300] sm:$0xff] }
0x1319   : > { %6056 = vmatpush1.bf16.msra.mxu0 %v6055_v52  ;;  %3334 = vmatprep.mubr.f32.mxu1 %v3221_v29  ;;  %v6117_v52 = vpack.c.bf16 %v4384_v6, %v4382_v42  ;;  %v6121_v29 = vpack.c.bf16 %v4388_v26, %v4386_v41  ;;  %v6147_v42 = vpack.c.bf16 %v4411_v24, %v4409_v1  ;;  %v3746_v6 = vld [vmem:[#allocation20 + $0x180] sm:$0xff]  ;;  %v3749_v26 = vld [vmem:[#allocation20 + $0x198] sm:$0xff] }
0x131a   : > { %3494 = vmatprep.mubr.f32.mxu0 %v7179_v62  ;;  %6058 = vmatprep.subr.bf16.mxu0 %v6057_v25  ;;  %v4383_v25 = vld [vmem:[#allocation17 + $0x310] sm:$0xff] }
0x131b   : > { %v6119_v9 = vpack.c.bf16 %v4383_v25, %v4381_v22  ;;  %v3730_v22 = vld [vmem:[#allocation20 + $0x100] sm:$0xff]  ;;  %v3731_v25 = vld [vmem:[#allocation20 + $0x108] sm:$0xff] }
0x131c   : > { %3335 = vmatmul.mubr.f32.gmra.mrb[28].mxu1 %v3220_v40  ;;  %3495 = vmatmul.mubr.f32.gmra.mrb[36].mxu0 %v7988_v54  ;;  %v6123_v40 = vpack.c.bf16 %v4387_v7, %v4385_v53  ;;  %v6023_v41 = vpack.c.bf16 %v3731_v25, %v3730_v22 }
0x131d   : > { %6060 = vmatpush1.bf16.msra.mxu0 %v6059_v46  ;;  %3500 = vmatprep.mubr.f32.mxu0 %v7179_v62  ;;  %v4392_v46 = vld [vmem:[#allocation17 + $0x358] sm:$0xff] }
0x131e   : > { %6062 = vmatprep.subr.bf16.mxu0 %v6061_v56  ;;  %v6125_v56 = vpack.c.bf16 %v4392_v46, %v4390_v45  ;;  %v3735_v45 = vld [vmem:[#allocation20 + $0x128] sm:$0xff] }
0x1320   : > { %3501 = vmatmul.mubr.f32.gmra.mrb[38].mxu0 %v8058_v0 }
0x1321   : > { %6064 = vmatpush1.bf16.msra.mxu0 %v6063_v2  ;;  %3506 = vmatprep.mubr.f32.mxu0 %v7179_v62  ;;  %v6127_v2 = vpack.c.bf16 %v4391_v58, %v4389_v57  ;;  %v3736_v58 = vld [vmem:[#allocation20 + $0x130] sm:$0xff] }
0x1322   : > { %6066 = vmatprep.subr.bf16.mxu0 %v6065_v17  ;;  %v6129_v17 = vpack.c.bf16 %v4396_v32, %v4394_v60  ;;  %v3737_v60 = vld [vmem:[#allocation20 + $0x138] sm:$0xff] }
0x1323   : > { %v6035_v32 = vpack.c.bf16 %v3737_v60, %v3736_v58  ;;  %v3913_v58 = vld [vmem:[#allocation19 + $0x4] sm:$0x3]  ;;  %v8128_v60 = vld [vmem:[#allocation20 + $0x200] sm:$0xff] }
0x1324   : > { %3507 = vmatmul.mubr.f32.gmra.mrb[40].mxu0 %v8068_v38  ;;  %9274 = vst [vmem:[#allocation39_spill] sm:$0xff] %v8128_v60 }
0x1325   : > { %6068 = vmatpush1.bf16.msra.mxu0 %v6067_v28  ;;  %3989 = vmatprep.mubr.f32.mxu0 %v7179_v62  ;;  %v6131_v28 = vpack.c.bf16 %v4395_v35, %v4393_v13  ;;  %v3738_v35 = vld [vmem:[#allocation20 + $0x140] sm:$0xff] }
0x1326   : > { %6070 = vmatprep.subr.bf16.mxu0 %v6069_v36  ;;  %v6133_v36 = vpack.c.bf16 %v4400_v20, %v4398_v14  ;;  %v3739_v14 = vld [vmem:[#allocation20 + $0x148] sm:$0xff] }
0x1327   : > { %v6039_v20 = vpack.c.bf16 %v3739_v14, %v3738_v35 }
0x1329   : > { %6072 = vmatpush1.bf16.msra.mxu0 %v6071_v10  ;;  %v6135_v10 = vpack.c.bf16 %v4399_v5, %v4397_v33  ;;  %v3740_v5 = vld [vmem:[#allocation20 + $0x150] sm:$0xff] }
0x132a   : > { %6074 = vmatprep.subr.bf16.mxu0 %v6073_v12  ;;  %v6137_v12 = vpack.c.bf16 %v4404_v8, %v4402_v11  ;;  %v3741_v11 = vld [vmem:[#allocation20 + $0x158] sm:$0xff] }
0x132b   : > { %v6043_v8 = vpack.c.bf16 %v3741_v11, %v3740_v5 }
0x132d   : > { %6076 = vmatpush1.bf16.msra.mxu0 %v6075_v63  ;;  %v6139_v63 = vpack.c.bf16 %v4403_v37, %v4401_v34  ;;  %v3742_v37 = vld [vmem:[#allocation20 + $0x160] sm:$0xff] }
0x132e   : > { %6078 = vmatprep.subr.bf16.mxu0 %v6077_v47  ;;  %v6141_v47 = vpack.c.bf16 %v4408_v21, %v4406_v43  ;;  %v3743_v43 = vld [vmem:[#allocation20 + $0x168] sm:$0xff] }
0x132f   : > { %v6047_v21 = vpack.c.bf16 %v3743_v43, %v3742_v37 }
0x1331   : > { %6080 = vmatpush1.bf16.msra.mxu0 %v6079_v19  ;;  %v6143_v19 = vpack.c.bf16 %v4407_v61, %v4405_v16  ;;  %v3744_v61 = vld [vmem:[#allocation20 + $0x170] sm:$0xff] }
0x1332   : > { %6082 = vmatprep.subr.bf16.mxu0 %v6081_v50  ;;  %v6145_v50 = vpack.c.bf16 %v4412_v39, %v4410_v4  ;;  %v3745_v4 = vld [vmem:[#allocation20 + $0x178] sm:$0xff] }
0x1333   : > { %v6051_v39 = vpack.c.bf16 %v3745_v4, %v3744_v61 }
0x1335   : > { %6084 = vmatpush1.bf16.msra.mxu0 %v6083_v15  ;;  %v3747_v15 = vld [vmem:[#allocation20 + $0x188] sm:$0xff] }
0x1336   : > { %6118 = vmatprep.subr.bf16.mxu0 %v6117_v52  ;;  %v6021_v52 = vpack.c.bf16 %v3747_v15, %v3746_v6 }
0x1338   : > { %3990 = vmatmul.mubr.f32.vlgmr.msra.gmra.mrb[42].mxu0 %v7985_v30  ;;  %6022 = vmatprep.subr.bf16.mxu1 %v6021_v52 }
0x1339   : > { %6120 = vmatpush1.bf16.msra.mxu0 %v6119_v9  ;;  %3995 = vmatprep.mubr.f32.mxu0 %v7179_v62 }
0x133a   : > { %6122 = vmatprep.subr.bf16.mxu0 %v6121_v29  ;;  %6024 = vmatpush3.bf16.msra.mxu1 %v6023_v41  ;;  %v3733_v29 = vld [vmem:[#allocation20 + $0x118] sm:$0xff] }
0x133c   : > { %3996 = vmatmul.mubr.f32.gmra.mrb[44].mxu0 %v7988_v54 }
0x133d   : > { %6124 = vmatpush1.bf16.msra.mxu0 %v6123_v40  ;;  %4001 = vmatprep.mubr.f32.mxu0 %v7179_v62  ;;  %v3752_v40 = vld [vmem:[#allocation20 + $0x1b0] sm:$0xff] }
0x133e   : > { %6126 = vmatprep.subr.bf16.mxu0 %v6125_v56  ;;  %v3753_v56 = vld [vmem:[#allocation20 + $0x1b8] sm:$0xff] }
0x133f   : > { %v6033_v57 = vpack.c.bf16 %v3753_v56, %v3752_v40 }
0x1340   : > { %4002 = vmatmul.mubr.f32.gmra.mrb[46].mxu0 %v8058_v0 }
0x1341   : > { %6128 = vmatpush1.bf16.msra.mxu0 %v6127_v2  ;;  %4007 = vmatprep.mubr.f32.mxu0 %v7179_v62  ;;  %v3754_v2 = vld [vmem:[#allocation20 + $0x1c0] sm:$0xff] }
0x1342   : > { %6130 = vmatprep.subr.bf16.mxu0 %v6129_v17  ;;  %v3755_v17 = vld [vmem:[#allocation20 + $0x1c8] sm:$0xff] }
0x1343   : > { %v6037_v13 = vpack.c.bf16 %v3755_v17, %v3754_v2 }
0x1344   : > { %4008 = vmatmul.mubr.f32.gmra.mrb[48].mxu0 %v8068_v38 }
0x1345   : > { %6132 = vmatpush1.bf16.msra.mxu0 %v6131_v28  ;;  %4490 = vmatprep.mubr.f32.mxu0 %v7179_v62  ;;  %v3756_v28 = vld [vmem:[#allocation20 + $0x1d0] sm:$0xff] }
0x1346   : > { %6134 = vmatprep.subr.bf16.mxu0 %v6133_v36  ;;  %v3757_v36 = vld [vmem:[#allocation20 + $0x1d8] sm:$0xff] }
0x1347   : > { %v6041_v33 = vpack.c.bf16 %v3757_v36, %v3756_v28  ;;  %v2838_v24 = vpop.xlane.xlu1 %2837  ;;  %v8146_v28 = vld [vmem:[#allocation20 + $0x298] sm:$0xff]  ;;  %v8148_v36 = vld [vmem:[#allocation20 + $0x210] sm:$0xff] }
0x1348   : > { %v2835_v6 = vpop.xlane.xlu0 %2834  ;;  %9278 = vst [vmem:[#allocation43_spill] sm:$0xff] %v8146_v28  ;;  %9279 = vst [vmem:[#allocation44_spill] sm:$0xff] %v8148_v36 }
0x1349   : > { %6136 = vmatpush1.bf16.msra.mxu0 %v6135_v10  ;;  %v3758_v10 = vld [vmem:[#allocation20 + $0x1e0] sm:$0xff]  ;;  %v2845_v15 = vsub.f32 %v8017_v31, %v2835_v6 }
0x134a   : > { %6138 = vmatprep.subr.bf16.mxu0 %v6137_v12  ;;  %v3759_v12 = vld [vmem:[#allocation20 + $0x1e8] sm:$0xff] }
0x134b   : > { %v6045_v34 = vpack.c.bf16 %v3759_v12, %v3758_v10  ;;  %v2849_v22 = vmul.f32 1.442695, %v2845_v15  ;;  %v8159_v10 = vld [vmem:[#allocation20 + $0x218] sm:$0xff]  ;;  %v8161_v12 = vld [vmem:[#allocation20 + $0x2a0] sm:$0xff] }
0x134c   : > { %9280 = vst [vmem:[#allocation45_spill] sm:$0xff] %v8159_v10  ;;  %9281 = vst [vmem:[#allocation46_spill] sm:$0xff] %v8161_v12 }
0x134d   : > { %6140 = vmatpush1.bf16.msra.mxu0 %v6139_v63  ;;  %v3760_v63 = vld [vmem:[#allocation20 + $0x1f0] sm:$0xff] }
0x134e   : > { %6142 = vmatprep.subr.bf16.mxu0 %v6141_v47  ;;  %v3761_v47 = vld [vmem:[#allocation20 + $0x1f8] sm:$0xff] }
0x134f   : > { %v6049_v16 = vpack.c.bf16 %v3761_v47, %v3760_v63  ;;  %v8172_v47 = vrot.slane %v3913_v58, %v7694_v48 }
0x1351   : > { %6144 = vmatpush1.bf16.msra.mxu0 %v6143_v19  ;;  %v4247_v19 = vld [vmem:[#allocation20 + $0x280] sm:$0xff] }
0x1352   : > { %6146 = vmatprep.subr.bf16.mxu0 %v6145_v50  ;;  %v4248_v50 = vld [vmem:[#allocation20 + $0x288] sm:$0xff] }
0x1353   : > { %v6085_v1 = vpack.c.bf16 %v4248_v50, %v4247_v19  ;;  %v8180_v50 = vld [vmem:[#allocation20 + $0x220] sm:$0xff] }
0x1354   : > { %9284 = vst [vmem:[#allocation49_spill] sm:$0xff] %v8180_v50 }
0x1355   : > { %6148 = vmatpush1.bf16.msra.mxu0 %v6147_v42  ;;  %v2846_v42 = vsub.f32 %v8011_v3, %v2838_v24 }
0x1357   : > { %v2851_v52 = vmul.f32 1.442695, %v2846_v42 }
0x1358   : > { %4491 = vmatmul.mubr.f32.vlgmr.msra.gmra.mrb[50].mxu0 %v7985_v30  ;;  %v3748_v30 = vld [vmem:[#allocation20 + $0x190] sm:$0xff] }
0x1359   : > { %4496 = vmatprep.mubr.f32.mxu0 %v7179_v62  ;;  %v6025_v9 = vpack.c.bf16 %v3749_v26, %v3748_v30  ;;  %6567 = vpow2.f32 %v2851_v52  ;;  %v4414_v52 = vld [vmem:[#allocation19 + $0x6] sm:$0x3] }
0x135a   : > { %6569 = vpow2.f32 %v2849_v22 }
0x135b   : > { %6026 = vmatprep.subr.bf16.mxu1 %v6025_v9 }
0x135c   : > { %4497 = vmatmul.mubr.f32.gmra.mrb[52].mxu0 %v7988_v54  ;;  %v3732_v54 = vld [vmem:[#allocation20 + $0x110] sm:$0xff] }
0x135d   : > { %4502 = vmatprep.mubr.f32.mxu0 %v7179_v62  ;;  %v6027_v53 = vpack.c.bf16 %v3733_v29, %v3732_v54 }
0x135f   : > { %6028 = vmatpush3.bf16.msra.mxu1 %v6027_v53 }
0x1360   : > { %4503 = vmatmul.mubr.f32.gmra.mrb[54].mxu0 %v8058_v0  ;;  %v3750_v0 = vld [vmem:[#allocation20 + $0x1a0] sm:$0xff] }
0x1361   : > { %4508 = vmatprep.mubr.f32.mxu0 %v7179_v62  ;;  %v3751_v62 = vld [vmem:[#allocation20 + $0x1a8] sm:$0xff] }
0x1362   : > { %v6029_v7 = vpack.c.bf16 %v3751_v62, %v3750_v0  ;;  %v3412_v62 = vld [vmem:[#allocation19 + $0x2] sm:$0x3] }
0x1363   : > { %v8107_v29 = vpop.eup %6567  ;;  %v8126_v40 = vrot.slane %v3412_v62, %v7689_v44  ;;  %v8154_v5 = vrot.slane %v3412_v62, %v7694_v48 }
0x1364   : > { %4509 = vmatmul.mubr.f32.gmra.mrb[56].mxu0 %v8068_v38  ;;  %v3734_v38 = vld [vmem:[#allocation20 + $0x120] sm:$0xff]  ;;  %6030 = vmatprep.subr.bf16.mxu1 %v6029_v7  ;;  %9272 = vst [vmem:[#allocation37_spill] sm:$0xff] %v8107_v29 }
0x1365   : > { %v6031_v46 = vpack.c.bf16 %v3735_v45, %v3734_v38  ;;  %v8118_v38 = vpop.eup %6569 }
0x1366   : > { %9273 = vst [vmem:[#allocation38_spill] sm:$0xff] %v8118_v38  ;;  %v8142_v14 = vsel %vm2832_vm5, %v8118_v38, 0.0 }
0x1367   : > { %6032 = vmatpush3.bf16.msra.mxu1 %v6031_v46  ;;  %v2860_v46 = vsel %vm2832_vm5, %v8107_v29, 0.0 }
0x1368   : > { %6034 = vmatprep.subr.bf16.mxu1 %v6033_v57 }
0x136b   : > { %6036 = vmatpush3.bf16.msra.mxu1 %v6035_v32  ;;  %v8130_v32 = vld [vmem:[#allocation20 + $0x208] sm:$0xff] }
0x136c   : > { %6038 = vmatprep.subr.bf16.mxu1 %v6037_v13  ;;  %9275 = vst [vmem:[#allocation40_spill] sm:$0xff] %v8130_v32 }
0x136f   : > { %6040 = vmatpush3.bf16.msra.mxu1 %v6039_v20  ;;  %v8144_v20 = vld [vmem:[#allocation20 + $0x290] sm:$0xff] }
0x1370   : > { %6042 = vmatprep.subr.bf16.mxu1 %v6041_v33  ;;  %9277 = vst [vmem:[#allocation42_spill] sm:$0xff] %v8144_v20 }
0x1373   : > { %6044 = vmatpush3.bf16.msra.mxu1 %v6043_v8  ;;  %v8157_v8 = vrot.slane %v3913_v58, %v7689_v44  ;;  %v8216_v58 = vld [vmem:[#allocation20 + $0x2b8] sm:$0xff] }
0x1374   : > { %6046 = vmatprep.subr.bf16.mxu1 %v6045_v34  ;;  %v8163_v34 = vld [vmem:[#allocation20 + $0x2a8] sm:$0xff]  ;;  %9289 = vst [vmem:[#allocation54_spill] sm:$0xff] %v8216_v58 }
0x1375   : > { %9282 = vst [vmem:[#allocation47_spill] sm:$0xff] %v8163_v34 }
0x1377   : > { %6048 = vmatpush3.bf16.msra.mxu1 %v6047_v21 }
0x1378   : > { %6050 = vmatprep.subr.bf16.mxu1 %v6049_v16 }
0x137b   : > { %6052 = vmatpush3.bf16.msra.mxu1 %v6051_v39 }
0x137c   : > { %6086 = vmatprep.subr.bf16.mxu1 %v6085_v1  ;;  %v8182_v1 = vld [vmem:[#allocation20 + $0x228] sm:$0xff] }
0x137d   : > { %9285 = vst [vmem:[#allocation50_spill] sm:$0xff] %v8182_v1 }
0x13e3   : > { %v2999_v25 = vpop.f32.mrb[30].mxu0 }
0x13e4   : > { %v3001_v41 = vpop.f32.mrb[31].mxu0  ;;  %v8102_v30 = vadd.f32 %v2999_v25, %v8022_v18 }
0x13e5   : > { %v8105_v26 = vadd.f32 %v3001_v41, %v8014_v59 }
0x13e6   : > { %v8110_v31 = vmul.f32 0.70710677, %v8102_v30 }
0x13e7   : > { %v5716_v9 = vpop.f32.mrb[24].mxu1  ;;  %v3005_v54 = vpop.f32.mrb[32].mxu0  ;;  %v8113_v0 = vmul.f32 0.70710677, %v8105_v26 }
0x13e8   : > { %v2823_v3 = vpop.f32.mrb[25].mxu1  ;;  %v3007_v53 = vpop.f32.mrb[33].mxu0  ;;  %v8116_v7 = vadd.f32 %v3005_v54, %v8022_v18  ;;  %v3030_v18 = vand.u32 2147483647, %v8110_v31  ;;  %vm3190_vm12 = vcmp.lt.f32.partialorder %v8110_v31, 0.0 }
0x13e9   : > { %v8121_v45 = vadd.f32 %v3007_v53, %v8014_v59  ;;  %v3031_v2 = vand.u32 2147483647, %v8113_v0  ;;  %v8135_v59 = vadd.f32 %v5716_v9, %v8008_v55  ;;  %v8166_v37 = vadd.f32 %v8008_v55, %v2823_v3 }
0x13ea   : > { %v8138_v35 = vmul.f32 0.70710677, %v8116_v7  ;;  %v3142_v61 = vsub.f32 0.0, %v3030_v18  ;;  %v3038_v22 = vmul.f32 0.3275911, %v3030_v18  ;;  %vm3191_vm11 = vcmp.lt.f32.partialorder %v8113_v0, 0.0 }
0x13eb   : > { %v3490_v56 = vpop.f32.mrb[34].mxu0  ;;  %v5347_v57 = vpop.f32.mrb[26].mxu1  ;;  %9276 = vst [vmem:[#allocation41_spill] sm:$0xff] %v8135_v59  ;;  %v8151_v33 = vmul.f32 0.70710677, %v8121_v45  ;;  %9283 = vst [vmem:[#allocation48_spill] sm:$0xff] %v8166_v37 }
0x13ec   : > { %v5348_v17 = vpop.f32.mrb[27].mxu1  ;;  %v3492_v13 = vpop.f32.mrb[35].mxu0  ;;  %v8169_v43 = vadd.f32 %v3490_v56, %v8126_v40  ;;  %v3143_v4 = vsub.f32 0.0, %v3031_v2  ;;  %v2842_v39 = vsel %vm2832_vm5, %v8135_v59, -inf  ;;  %v3032_v24 = vand.u32 2147483647, %v8138_v35 }
0x13ed   : > { %2843 = vmax.xlane.f32.xlu1 %v2842_v39  ;;  %v3033_v25 = vand.u32 2147483647, %v8151_v33  ;;  %v8193_v41 = vadd.f32 %v5348_v17, %v5347_v57  ;;  %v8196_v9 = vadd.f32 %v3492_v13, %v8154_v5  ;;  %v3039_v3 = vmul.f32 0.3275911, %v3031_v2 }
0x13ee   : > { %v8186_v42 = vmul.f32 0.70710677, %v8169_v43  ;;  %v2839_v62 = vsel %vm2832_vm5, %v8166_v37, -inf  ;;  %v3150_v39 = vmul.f32 %v3142_v61, %v3030_v18  ;;  %v3151_v15 = vmul.f32 %v3143_v4, %v3031_v2 }
0x13ef   : > { %v3496_v11 = vpop.f32.mrb[36].mxu0  ;;  %v5350_v21 = vpop.f32.mrb[28].mxu1  ;;  %9286 = vst [vmem:[#allocation51_spill] sm:$0xff] %v8193_v41  ;;  %v8204_v6 = vmul.f32 0.70710677, %v8196_v9  ;;  %2840 = vmax.xlane.f32.xlu0 %v2839_v62  ;;  %v3144_v17 = vsub.f32 0.0, %v3032_v24 }
0x13f0   : > { %v3498_v63 = vpop.f32.mrb[37].mxu0  ;;  %v5351_v19 = vpop.f32.mrb[29].mxu1  ;;  %v3529_v53 = vand.u32 2147483647, %v8186_v42  ;;  %v8207_v57 = vadd.f32 %v3496_v11, %v8126_v40  ;;  %v3046_v18 = vadd.f32 1.0, %v3038_v22  ;;  %v3145_v2 = vsub.f32 0.0, %v3033_v25 }
0x13f1   : > { %2861 = vadd.xlane.f32.xlu1 %v2860_v46  ;;  %v8209_v55 = vadd.f32 %v5351_v19, %v5350_v21  ;;  %v8212_v16 = vadd.f32 %v3498_v63, %v8154_v5  ;;  %v8222_v11 = vrot.slane %v4414_v52, %v7689_v44  ;;  %v8225_v4 = vmul.f32 0.5, %v8102_v30 }
0x13f2   : > { %v3537_v13 = vmul.f32 0.3275911, %v3529_v53  ;;  %v8219_v61 = vmul.f32 0.70710677, %v8207_v57  ;;  %v3047_v46 = vadd.f32 1.0, %v3039_v3  ;;  %v3153_v3 = vmul.f32 %v3145_v2, %v3033_v25 }
0x13f3   : > { %v3502_v54 = vpop.f32.mrb[38].mxu0  ;;  %9287 = vst [vmem:[#allocation52_spill] sm:$0xff] %v8209_v55  ;;  %v3040_v21 = vmul.f32 0.3275911, %v3032_v24  ;;  %v3162_v62 = vmul.f32 1.442695, %v3150_v39  ;;  %2858 = vadd.xlane.f32.xlu0 %v8142_v14  ;;  %v3152_v55 = vmul.f32 %v3144_v17, %v3032_v24  ;;  %v8237_v14 = vrot.slane %v4414_v52, %v7694_v48 }
0x13f4   : > { %v3504_v56 = vpop.f32.mrb[39].mxu0  ;;  %v3545_v19 = vadd.f32 1.0, %v3537_v13  ;;  %v3041_v23 = vmul.f32 0.3275911, %v3033_v25  ;;  %v3530_v49 = vand.u32 2147483647, %v8204_v6  ;;  %v3503_v38 = vadd.f32 %v3502_v54, %v8126_v40 }
0x13f5   : > { %v3164_v51 = vmul.f32 1.442695, %v3151_v15  ;;  %v8232_v44 = vmul.f32 0.70710677, %v8212_v16  ;;  %v3641_v13 = vsub.f32 0.0, %v3529_v53  ;;  %v3048_v41 = vadd.f32 1.0, %v3040_v21 }
0x13f6   : > { %6571 = vrcp.f32 %v3545_v19  ;;  %v3531_v39 = vand.u32 2147483647, %v8219_v61  ;;  %9290 = vst [vmem:[#allocation55_spill] sm:$0xff] %v8237_v14  ;;  %v8240_v24 = vmul.f32 0.5, %v8105_v26  ;;  %v3049_v15 = vadd.f32 1.0, %v3041_v23 }
0x13f7   : > { %v3508_v63 = vpop.f32.mrb[40].mxu0  ;;  %6573 = vrcp.f32 %v3046_v18  ;;  %v3642_v17 = vsub.f32 0.0, %v3530_v49  ;;  %v3166_v19 = vmul.f32 1.442695, %v3152_v55  ;;  %v3532_v25 = vand.u32 2147483647, %v8232_v44 }
0x13f8   : > { %v3510_v30 = vpop.f32.mrb[41].mxu0  ;;  %6575 = vrcp.f32 %v3047_v46  ;;  %v8243_v18 = vmul.f32 0.70710677, %v3503_v38  ;;  %v3168_v2 = vmul.f32 1.442695, %v3153_v3  ;;  %v3649_v46 = vmul.f32 %v3641_v13, %v3529_v53 }
0x13f9   : > { %6577 = vpow2.f32 %v3162_v62  ;;  %v3643_v21 = vsub.f32 0.0, %v3531_v39  ;;  %v8246_v54 = vadd.f32 %v3504_v56, %v8154_v5  ;;  %v8249_v48 = vmul.f32 0.5, %v8116_v7 }
0x13fa   : > { %6579 = vpow2.f32 %v3164_v51  ;;  %9291 = vst [vmem:[#allocation56_spill] sm:$0xff] %v8243_v18  ;;  %v3538_v26 = vmul.f32 0.3275911, %v3530_v49  ;;  %v8252_v23 = vadd.f32 %v3508_v63, %v8126_v40  ;;  %v8255_v51 = vmul.f32 0.5, %v8121_v45 }
0x13fb   : > { %6581 = vrcp.f32 %v3048_v41  ;;  %v3650_v55 = vmul.f32 %v3642_v17, %v3530_v49  ;;  %v3539_v52 = vmul.f32 0.3275911, %v3531_v39  ;;  %v3644_v53 = vsub.f32 0.0, %v3532_v25 }
0x13fc   : > { %6583 = vrcp.f32 %v3049_v15  ;;  %v3533_v62 = vand.u32 2147483647, %v8243_v18  ;;  %v8259_v56 = vmul.f32 0.70710677, %v8246_v54  ;;  %v8262_v7 = vmul.f32 0.5, %v8169_v43 }
0x13fd   : > { %6585 = vpow2.f32 %v3166_v19  ;;  %v3657_v41 = vmul.f32 1.442695, %v3649_v46  ;;  %v3651_v40 = vmul.f32 %v3643_v21, %v3531_v39  ;;  %v8267_v45 = vmul.f32 0.5, %v8196_v9 }
0x13fe   : > { %6587 = vpow2.f32 %v3168_v2  ;;  %v3546_v49 = vadd.f32 1.0, %v3538_v26  ;;  %v3540_v3 = vmul.f32 0.3275911, %v3532_v25  ;;  %v8270_v13 = vmul.f32 0.70710677, %v8252_v23 }
0x13ff   : > { %9292 = vst [vmem:[#allocation57_spill] sm:$0xff] %v8267_v45  ;;  %v3659_v19 = vmul.f32 1.442695, %v3650_v55  ;;  %v8276_v43 = vmul.f32 0.5, %v8207_v57  ;;  %v8279_v39 = vadd.f32 %v3510_v30, %v8154_v5  ;;  %v3547_v9 = vadd.f32 1.0, %v3539_v52 }
0x1400   : > { %v8264_v63 = vpop.eup %6571  ;;  %9293 = vst [vmem:[#allocation58_spill] sm:$0xff] %v8270_v13  ;;  %v3652_v46 = vmul.f32 %v3644_v53, %v3532_v25  ;;  %v3645_v21 = vsub.f32 0.0, %v3533_v62  ;;  %v3534_v26 = vand.u32 2147483647, %v8259_v56  ;;  %6589 = vpow2.f32 %v3657_v41 }
0x1401   : > { %v8272_v15 = vpop.eup %6573  ;;  %v3569_v17 = vmul.f32 1.0614054, %v8264_v63  ;;  %9294 = vst [vmem:[#allocation59_spill] sm:$0xff] %v8276_v43  ;;  %v3661_v37 = vmul.f32 1.442695, %v3651_v40  ;;  %6591 = vrcp.f32 %v3546_v49  ;;  %v8289_v57 = vmul.f32 0.5, %v8212_v16 }
0x1402   : > { %v8281_v2 = vpop.eup %6575  ;;  %v3541_v59 = vmul.f32 0.3275911, %v3533_v62  ;;  %v3548_v5 = vadd.f32 1.0, %v3540_v3  ;;  %v3535_v30 = vand.u32 2147483647, %v8270_v13  ;;  %6593 = vpow2.f32 %v3659_v19 }
0x1403   : > { %v8284_v22 = vpop.eup %6577  ;;  %v3577_v29 = vadd.f32 -1.4531521, %v3569_v17  ;;  %9295 = vst [vmem:[#allocation60_spill] sm:$0xff] %v8289_v57  ;;  %v8293_v52 = vmul.f32 0.5, %v3503_v38  ;;  %v8296_v53 = vmul.f32 0.70710677, %v8279_v39  ;;  %6595 = vrcp.f32 %v3547_v9 }
0x1404   : > { %v8286_v55 = vpop.eup %6579  ;;  %v3663_v40 = vmul.f32 1.442695, %v3652_v46  ;;  %v3653_v17 = vmul.f32 %v3645_v21, %v3533_v62  ;;  %v3542_v49 = vmul.f32 0.3275911, %v3534_v26  ;;  %6597 = vpow2.f32 %v3661_v37 }
0x1405   : > { %v3585_v25 = vmul.f32 %v8264_v63, %v3577_v29  ;;  %9296 = vst [vmem:[#allocation61_spill] sm:$0xff] %v8293_v52  ;;  %9297 = vst [vmem:[#allocation62_spill] sm:$0xff] %v8296_v53  ;;  %v8298_v41 = vpop.eup %6581  ;;  %v3549_v3 = vadd.f32 1.0, %v3541_v59  ;;  %v3071_v29 = vmul.f32 1.0614054, %v8281_v2  ;;  %6599 = vrcp.f32 %v3548_v5 }
0x1406   : > { %v8300_v27 = vpop.eup %6583  ;;  %v3646_v38 = vsub.f32 0.0, %v3534_v26  ;;  %v3543_v52 = vmul.f32 0.3275911, %v3535_v30  ;;  %v3647_v21 = vsub.f32 0.0, %v3535_v30  ;;  %v3536_v37 = vand.u32 2147483647, %v8296_v53 }
0x1407   : > { %v3593_v16 = vadd.f32 1.4214138, %v3585_v25  ;;  %v8303_v19 = vpop.eup %6585  ;;  %6601 = vpow2.f32 %v3663_v40  ;;  %v3665_v25 = vmul.f32 1.442695, %v3653_v17  ;;  %v8316_v5 = vmul.f32 0.5, %v8246_v54 }
0x1408   : > { %v8308_v46 = vpop.eup %6587  ;;  %6603 = vrcp.f32 %v3549_v3  ;;  %v3550_v1 = vadd.f32 1.0, %v3542_v49  ;;  %v3079_v34 = vadd.f32 -1.4531521, %v3071_v29  ;;  %v3551_v10 = vadd.f32 1.0, %v3543_v52 }
0x1409   : > { %v3601_v62 = vmul.f32 %v8264_v63, %v3593_v16  ;;  %9298 = vst [vmem:[#allocation63_spill] sm:$0xff] %v8316_v5  ;;  %v3654_v16 = vmul.f32 %v3646_v38, %v3534_v26  ;;  %v3655_v5 = vmul.f32 %v3647_v21, %v3535_v30  ;;  %6605 = vpow2.f32 %v3665_v25 }
0x140a   : > { %v6590_v54 = vpop.eup %6589  ;;  %v3544_v49 = vmul.f32 0.3275911, %v3536_v37  ;;  %6607 = vrcp.f32 %v3550_v1  ;;  %v3087_v28 = vmul.f32 %v8281_v2, %v3079_v34  ;;  %v8349_v18 = vmul.f32 0.5, %v8252_v23  ;;  %v8357_v34 = vld [vmem:[#allocation20 + $0x230] sm:$0xff] }
0x140b   : > { %v3991_v13 = vpop.f32.mrb[42].mxu0  ;;  %v8329_v3 = vpop.eup %6591  ;;  %v3667_v30 = vmul.f32 1.442695, %v3654_v16  ;;  %6609 = vrcp.f32 %v3551_v10  ;;  %v8352_v16 = vmul.f32 0.5, %v8279_v39  ;;  %9304 = vst [vmem:[#allocation69_spill] sm:$0xff] %v8357_v34  ;;  %vm3689_vm10 = vcmp.lt.f32.partialorder %v8186_v42, 0.0 }
0x140c   : > { %v8306_v58 = vadd.f32 %v3991_v13, %v8157_v8  ;;  %v3993_v9 = vpop.f32.mrb[43].mxu0  ;;  %v3609_v13 = vadd.f32 -0.28449672, %v3601_v62  ;;  %v3648_v62 = vsub.f32 0.0, %v3536_v37  ;;  %v8334_v38 = vpop.eup %6593  ;;  %9301 = vst [vmem:[#allocation66_spill] sm:$0xff] %v8349_v18  ;;  %vm3192_vm13 = vcmp.lt.f32.partialorder %v8138_v35, 0.0 }
0x140d   : > { %v8313_v59 = vadd.f32 %v3993_v9, %v8172_v47  ;;  %v8340_v52 = vpop.eup %6595  ;;  %9302 = vst [vmem:[#allocation67_spill] sm:$0xff] %v8352_v16  ;;  %vm3193_vm14 = vcmp.lt.f32.partialorder %v8151_v33, 0.0  ;;  %vm3690_vm15 = vcmp.lt.f32.partialorder %v8204_v6, 0.0  ;;  %vm3692_vm0 = vcmp.lt.f32.partialorder %v8232_v44, 0.0  ;;  %v9325_v6 = vld [vmem:[#allocation55_spill] sm:$0xff] }
0x140e   : > { %v8319_v50 = vmul.f32 0.70710677, %v8306_v58  ;;  %v3617_v9 = vmul.f32 %v8264_v63, %v3609_v13  ;;  %v8343_v60 = vpop.eup %6597  ;;  %v3656_v1 = vmul.f32 %v3648_v62, %v3536_v37  ;;  %vm3691_vm1 = vcmp.lt.f32.partialorder %v8219_v61, 0.0 }
0x140f   : > { %v3997_v12 = vpop.f32.mrb[44].mxu0  ;;  %v8323_v53 = vmul.f32 0.70710677, %v8313_v59  ;;  %vm3694_vm2 = vcmp.lt.f32.partialorder %v8259_v56, 0.0 }
0x1410   : > { %v4030_v36 = vand.u32 2147483647, %v8319_v50  ;;  %v8326_v40 = vadd.f32 %v3997_v12, %v8157_v8  ;;  %v3999_v17 = vpop.f32.mrb[45].mxu0  ;;  %v3625_v43 = vadd.f32 0.2548296, %v3617_v9  ;;  %vm4190_vm3 = vcmp.lt.f32.partialorder %v8319_v50, 0.0 }
0x1411   : > { %9299 = vst [vmem:[#allocation64_spill] sm:$0xff] %v8323_v53  ;;  %v8332_v29 = vadd.f32 %v3999_v17, %v8172_v47  ;;  %v4031_v12 = vand.u32 2147483647, %v8323_v53  ;;  %v3669_v9 = vmul.f32 1.442695, %v3655_v5  ;;  %v8346_v53 = vpop.eup %6599  ;;  %v8360_v5 = vld [vmem:[#allocation20 + $0x238] sm:$0xff] }
0x1412   : > { %v4038_v26 = vmul.f32 0.3275911, %v4030_v36  ;;  %v8338_v20 = vmul.f32 0.70710677, %v8326_v40  ;;  %v4142_v13 = vsub.f32 0.0, %v4030_v36  ;;  %v3633_v17 = vmul.f32 %v8264_v63, %v3625_v43  ;;  %9305 = vst [vmem:[#allocation70_spill] sm:$0xff] %v8360_v5  ;;  %v8362_v62 = vpop.eup %6601 }
0x1413   : > { %v4003_v25 = vpop.f32.mrb[46].mxu0  ;;  %v3552_v63 = vadd.f32 1.0, %v3544_v49  ;;  %v4143_v10 = vsub.f32 0.0, %v4031_v12  ;;  %v8368_v16 = vpop.eup %6603  ;;  %v3671_v49 = vmul.f32 1.442695, %v3656_v1 }
0x1414   : > { %9300 = vst [vmem:[#allocation65_spill] sm:$0xff] %v8338_v20  ;;  %v4046_v21 = vadd.f32 1.0, %v4038_v26  ;;  %v4005_v32 = vpop.f32.mrb[47].mxu0  ;;  %v8355_v26 = vmul.f32 0.70710677, %v8332_v29  ;;  %v3673_v57 = vmul.f32 %v6590_v54, %v3633_v17  ;;  %v4150_v23 = vmul.f32 %v4142_v13, %v4030_v36 }
0x1415   : > { %v4032_v43 = vand.u32 2147483647, %v8338_v20  ;;  %v4004_v39 = vadd.f32 %v4003_v25, %v8157_v8  ;;  %v8371_v17 = vmul.f32 1.0614054, %v8272_v15  ;;  %v8374_v20 = vmul.f32 0.5, %v8306_v58 }
0x1416   : > { %6611 = vrcp.f32 %v4046_v21  ;;  %9303 = vst [vmem:[#allocation68_spill] sm:$0xff] %v8355_v26  ;;  %v3095_v21 = vadd.f32 1.4214138, %v3087_v28  ;;  %v3681_v54 = vsub.f32 1.0, %v3673_v57  ;;  %v4039_v45 = vmul.f32 0.3275911, %v4031_v12  ;;  %v8381_v57 = vpop.eup %6605 }
0x1417   : > { %v4009_v37 = vpop.f32.mrb[48].mxu0  ;;  %6613 = vpow2.f32 %v3667_v30  ;;  %9306 = vst [vmem:[#allocation71_spill] sm:$0xff] %v8374_v20  ;;  %v4033_v30 = vand.u32 2147483647, %v8355_v26  ;;  %v4151_v28 = vmul.f32 %v4143_v10, %v4031_v12  ;;  %v4144_v13 = vsub.f32 0.0, %v4032_v43  ;;  %9308 = vst [vmem:[#allocation73_spill] sm:$0xff] %v8381_v57  ;;  %v8390_v26 = vpop.eup %6607 }
0x1418   : > { %v8366_v18 = vpop.f32.mrb[49].mxu0  ;;  %6615 = vpow2.f32 %v3669_v9  ;;  %v8379_v25 = vmul.f32 0.70710677, %v4004_v39  ;;  %v4158_v9 = vmul.f32 1.442695, %v4150_v23  ;;  %v8384_v1 = vadd.f32 %v4005_v32, %v8172_v47  ;;  %v8399_v34 = vpop.eup %6609 }
0x1419   : > { %6617 = vrcp.f32 %v3552_v63  ;;  %v8387_v58 = vadd.f32 %v4009_v37, %v8157_v8  ;;  %v3103_v20 = vmul.f32 %v8281_v2, %v3095_v21  ;;  %v3697_v14 = vsub.f32 0.0, %v3681_v54  ;;  %9313 = vst [vmem:[#allocation78_spill] sm:$0xff] %v8399_v34 }
0x141a   : > { %9307 = vst [vmem:[#allocation72_spill] sm:$0xff] %v8379_v25  ;;  %9309 = vst [vmem:[#allocation74_spill] sm:$0xff] %v8384_v1  ;;  %6619 = vpow2.f32 %v3671_v49  ;;  %v8393_v12 = vmul.f32 0.5, %v8313_v59  ;;  %v4034_v63 = vand.u32 2147483647, %v8379_v25  ;;  %v4047_v10 = vadd.f32 1.0, %v4039_v45 }
0x141b   : > { %9310 = vst [vmem:[#allocation75_spill] sm:$0xff] %v8387_v58  ;;  %v8397_v23 = vmul.f32 0.5, %v8326_v40  ;;  %v4040_v32 = vmul.f32 0.3275911, %v4032_v43  ;;  %v4145_v36 = vsub.f32 0.0, %v4033_v30  ;;  %v4152_v37 = vmul.f32 %v4144_v13, %v4032_v43 }
0x141c   : > { %9311 = vst [vmem:[#allocation76_spill] sm:$0xff] %v8393_v12  ;;  %v4160_v8 = vmul.f32 1.442695, %v4151_v28  ;;  %v8402_v21 = vmul.f32 0.5, %v8332_v29  ;;  %v8405_v49 = vmul.f32 0.70710677, %v8384_v1  ;;  %6621 = vpow2.f32 %v4158_v9 }
0x141d   : > { %9312 = vst [vmem:[#allocation77_spill] sm:$0xff] %v8397_v23  ;;  %v4041_v12 = vmul.f32 0.3275911, %v4033_v30  ;;  %v8410_v45 = vmul.f32 0.70710677, %v8387_v58  ;;  %v3705_v23 = vsel %vm3689_vm10, %v3697_v14, %v3681_v54  ;;  %v4146_v43 = vsub.f32 0.0, %v4034_v63 }
0x141e   : > { %9314 = vst [vmem:[#allocation79_spill] sm:$0xff] %v8402_v21  ;;  %9315 = vst [vmem:[#allocation80_spill] sm:$0xff] %v8405_v49  ;;  %v3111_v40 = vadd.f32 -0.28449672, %v3103_v20  ;;  %v4035_v29 = vand.u32 2147483647, %v8405_v49  ;;  %6623 = vrcp.f32 %v4047_v10  ;;  %v4153_v25 = vmul.f32 %v4145_v36, %v4033_v30 }
0x141f   : > { %9316 = vst [vmem:[#allocation81_spill] sm:$0xff] %v8410_v45  ;;  %v4048_v21 = vadd.f32 1.0, %v4040_v32  ;;  %6625 = vpow2.f32 %v4160_v8  ;;  %v4162_v20 = vmul.f32 1.442695, %v4152_v37  ;;  %v4036_v42 = vand.u32 2147483647, %v8410_v45 }
0x1420   : > { %v8407_v59 = vpop.eup %6611  ;;  %v3119_v9 = vmul.f32 %v8281_v2, %v3111_v40  ;;  %v3713_v14 = vadd.f32 1.0, %v3705_v23  ;;  %v4049_v54 = vadd.f32 1.0, %v4041_v12  ;;  %v4042_v57 = vmul.f32 0.3275911, %v4034_v63 }
0x1421   : > { %v4070_v28 = vmul.f32 1.0614054, %v8407_v59  ;;  %v8416_v13 = vpop.eup %6613  ;;  %v8426_v30 = vmul.f32 0.5, %v4004_v39  ;;  %v4154_v36 = vmul.f32 %v4146_v43, %v4034_v63  ;;  %v4147_v32 = vsub.f32 0.0, %v4035_v29 }
0x1422   : > { %v8419_v5 = vpop.eup %6615  ;;  %v3127_v1 = vadd.f32 0.2548296, %v3119_v9  ;;  %6627 = vrcp.f32 %v4048_v21  ;;  %v4164_v40 = vmul.f32 1.442695, %v4153_v25  ;;  %v4043_v8 = vmul.f32 0.3275911, %v4035_v29 }
0x1423   : > { %v4078_v58 = vadd.f32 -1.4531521, %v4070_v28  ;;  %v8422_v34 = vpop.eup %6617  ;;  %9317 = vst [vmem:[#allocation82_spill] sm:$0xff] %v8426_v30  ;;  %6629 = vpow2.f32 %v4162_v20  ;;  %v4044_v23 = vmul.f32 0.3275911, %v4036_v42  ;;  %v4148_v9 = vsub.f32 0.0, %v4036_v42 }
0x1424   : > { %v3135_v37 = vmul.f32 %v8281_v2, %v3127_v1  ;;  %v8429_v28 = vpop.eup %6619  ;;  %v8432_v45 = vmul.f32 %v3713_v14, %v8262_v7  ;;  %6631 = vrcp.f32 %v4049_v54  ;;  %v4166_v63 = vmul.f32 1.442695, %v4154_v36 }
0x1425   : > { %v4086_v10 = vmul.f32 %v8407_v59, %v4078_v58  ;;  %v4050_v58 = vadd.f32 1.0, %v4042_v57  ;;  %v4155_v43 = vmul.f32 %v4147_v32, %v4035_v29  ;;  %v8437_v25 = vadd.f32 %v8366_v18, %v8172_v47 }
0x1426   : > { %v3175_v39 = vmul.f32 %v8286_v55, %v3135_v37  ;;  %v3078_v2 = vadd.f32 -1.4531521, %v8371_v17  ;;  %v8440_v1 = vpop.eup %6621  ;;  %6633 = vpow2.f32 %v4164_v40  ;;  %v3073_v20 = vmul.f32 1.0614054, %v8300_v27 }
0x1427   : > { %v4094_v12 = vadd.f32 1.4214138, %v4086_v10  ;;  %v3072_v7 = vmul.f32 1.0614054, %v8298_v41  ;;  %v4051_v14 = vadd.f32 1.0, %v4043_v8  ;;  %v4052_v55 = vadd.f32 1.0, %v4044_v23 }
0x1428   : > { %v3183_v21 = vsub.f32 1.0, %v3175_v39  ;;  %v4156_v54 = vmul.f32 %v4148_v9, %v4036_v42  ;;  %v8447_v10 = vpop.eup %6623  ;;  %v3086_v18 = vmul.f32 %v8272_v15, %v3078_v2  ;;  %v3081_v17 = vadd.f32 -1.4531521, %v3073_v20 }
0x1429   : > { %v4102_v57 = vmul.f32 %v8407_v59, %v4094_v12  ;;  %v3080_v36 = vadd.f32 -1.4531521, %v3072_v7  ;;  %v8452_v40 = vpop.eup %6625  ;;  %6635 = vrcp.f32 %v4050_v58  ;;  %v4168_v37 = vmul.f32 1.442695, %v4155_v43 }
0x142a   : > { %v3199_v47 = vsub.f32 0.0, %v3183_v21  ;;  %9318 = vst [vmem:[#allocation83_spill] sm:$0xff] %v8452_v40  ;;  %v8455_v12 = vmul.f32 0.70710677, %v8437_v25  ;;  %v3570_v42 = vmul.f32 1.0614054, %v8329_v3  ;;  %v3089_v9 = vmul.f32 %v8300_v27, %v3081_v17 }
0x142b   : > { %v8445_v29 = vpop.f32.mrb[50].mxu0  ;;  %v3094_v23 = vadd.f32 1.4214138, %v3086_v18  ;;  %v3088_v39 = vmul.f32 %v8298_v41, %v3080_v36  ;;  %v4110_v2 = vadd.f32 -0.28449672, %v4102_v57  ;;  %6637 = vpow2.f32 %v4166_v63 }
0x142c   : > { %v8450_v32 = vpop.f32.mrb[51].mxu0  ;;  %9319 = vst [vmem:[#allocation84_spill] sm:$0xff] %v8455_v12  ;;  %v3207_v8 = vsel %vm3191_vm11, %v3199_v47, %v3183_v21  ;;  %v8462_v20 = vmul.f32 1.442695, %v4156_v54  ;;  %v8466_v43 = vpop.eup %6627  ;;  %v3097_v49 = vadd.f32 1.4214138, %v3089_v9  ;;  %6639 = vrcp.f32 %v4051_v14 }
0x142d   : > { %v3215_v7 = vadd.f32 1.0, %v3207_v8  ;;  %9320 = vst [vmem:[#allocation85_spill] sm:$0xff] %v8466_v43  ;;  %v3102_v30 = vmul.f32 %v8272_v15, %v3094_v23  ;;  %v3096_v40 = vadd.f32 1.4214138, %v3088_v39  ;;  %v3578_v0 = vadd.f32 -1.4531521, %v3570_v42  ;;  %v8469_v21 = vpop.eup %6629 }
0x142e   : > { %9321 = vst [vmem:[#allocation86_spill] sm:$0xff] %v8469_v21  ;;  %v8473_v57 = vand.u32 2147483647, %v8455_v12  ;;  %v3572_v63 = vmul.f32 1.0614054, %v8346_v53  ;;  %v8478_v18 = vpop.eup %6631  ;;  %v3105_v36 = vmul.f32 %v8300_v27, %v3097_v49  ;;  %v4118_v14 = vmul.f32 %v8407_v59, %v4110_v2 }
0x142f   : > { %v8464_v58 = vpop.f32.mrb[52].mxu0  ;;  %v3223_v47 = vmul.f32 %v3215_v7, %v8240_v24  ;;  %9322 = vst [vmem:[#allocation87_spill] sm:$0xff] %v8478_v18  ;;  %v3110_v17 = vadd.f32 -0.28449672, %v3102_v30  ;;  %v3104_v8 = vmul.f32 %v8298_v41, %v3096_v40  ;;  %v3586_v42 = vmul.f32 %v8329_v3, %v3578_v0 }
0x1430   : > { %v8476_v54 = vpop.f32.mrb[53].mxu0  ;;  %v3580_v24 = vadd.f32 -1.4531521, %v3572_v63  ;;  %v3571_v23 = vmul.f32 1.0614054, %v8340_v52  ;;  %v8486_v39 = vpop.eup %6633  ;;  %6641 = vrcp.f32 %v4052_v55 }
0x1431   : > { %3339 = vmatprep.mubr.f32.mxu1 %v3223_v47  ;;  %v3574_v9 = vmul.f32 1.0614054, %v8390_v26  ;;  %9323 = vst [vmem:[#allocation88_spill] sm:$0xff] %v8486_v39  ;;  %v3118_v7 = vmul.f32 %v8272_v15, %v3110_v17  ;;  %v3113_v12 = vadd.f32 -0.28449672, %v3105_v36  ;;  %6643 = vpow2.f32 %v4168_v37 }
0x1432   : > { %v3112_v30 = vadd.f32 -0.28449672, %v3104_v8  ;;  %v3594_v21 = vadd.f32 1.4214138, %v3586_v42  ;;  %v3588_v49 = vmul.f32 %v8346_v53, %v3580_v24  ;;  %v3579_v40 = vadd.f32 -1.4531521, %v3571_v23 }
0x1433   : > { %v3582_v0 = vadd.f32 -1.4531521, %v3574_v9  ;;  %v8490_v43 = vpop.f32.mrb[54].mxu0  ;;  %v3126_v2 = vadd.f32 0.2548296, %v3118_v7  ;;  %v3121_v47 = vmul.f32 %v8300_v27, %v3113_v12  ;;  %v8497_v17 = vpop.eup %6635 }
0x1434   : > { %v3120_v63 = vmul.f32 %v8298_v41, %v3112_v30  ;;  %v3602_v18 = vmul.f32 %v8329_v3, %v3594_v21  ;;  %v8495_v39 = vpop.f32.mrb[55].mxu0  ;;  %v4126_v55 = vadd.f32 0.2548296, %v4118_v14  ;;  %v3596_v36 = vadd.f32 1.4214138, %v3588_v49 }
0x1435   : > { %v3587_v8 = vmul.f32 %v8340_v52, %v3579_v40  ;;  %v3590_v42 = vmul.f32 %v8390_v26, %v3582_v0  ;;  %v3134_v12 = vmul.f32 %v8272_v15, %v3126_v2  ;;  %v3129_v23 = vadd.f32 0.2548296, %v3121_v47  ;;  %v8505_v21 = vpop.eup %6637 }
0x1436   : > { %v3128_v9 = vadd.f32 0.2548296, %v3120_v63  ;;  %v3610_v7 = vadd.f32 -0.28449672, %v3602_v18  ;;  %9324 = vst [vmem:[#allocation89_spill] sm:$0xff] %v8505_v21  ;;  %v3604_v14 = vmul.f32 %v8346_v53, %v3596_v36  ;;  %v8516_v47 = vpop.eup %6639 }
0x1437   : > { %v8502_v24 = vpop.f32.mrb[56].mxu0  ;;  %v3595_v30 = vadd.f32 1.4214138, %v3587_v8  ;;  %v3598_v49 = vadd.f32 1.4214138, %v3590_v42  ;;  %v3174_v15 = vmul.f32 %v8284_v22, %v3134_v12  ;;  %v3137_v2 = vmul.f32 %v8300_v27, %v3129_v23 }
0x1438   : > { %v8510_v40 = vpop.f32.mrb[57].mxu0  ;;  %v3136_v18 = vmul.f32 %v8298_v41, %v3128_v9  ;;  %v3618_v63 = vmul.f32 %v8329_v3, %v3610_v7  ;;  %v3612_v21 = vadd.f32 -0.28449672, %v3604_v14  ;;  %v4134_v8 = vmul.f32 %v8407_v59, %v4126_v55 }
0x1439   : > { %v3603_v37 = vmul.f32 %v8340_v52, %v3595_v30  ;;  %v3606_v36 = vmul.f32 %v8390_v26, %v3598_v49  ;;  %v3182_v42 = vsub.f32 1.0, %v3174_v15  ;;  %v3177_v0 = vmul.f32 %v8308_v46, %v3137_v2 }
0x143a   : > { %v3176_v22 = vmul.f32 %v8303_v19, %v3136_v18  ;;  %v3626_v12 = vadd.f32 0.2548296, %v3618_v63  ;;  %v3620_v27 = vmul.f32 %v8346_v53, %v3612_v21  ;;  %v3573_v30 = vmul.f32 1.0614054, %v8368_v16  ;;  %v8527_v49 = vpop.eup %6641 }
0x143b   : > { %v3611_v41 = vadd.f32 -0.28449672, %v3603_v37  ;;  %v3614_v23 = vadd.f32 -0.28449672, %v3606_v36  ;;  %v3198_v9 = vsub.f32 0.0, %v3182_v42  ;;  %v3185_v7 = vsub.f32 1.0, %v3177_v0 }
0x143c   : > { %v3184_v14 = vsub.f32 1.0, %v3176_v22  ;;  %v3634_v59 = vmul.f32 %v8329_v3, %v3626_v12  ;;  %v3628_v55 = vadd.f32 0.2548296, %v3620_v27  ;;  %v3581_v18 = vadd.f32 -1.4531521, %v3573_v30 }
0x143d   : > { %v3619_v46 = vmul.f32 %v8340_v52, %v3611_v41  ;;  %v3622_v19 = vmul.f32 %v8390_v26, %v3614_v23  ;;  %v3206_v21 = vsel %vm3190_vm12, %v3198_v9, %v3182_v42  ;;  %v3201_v15 = vsub.f32 0.0, %v3185_v7  ;;  %v8542_v42 = vpop.eup %6643 }
0x143e   : > { %v3200_v2 = vsub.f32 0.0, %v3184_v14  ;;  %v3214_v0 = vadd.f32 1.0, %v3206_v21  ;;  %v3674_v63 = vmul.f32 %v8334_v38, %v3634_v59  ;;  %v3636_v37 = vmul.f32 %v8346_v53, %v3628_v55 }
0x143f   : > { %v3627_v36 = vadd.f32 0.2548296, %v3619_v46  ;;  %v3209_v3 = vsel %vm3193_vm14, %v3201_v15, %v3185_v7  ;;  %v3630_v12 = vadd.f32 0.2548296, %v3622_v19  ;;  %v3589_v31 = vmul.f32 %v8368_v16, %v3581_v18 }
0x1440   : > { %v3208_v22 = vsel %vm3192_vm13, %v3200_v2, %v3184_v14  ;;  %v3222_v38 = vmul.f32 %v3214_v0, %v8225_v4  ;;  %v3217_v27 = vadd.f32 1.0, %v3209_v3  ;;  %v3682_v41 = vsub.f32 1.0, %v3674_v63  ;;  %v9326_v2 = vld [vmem:[#allocation57_spill] sm:$0xff] }
0x1441   : > { %v3216_v53 = vadd.f32 1.0, %v3208_v22  ;;  %v3676_v33 = vmul.f32 %v8362_v62, %v3636_v37  ;;  %v3635_v23 = vmul.f32 %v8340_v52, %v3627_v36  ;;  %v3638_v35 = vmul.f32 %v8390_v26, %v3630_v12 }
0x1442   : > { %v3597_v9 = vadd.f32 1.4214138, %v3589_v31  ;;  %v8551_v7 = vmul.f32 %v8440_v1, %v4134_v8  ;;  %3340 = vmatmul.mubr.f32.gmra.mrb[30].mxu1 %v3222_v38  ;;  %v3225_v14 = vmul.f32 %v3217_v27, %v8255_v51  ;;  %v3698_v30 = vsub.f32 0.0, %v3682_v41 }
0x1443   : > { %v8556_v4 = vadd.f32 %v8445_v29, %v8222_v11  ;;  %v3684_v59 = vsub.f32 1.0, %v3676_v33  ;;  %v3675_v55 = vmul.f32 %v8343_v60, %v3635_v23  ;;  %v3678_v62 = vmul.f32 %v8416_v13, %v3638_v35 }
0x1444   : > { %v3605_v52 = vmul.f32 %v8368_v16, %v3597_v9  ;;  %3344 = vmatprep.mubr.f32.mxu1 %v3225_v14  ;;  %v3224_v26 = vmul.f32 %v3216_v53, %v8249_v48  ;;  %v3706_v1 = vsel %vm3690_vm15, %v3698_v30, %v3682_v41  ;;  %v3576_v8 = vmul.f32 1.0614054, %v8422_v34  ;;  %v9328_v53 = vld [vmem:[#allocation60_spill] sm:$0xff] }
0x1445   : > { %v8565_v51 = vmul.f32 0.70710677, %v8556_v4  ;;  %v3714_v29 = vadd.f32 1.0, %v3706_v1  ;;  %v3700_v46 = vsub.f32 0.0, %v3684_v59  ;;  %v3683_v19 = vsub.f32 1.0, %v3675_v55  ;;  %v9329_v9 = vld [vmem:[#allocation56_spill] sm:$0xff] }
0x1446   : > { %v3686_v21 = vsub.f32 1.0, %v3678_v62  ;;  %v4182_v60 = vsub.f32 1.0, %v8551_v7  ;;  %3345 = vmatmul.mubr.f32.gmra.mrb[32].mxu1 %v3224_v26  ;;  %v3613_v13 = vadd.f32 -0.28449672, %v3605_v52  ;;  %v8575_v15 = vadd.f32 %v8450_v32, %v9325_v6  ;;  %v9330_v14 = vld [vmem:[#allocation40_spill] sm:$0xff]  ;;  %v9334_v55 = vld [vmem:[#allocation42_spill] sm:$0xff] }
0x1447   : > { %v8571_v48 = vand.u32 2147483647, %v8565_v51  ;;  %v3722_v18 = vmul.f32 %v3714_v29, %v9326_v2  ;;  %v3708_v0 = vsel %vm3692_vm0, %v3700_v46, %v3684_v59  ;;  %v3699_v63 = vsub.f32 0.0, %v3683_v19  ;;  %v9336_v52 = vld [vmem:[#allocation59_spill] sm:$0xff]  ;;  %v9338_v46 = vld [vmem:[#allocation78_spill] sm:$0xff] }
0x1448   : > { %v3702_v37 = vsub.f32 0.0, %v3686_v21  ;;  %v4045_v36 = vmul.f32 0.3275911, %v8473_v57  ;;  %v3716_v3 = vadd.f32 1.0, %v3708_v0  ;;  %v3621_v22 = vmul.f32 %v8368_v16, %v3613_v13  ;;  %v9337_v1 = vld [vmem:[#allocation63_spill] sm:$0xff]  ;;  %v9340_v0 = vld [vmem:[#allocation73_spill] sm:$0xff] }
0x1449   : > { %v4539_v12 = vmul.f32 0.3275911, %v8571_v48  ;;  %v9327_v31 = vsub.f32 0.0, %v8473_v57  ;;  %3834 = vmatprep.mubr.f32.mxu1 %v3722_v18  ;;  %v3707_v32 = vsel %vm3691_vm1, %v3699_v63, %v3683_v19  ;;  %v3584_v27 = vadd.f32 -1.4531521, %v3576_v8 }
0x144a   : > { %v3710_v44 = vsel %vm3694_vm2, %v3702_v37, %v3686_v21  ;;  %3835 = vmatmul.mubr.f32.vlgmr.msra.gmra.mrb[34].mxu1 %v8432_v45  ;;  %v3724_v41 = vmul.f32 %v3716_v3, %v9328_v53  ;;  %v3715_v33 = vadd.f32 1.0, %v3707_v32  ;;  %v3629_v35 = vadd.f32 0.2548296, %v3621_v22  ;;  %v9333_v45 = vld [vmem:[#allocation43_spill] sm:$0xff]  ;;  %v9339_v21 = vld [vmem:[#allocation74_spill] sm:$0xff] }
0x144b   : > { %v4157_v38 = vmul.f32 %v9327_v31, %v8473_v57  ;;  %v3718_v23 = vadd.f32 1.0, %v3710_v44  ;;  %vm3693_vm4 = vcmp.lt.f32.partialorder %v9329_v9, 0.0  ;;  %v4198_v7 = vsub.f32 0.0, %v4182_v60  ;;  %v9331_v57 = vld [vmem:[#allocation39_spill] sm:$0xff]  ;;  %v9342_v31 = vld [vmem:[#allocation45_spill] sm:$0xff]  ;;  %v9346_v53 = vld [vmem:[#allocation46_spill] sm:$0xff] }
0x144c   : > { %v9332_v30 = vpack.c.bf16 %v9330_v14, %v9331_v57  ;;  %v4547_v61 = vadd.f32 1.0, %v4539_v12  ;;  %v3592_v59 = vmul.f32 %v8422_v34, %v3584_v27  ;;  %v8598_v56 = vmul.f32 0.70710677, %v8575_v15  ;;  %3839 = vmatprep.mubr.f32.mxu1 %v3724_v41  ;;  %v9345_v27 = vld [vmem:[#allocation47_spill] sm:$0xff]  ;;  %v4256_v14 = vld [vmem:[#allocation20 + $0x2c8] sm:$0xff] }
0x144d   : > { %v9335_v62 = vpack.c.bf16 %v9333_v45, %v9334_v55  ;;  %v3723_v26 = vmul.f32 %v3715_v33, %v9336_v52  ;;  %v3726_v8 = vmul.f32 %v3718_v23, %v9337_v1  ;;  %v3637_v29 = vmul.f32 %v8368_v16, %v3629_v35  ;;  %v9350_v55 = vld [vmem:[#allocation50_spill] sm:$0xff] }
0x144e   : > { %6088 = vmatpush3.bf16.msra.mxu1 %v9332_v30  ;;  %v3575_v19 = vmul.f32 1.0614054, %v9338_v46  ;;  %v8608_v13 = vmul.f32 0.5, %v9339_v21  ;;  %v4053_v2 = vadd.f32 1.0, %v4045_v36  ;;  %6645 = vrcp.f32 %v4547_v61  ;;  %v9343_v36 = vld [vmem:[#allocation44_spill] sm:$0xff] }
0x144f   : > { %6090 = vmatprep.subr.bf16.mxu1 %v9335_v62  ;;  %v3600_v18 = vadd.f32 1.4214138, %v3592_v59  ;;  %3840 = vmatmul.mubr.f32.gmra.mrb[36].mxu1 %v3723_v26  ;;  %v3677_v63 = vmul.f32 %v9340_v0, %v3637_v29  ;;  %v4532_v37 = vand.u32 2147483647, %v8598_v56  ;;  %v8614_v22 = vadd.f32 %v8464_v58, %v8222_v11  ;;  %v9351_v62 = vld [vmem:[#allocation49_spill] sm:$0xff]  ;;  %v9353_v29 = vld [vmem:[#allocation54_spill] sm:$0xff] }
0x1450   : > { %v3583_v3 = vadd.f32 -1.4531521, %v3575_v19  ;;  %v4206_v16 = vsel %vm4190_vm3, %v4198_v7, %v4182_v60  ;;  %6647 = vpow2.f32 %v8462_v20  ;;  %v4172_v12 = vmul.f32 1.442695, %v4157_v38  ;;  %3844 = vmatprep.mubr.f32.mxu1 %v3726_v8  ;;  %v9349_v20 = vld [vmem:[#allocation75_spill] sm:$0xff]  ;;  %v4255_v7 = vld [vmem:[#allocation20 + $0x2c0] sm:$0xff] }
0x1451   : > { %9341 = vst [vmem:[#allocation55_spill] sm:$0xff] %v8614_v22  ;;  %v9344_v32 = vpack.c.bf16 %v9342_v31, %v9343_v36  ;;  %v3608_v44 = vmul.f32 %v8422_v34, %v3600_v18  ;;  %v9347_v41 = vpack.c.bf16 %v9345_v27, %v9346_v53  ;;  %v3685_v33 = vsub.f32 1.0, %v3677_v63  ;;  %v9354_v19 = vld [vmem:[#allocation53_spill] sm:$0xff] }
0x1452   : > { %v4643_v58 = vsub.f32 0.0, %v8571_v48  ;;  %v3591_v50 = vmul.f32 %v9338_v46, %v3583_v3  ;;  %v8629_v60 = vmul.f32 0.70710677, %v8614_v22  ;;  %v8632_v38 = vmul.f32 0.5, %v9349_v20  ;;  %v4239_v0 = vld [vmem:[#allocation20 + $0x240] sm:$0xff]  ;;  %v4240_v63 = vld [vmem:[#allocation20 + $0x248] sm:$0xff] }
0x1453   : > { %6092 = vmatpush3.bf16.msra.mxu1 %v9344_v32  ;;  %v8635_v23 = vmul.f32 0.5, %v8437_v25  ;;  %6649 = vrcp.f32 %v4053_v2  ;;  %v3616_v35 = vadd.f32 -0.28449672, %v3608_v44  ;;  %v3701_v57 = vsub.f32 0.0, %v3685_v33  ;;  %v9359_v27 = vld [vmem:[#allocation61_spill] sm:$0xff] }
0x1454   : > { %6094 = vmatprep.subr.bf16.mxu1 %v9347_v41  ;;  %9348 = vst [vmem:[#allocation57_spill] sm:$0xff] %v8629_v60  ;;  %v4644_v30 = vsub.f32 0.0, %v4532_v37  ;;  %v3599_v61 = vadd.f32 1.4214138, %v3591_v50  ;;  %v4533_v59 = vand.u32 2147483647, %v8629_v60  ;;  %6651 = vpow2.f32 %v4172_v12 }
0x1455   : > { %v4214_v45 = vadd.f32 1.0, %v4206_v16  ;;  %v9352_v52 = vpack.c.bf16 %v9350_v55, %v9351_v62  ;;  %v3624_v26 = vmul.f32 %v8422_v34, %v3616_v35  ;;  %v8644_v25 = vadd.f32 %v8476_v54, %v9325_v6  ;;  %v9356_v54 = vld [vmem:[#allocation62_spill] sm:$0xff]  ;;  %v4258_v35 = vld [vmem:[#allocation20 + $0x2d8] sm:$0xff] }
0x1456   : > { %v3709_v1 = vsel %vm3693_vm4, %v3701_v57, %v3685_v33  ;;  %v4651_v8 = vmul.f32 %v4643_v58, %v8571_v48  ;;  %v9355_v21 = vpack.c.bf16 %v9353_v29, %v9354_v19  ;;  %v3607_v2 = vmul.f32 %v9338_v46, %v3599_v61  ;;  %v9360_v33 = vld [vmem:[#allocation70_spill] sm:$0xff]  ;;  %v9361_v58 = vld [vmem:[#allocation69_spill] sm:$0xff] }
0x1457   : > { %6096 = vmatpush3.bf16.msra.mxu1 %v9352_v52  ;;  %v6101_v18 = vpack.c.bf16 %v4256_v14, %v4255_v7  ;;  %v3717_v3 = vadd.f32 1.0, %v3709_v1  ;;  %v3632_v16 = vadd.f32 0.2548296, %v3624_v26  ;;  %v4540_v12 = vmul.f32 0.3275911, %v4532_v37 }
0x1458   : > { %6098 = vmatprep.subr.bf16.mxu1 %v9355_v21  ;;  %v4645_v31 = vsub.f32 0.0, %v4533_v59  ;;  %vm3696_vm6 = vcmp.lt.f32.partialorder %v9356_v54, 0.0  ;;  %v8655_v9 = vmul.f32 0.5, %v8556_v4  ;;  %v4652_v36 = vmul.f32 %v4644_v30, %v4532_v37  ;;  %v8660_v44 = vpop.eup %6645  ;;  %v4257_v37 = vld [vmem:[#allocation20 + $0x2d0] sm:$0xff] }
0x1459   : > { %v3615_v48 = vadd.f32 -0.28449672, %v3607_v2  ;;  %v8658_v32 = vmul.f32 0.70710677, %v8644_v25  ;;  %v3725_v53 = vmul.f32 %v3717_v3, %v9359_v27  ;;  %v3640_v41 = vmul.f32 %v8422_v34, %v3632_v16  ;;  %v9366_v21 = vld [vmem:[#allocation58_spill] sm:$0xff] }
0x145a   : > { %9357 = vst [vmem:[#allocation60_spill] sm:$0xff] %v8655_v9  ;;  %v9362_v50 = vpack.c.bf16 %v9360_v33, %v9361_v58  ;;  %v6103_v20 = vpack.c.bf16 %v4240_v63, %v4239_v0  ;;  %v8669_v4 = vadd.f32 %v8490_v43, %v8222_v11  ;;  %v4571_v7 = vmul.f32 1.0614054, %v8660_v44  ;;  %v8673_v61 = vpop.eup %6647  ;;  %v9364_v43 = vld [vmem:[#allocation71_spill] sm:$0xff] }
0x145b   : > { %9358 = vst [vmem:[#allocation56_spill] sm:$0xff] %v8658_v32  ;;  %v4659_v14 = vmul.f32 1.442695, %v4651_v8  ;;  %v3623_v57 = vmul.f32 %v9338_v46, %v3615_v48  ;;  %v4541_v30 = vmul.f32 0.3275911, %v4533_v59  ;;  %3845 = vmatmul.mubr.f32.gmra.mrb[38].mxu1 %v3725_v53  ;;  %v3680_v34 = vmul.f32 %v8429_v28, %v3640_v41  ;;  %v4241_v41 = vld [vmem:[#allocation20 + $0x250] sm:$0xff] }
0x145c   : > { %6100 = vmatpush3.bf16.msra.mxu1 %v9362_v50  ;;  %9363 = vst [vmem:[#allocation40_spill] sm:$0xff] %v8669_v4  ;;  %v4548_v55 = vadd.f32 1.0, %v4540_v12  ;;  %v4653_v62 = vmul.f32 %v4645_v31, %v4533_v59  ;;  %v4534_v52 = vand.u32 2147483647, %v8658_v32  ;;  %v8678_v26 = vmul.f32 %v4214_v45, %v9364_v43 }
0x145d   : > { %6102 = vmatprep.subr.bf16.mxu1 %v6101_v18  ;;  %v4579_v1 = vadd.f32 -1.4531521, %v4571_v7  ;;  %v3631_v29 = vadd.f32 0.2548296, %v3623_v57  ;;  %v8681_v8 = vmul.f32 0.70710677, %v8669_v4  ;;  %v8683_v19 = vpop.eup %6649  ;;  %v6105_v28 = vpack.c.bf16 %v4258_v35, %v4257_v37 }
0x145e   : > { %vm3695_vm7 = vcmp.lt.f32.partialorder %v9366_v21, 0.0  ;;  %v3688_v2 = vsub.f32 1.0, %v3680_v34  ;;  %v4661_v18 = vmul.f32 1.442695, %v4652_v36  ;;  %v4646_v0 = vsub.f32 0.0, %v4534_v52  ;;  %v8689_v16 = vpop.eup %6651  ;;  %v4260_v57 = vld [vmem:[#allocation20 + $0x2e8] sm:$0xff] }
0x145f   : > { %9365 = vst [vmem:[#allocation39_spill] sm:$0xff] %v8681_v8  ;;  %v4587_v59 = vmul.f32 %v8660_v44, %v4579_v1  ;;  %v3639_v63 = vmul.f32 %v9338_v46, %v3631_v29  ;;  %v4549_v45 = vadd.f32 1.0, %v4541_v30  ;;  %v4535_v3 = vand.u32 2147483647, %v8681_v8  ;;  %v4242_v46 = vld [vmem:[#allocation20 + $0x258] sm:$0xff] }
0x1460   : > { %6104 = vmatpush3.bf16.msra.mxu1 %v6103_v20  ;;  %6653 = vpow2.f32 %v4659_v14  ;;  %v3704_v12 = vsub.f32 0.0, %v3688_v2  ;;  %v4663_v31 = vmul.f32 1.442695, %v4653_v62  ;;  %v8693_v48 = vadd.f32 %v8495_v39, %v9325_v6  ;;  %v4259_v14 = vld [vmem:[#allocation20 + $0x2e0] sm:$0xff]  ;;  %v9369_v34 = vld [vmem:[#allocation67_spill] sm:$0xff] }
0x1461   : > { %6106 = vmatprep.subr.bf16.mxu1 %v6105_v28  ;;  %v4595_v36 = vadd.f32 1.4214138, %v4587_v59  ;;  %6655 = vrcp.f32 %v4548_v55  ;;  %v3679_v27 = vmul.f32 %v8419_v5, %v3639_v63  ;;  %v4542_v53 = vmul.f32 0.3275911, %v4534_v52  ;;  %v4243_v59 = vld [vmem:[#allocation20 + $0x260] sm:$0xff] }
0x1462   : > { %9367 = vst [vmem:[#allocation43_spill] sm:$0xff] %v8693_v48  ;;  %v3712_v33 = vsel %vm3696_vm6, %v3704_v12, %v3688_v2  ;;  %6657 = vpow2.f32 %v4661_v18  ;;  %v4654_v58 = vmul.f32 %v4646_v0, %v4534_v52  ;;  %v4647_v50 = vsub.f32 0.0, %v4535_v3 }
0x1463   : > { %v4603_v20 = vmul.f32 %v8660_v44, %v4595_v36  ;;  %v3720_v37 = vadd.f32 1.0, %v3712_v33  ;;  %v3687_v35 = vsub.f32 1.0, %v3679_v27  ;;  %6659 = vrcp.f32 %v4549_v45  ;;  %v4262_v33 = vld [vmem:[#allocation20 + $0x2f8] sm:$0xff] }
0x1464   : > { %6661 = vpow2.f32 %v4663_v31  ;;  %v4543_v39 = vmul.f32 0.3275911, %v4535_v3  ;;  %v8700_v7 = vmul.f32 0.70710677, %v8693_v48  ;;  %v6107_v5 = vpack.c.bf16 %v4242_v46, %v4241_v41  ;;  %v4244_v31 = vld [vmem:[#allocation20 + $0x268] sm:$0xff]  ;;  %v4261_v46 = vld [vmem:[#allocation20 + $0x2f0] sm:$0xff] }
0x1465   : > { %v4611_v30 = vadd.f32 -0.28449672, %v4603_v20  ;;  %v3728_v54 = vmul.f32 %v3720_v37, %v9369_v34  ;;  %v3703_v55 = vsub.f32 0.0, %v3687_v35  ;;  %v4550_v62 = vadd.f32 1.0, %v4542_v53  ;;  %v4245_v37 = vld [vmem:[#allocation20 + $0x270] sm:$0xff] }
0x1466   : > { %9368 = vst [vmem:[#allocation42_spill] sm:$0xff] %v8700_v7  ;;  %v4665_v52 = vmul.f32 1.442695, %v4654_v58  ;;  %v4655_v43 = vmul.f32 %v4647_v50, %v4535_v3  ;;  %v4536_v1 = vand.u32 2147483647, %v8700_v7  ;;  %6108 = vmatpush3.bf16.msra.mxu1 %v6107_v5  ;;  %v8706_v29 = vadd.f32 %v8502_v24, %v8222_v11 }
0x1467   : > { %v4619_v2 = vmul.f32 %v8660_v44, %v4611_v30  ;;  %3849 = vmatprep.mubr.f32.mxu1 %v3728_v54  ;;  %v3711_v18 = vsel %vm3695_vm7, %v3703_v55, %v3687_v35  ;;  %v6109_v0 = vpack.c.bf16 %v4260_v57, %v4259_v14  ;;  %v8713_v28 = vadd.f32 %v8510_v40, %v9325_v6  ;;  %v9374_v40 = vld [vmem:[#allocation66_spill] sm:$0xff]  ;;  %v4246_v35 = vld [vmem:[#allocation20 + $0x278] sm:$0xff] }
0x1468   : > { %9370 = vst [vmem:[#allocation59_spill] sm:$0xff] %v8706_v29  ;;  %v3719_v63 = vadd.f32 1.0, %v3711_v18  ;;  %v4551_v45 = vadd.f32 1.0, %v4543_v39  ;;  %v4544_v3 = vmul.f32 0.3275911, %v4536_v1  ;;  %v4648_v12 = vsub.f32 0.0, %v4536_v1 }
0x1469   : > { %9371 = vst [vmem:[#allocation63_spill] sm:$0xff] %v8713_v28  ;;  %v4627_v36 = vadd.f32 0.2548296, %v4619_v2  ;;  %v8716_v11 = vmul.f32 0.5, %v8575_v15  ;;  %6663 = vrcp.f32 %v4550_v62  ;;  %v8719_v24 = vmul.f32 0.70710677, %v8706_v29  ;;  %6110 = vmatprep.subr.bf16.mxu1 %v6109_v0 }
0x146a   : > { %v6654_v21 = vpop.eup %6653  ;;  %vm4691_vm8 = vcmp.lt.f32.partialorder %v8565_v51, 0.0  ;;  %v3727_v6 = vmul.f32 %v3719_v63, %v9374_v40  ;;  %v4667_v27 = vmul.f32 1.442695, %v4655_v43  ;;  %v4656_v53 = vmul.f32 %v4648_v12, %v4536_v1  ;;  %v4748_v62 = vld [vmem:[#allocation20 + $0x380] sm:$0xff]  ;;  %v8742_v40 = vld [vmem:[#allocation20 + $0x390] sm:$0xff]  ;;  %v8764_v51 = vld [vmem:[#allocation20 + $0x3a8] sm:$0xff] }
0x146b   : > { %9372 = vst [vmem:[#allocation78_spill] sm:$0xff] %v8716_v11  ;;  %9373 = vst [vmem:[#allocation74_spill] sm:$0xff] %v8719_v24  ;;  %v8724_v41 = vmul.f32 0.70710677, %v8713_v28  ;;  %v8726_v58 = vpop.eup %6655  ;;  %v4635_v15 = vmul.f32 %v8660_v44, %v4627_v36  ;;  %6665 = vpow2.f32 %v4665_v52  ;;  %v4537_v50 = vand.u32 2147483647, %v8719_v24 }
0x146c   : > { %v6111_v20 = vpack.c.bf16 %v4244_v31, %v4243_v59  ;;  %v8730_v39 = vpop.eup %6657  ;;  %3850 = vmatmul.mubr.f32.gmra.mrb[40].mxu1 %v3727_v6  ;;  %6667 = vrcp.f32 %v4551_v45  ;;  %v4552_v5 = vadd.f32 1.0, %v4544_v3  ;;  %v4669_v14 = vmul.f32 1.442695, %v4656_v53  ;;  %v4749_v52 = vld [vmem:[#allocation20 + $0x388] sm:$0xff]  ;;  %v8738_v36 = vld [vmem:[#allocation20 + $0x300] sm:$0xff]  ;;  %v8803_v29 = vld [vmem:[#allocation20 + $0x330] sm:$0xff] }
0x146d   : > { %9375 = vst [vmem:[#allocation73_spill] sm:$0xff] %v8724_v41  ;;  %9376 = vst [vmem:[#allocation45_spill] sm:$0xff] %v8730_v39  ;;  %v4538_v57 = vand.u32 2147483647, %v8724_v41  ;;  %v8733_v30 = vpop.eup %6659  ;;  %v4675_v34 = vmul.f32 %v6654_v21, %v4635_v15  ;;  %v4545_v54 = vmul.f32 0.3275911, %v4537_v50  ;;  %v6113_v44 = vpack.c.bf16 %v4262_v33, %v4261_v46 }
0x146e   : > { %v4649_v55 = vsub.f32 0.0, %v4537_v50  ;;  %6112 = vmatpush3.bf16.msra.mxu1 %v6111_v20  ;;  %v8735_v43 = vpop.eup %6661  ;;  %6669 = vpow2.f32 %v4667_v27  ;;  %v6115_v18 = vpack.c.bf16 %v4246_v35, %v4245_v37  ;;  %v4071_v45 = vmul.f32 1.0614054, %v8447_v10  ;;  %v8740_v21 = vld [vmem:[#allocation20 + $0x308] sm:$0xff]  ;;  %v8744_v46 = vld [vmem:[#allocation20 + $0x398] sm:$0xff] }
0x146f   : > { %9377 = vst [vmem:[#allocation44_spill] sm:$0xff] %v8735_v43  ;;  %v4546_v1 = vmul.f32 0.3275911, %v4538_v57  ;;  %v4650_v2 = vsub.f32 0.0, %v4538_v57  ;;  %v4683_v0 = vsub.f32 1.0, %v4675_v34  ;;  %v4553_v59 = vadd.f32 1.0, %v4545_v54  ;;  %6114 = vmatprep.subr.bf16.mxu1 %v6113_v44 }
0x1470   : > { %v4657_v63 = vmul.f32 %v4649_v55, %v4537_v50  ;;  %6671 = vrcp.f32 %v4552_v5  ;;  %v6149_v31 = vpack.c.bf16 %v4749_v52, %v4748_v62  ;;  %v4079_v53 = vadd.f32 -1.4531521, %v4071_v45  ;;  %v9378_v15 = vld [vmem:[#allocation87_spill] sm:$0xff]  ;;  %v9379_v20 = vld [vmem:[#allocation85_spill] sm:$0xff] }
0x1471   : > { %v4554_v3 = vadd.f32 1.0, %v4546_v1  ;;  %v4658_v12 = vmul.f32 %v4650_v2, %v4538_v57  ;;  %v4699_v6 = vsub.f32 0.0, %v4683_v0  ;;  %6673 = vpow2.f32 %v4669_v14  ;;  %v8756_v34 = vld [vmem:[#allocation20 + $0x310] sm:$0xff]  ;;  %v8758_v54 = vld [vmem:[#allocation20 + $0x318] sm:$0xff]  ;;  %v8762_v52 = vld [vmem:[#allocation20 + $0x3a0] sm:$0xff] }
0x1472   : > { %v4671_v27 = vmul.f32 1.442695, %v4657_v63  ;;  %6116 = vmatpush3.bf16.msra.mxu1 %v6115_v18  ;;  %6675 = vrcp.f32 %v4553_v59  ;;  %v4073_v50 = vmul.f32 1.0614054, %v9378_v15  ;;  %v4072_v37 = vmul.f32 1.0614054, %v9379_v20 }
0x1473   : > { %v4673_v33 = vmul.f32 1.442695, %v4658_v12  ;;  %6150 = vmatprep.subr.bf16.mxu1 %v6149_v31  ;;  %v8748_v35 = vpop.eup %6663  ;;  %v4707_v5 = vsel %vm4691_vm8, %v4699_v6, %v4683_v0  ;;  %v8753_v57 = vmul.f32 0.5, %v8644_v25  ;;  %6677 = vrcp.f32 %v4554_v3  ;;  %v8795_v2 = vld [vmem:[#allocation20 + $0x3b8] sm:$0xff]  ;;  %v9392_v43 = vld [vmem:[#allocation65_spill] sm:$0xff] }
0x1474   : > { %v4087_v14 = vmul.f32 %v8447_v10, %v4079_v53  ;;  %6679 = vpow2.f32 %v4671_v27  ;;  %v4081_v44 = vadd.f32 -1.4531521, %v4073_v50  ;;  %v4080_v62 = vadd.f32 -1.4531521, %v4072_v37  ;;  %v8781_v53 = vld [vmem:[#allocation20 + $0x320] sm:$0xff]  ;;  %v8783_v50 = vld [vmem:[#allocation20 + $0x328] sm:$0xff] }
0x1475   : > { %9380 = vst [vmem:[#allocation47_spill] sm:$0xff] %v8753_v57  ;;  %v8766_v1 = vpop.eup %6665  ;;  %v4075_v18 = vmul.f32 1.0614054, %v8516_v47  ;;  %v4074_v0 = vmul.f32 1.0614054, %v8497_v17  ;;  %v8774_v63 = vadd.f32 1.0, %v4707_v5  ;;  %6681 = vpow2.f32 %v4673_v33 }
0x1476   : > { %9381 = vst [vmem:[#allocation46_spill] sm:$0xff] %v8766_v1  ;;  %v4095_v25 = vadd.f32 1.4214138, %v4087_v14  ;;  %v8772_v59 = vpop.eup %6667  ;;  %v4089_v45 = vmul.f32 %v9378_v15, %v4081_v44  ;;  %v4088_v3 = vmul.f32 %v9379_v20, %v4080_v62  ;;  %v4077_v44 = vmul.f32 1.0614054, %v8683_v19  ;;  %v9393_v1 = vld [vmem:[#allocation68_spill] sm:$0xff] }
0x1477   : > { %9382 = vst [vmem:[#allocation75_spill] sm:$0xff] %v8774_v63  ;;  %v4083_v6 = vadd.f32 -1.4531521, %v4075_v18  ;;  %v4082_v27 = vadd.f32 -1.4531521, %v4074_v0  ;;  %v8793_v0 = vld [vmem:[#allocation20 + $0x3b0] sm:$0xff] }
0x1478   : > { %v4103_v12 = vmul.f32 %v8447_v10, %v4095_v25  ;;  %v8785_v37 = vpop.eup %6669  ;;  %v4097_v5 = vadd.f32 1.4214138, %v4089_v45  ;;  %v4096_v14 = vadd.f32 1.4214138, %v4088_v3  ;;  %v4076_v18 = vmul.f32 1.0614054, %v8527_v49 }
0x1479   : > { %9383 = vst [vmem:[#allocation50_spill] sm:$0xff] %v8785_v37  ;;  %v4091_v25 = vmul.f32 %v8516_v47, %v4083_v6  ;;  %v4090_v31 = vmul.f32 %v8497_v17, %v4082_v27  ;;  %v8805_v6 = vld [vmem:[#allocation20 + $0x338] sm:$0xff]  ;;  %vm4192_vm10 = vcmp.lt.f32.partialorder %v9392_v43, 0.0  ;;  %vm4193_vm11 = vcmp.lt.f32.partialorder %v9393_v1, 0.0 }
0x147a   : > { %v4111_v62 = vadd.f32 -0.28449672, %v4103_v12  ;;  %v8797_v55 = vpop.eup %6671  ;;  %v4105_v45 = vmul.f32 %v9378_v15, %v4097_v5  ;;  %v4104_v3 = vmul.f32 %v9379_v20, %v4096_v14  ;;  %v4085_v12 = vadd.f32 -1.4531521, %v4077_v44  ;;  %v8857_v39 = vld [vmem:[#allocation20 + $0x358] sm:$0xff] }
0x147b   : > { %v8807_v27 = vpop.eup %6673  ;;  %v4099_v28 = vadd.f32 1.4214138, %v4091_v25  ;;  %v4098_v24 = vadd.f32 1.4214138, %v4090_v31  ;;  %v4084_v22 = vadd.f32 -1.4531521, %v4076_v18 }
0x147c   : > { %9384 = vst [vmem:[#allocation49_spill] sm:$0xff] %v8807_v27  ;;  %v4119_v4 = vmul.f32 %v8447_v10, %v4111_v62  ;;  %v8810_v41 = vpop.eup %6675  ;;  %v4113_v5 = vadd.f32 -0.28449672, %v4105_v45  ;;  %v4112_v48 = vadd.f32 -0.28449672, %v4104_v3  ;;  %v4093_v14 = vmul.f32 %v8683_v19, %v4085_v12  ;;  %v8820_v31 = vld [vmem:[#allocation20 + $0x3c0] sm:$0xff] }
0x147d   : > { %v8815_v33 = vpop.eup %6677  ;;  %v4107_v63 = vmul.f32 %v8516_v47, %v4099_v28  ;;  %v4106_v9 = vmul.f32 %v8497_v17, %v4098_v24  ;;  %v4092_v62 = vmul.f32 %v8527_v49, %v4084_v22  ;;  %v8822_v25 = vld [vmem:[#allocation20 + $0x3c8] sm:$0xff]  ;;  %v9386_v45 = vld [vmem:[#allocation64_spill] sm:$0xff]  ;;  %9396 = vst [vmem:[#allocation58_spill] sm:$0xff] %v8857_v39  ;;  %v4574_v1 = vmul.f32 1.0614054, %v8748_v35  ;;  %v9405_v43 = vld [vmem:[#allocation79_spill] sm:$0xff] }
0x147e   : > { %v4127_v57 = vadd.f32 0.2548296, %v4119_v4  ;;  %v8824_v18 = vpop.eup %6679  ;;  %vm4191_vm9 = vcmp.lt.f32.partialorder %v9386_v45, 0.0  ;;  %v4121_v3 = vmul.f32 %v9378_v15, %v4113_v5  ;;  %v4120_v12 = vmul.f32 %v9379_v20, %v4112_v48  ;;  %v8831_v28 = vld [vmem:[#allocation20 + $0x340] sm:$0xff]  ;;  %v8833_v24 = vld [vmem:[#allocation20 + $0x348] sm:$0xff]  ;;  %v8843_v4 = vld [vmem:[#allocation20 + $0x3d8] sm:$0xff] }
0x147f   : > { %9385 = vst [vmem:[#allocation54_spill] sm:$0xff] %v8824_v18  ;;  %v4101_v44 = vadd.f32 1.4214138, %v4093_v14  ;;  %9387 = vst [vmem:[#allocation53_spill] sm:$0xff] %v8831_v28  ;;  %v4115_v11 = vadd.f32 -0.28449672, %v4107_v63  ;;  %v8836_v18 = vpop.eup %6681 }
0x1480   : > { %9388 = vst [vmem:[#allocation62_spill] sm:$0xff] %v8833_v24  ;;  %v4135_v22 = vmul.f32 %v8447_v10, %v4127_v57  ;;  %v4114_v7 = vadd.f32 -0.28449672, %v4106_v9  ;;  %v4100_v8 = vadd.f32 1.4214138, %v4092_v62  ;;  %9389 = vst [vmem:[#allocation61_spill] sm:$0xff] %v8836_v18 }
0x1481   : > { %v4129_v37 = vadd.f32 0.2548296, %v4121_v3  ;;  %v4128_v27 = vadd.f32 0.2548296, %v4120_v12  ;;  %v4109_v5 = vmul.f32 %v8683_v19, %v4101_v44  ;;  %v8841_v14 = vld [vmem:[#allocation20 + $0x3d0] sm:$0xff]  ;;  %9391 = vst [vmem:[#allocation69_spill] sm:$0xff] %v8843_v4  ;;  %v4123_v57 = vmul.f32 %v8516_v47, %v4115_v11 }
0x1482   : > { %9390 = vst [vmem:[#allocation70_spill] sm:$0xff] %v8841_v14  ;;  %v9394_v10 = vld [vmem:[#allocation83_spill] sm:$0xff]  ;;  %v4122_v63 = vmul.f32 %v8497_v17, %v4114_v7  ;;  %v4108_v62 = vmul.f32 %v8527_v49, %v4100_v8  ;;  %v9397_v11 = vld [vmem:[#allocation72_spill] sm:$0xff]  ;;  %v8868_v24 = vld [vmem:[#allocation20 + $0x3e8] sm:$0xff]  ;;  %vm4692_vm0 = vcmp.lt.f32.partialorder %v8598_v56, 0.0 }
0x1483   : > { %v4175_v9 = vmul.f32 %v9394_v10, %v4135_v22  ;;  %v4137_v44 = vmul.f32 %v9378_v15, %v4129_v37  ;;  %v4136_v3 = vmul.f32 %v9379_v20, %v4128_v27  ;;  %v4117_v12 = vadd.f32 -0.28449672, %v4109_v5  ;;  %v8855_v18 = vld [vmem:[#allocation20 + $0x350] sm:$0xff]  ;;  %v9398_v8 = vld [vmem:[#allocation80_spill] sm:$0xff] }
0x1484   : > { %9395 = vst [vmem:[#allocation71_spill] sm:$0xff] %v8855_v18  ;;  %v4131_v22 = vadd.f32 0.2548296, %v4123_v57  ;;  %v4130_v10 = vadd.f32 0.2548296, %v4122_v63  ;;  %vm4194_vm12 = vcmp.lt.f32.partialorder %v9397_v11, 0.0 }
0x1485   : > { %v4183_v60 = vsub.f32 1.0, %v4175_v9  ;;  %vm4195_vm13 = vcmp.lt.f32.partialorder %v9398_v8, 0.0  ;;  %v9399_v15 = vld [vmem:[#allocation88_spill] sm:$0xff]  ;;  %v9400_v37 = vld [vmem:[#allocation86_spill] sm:$0xff]  ;;  %v4125_v5 = vmul.f32 %v8683_v19, %v4117_v12  ;;  %v4116_v48 = vadd.f32 -0.28449672, %v4108_v62 }
0x1486   : > { %v4177_v20 = vmul.f32 %v9399_v15, %v4137_v44  ;;  %v4176_v27 = vmul.f32 %v9400_v37, %v4136_v3  ;;  %v8866_v28 = vld [vmem:[#allocation20 + $0x3e0] sm:$0xff]  ;;  %v4139_v57 = vmul.f32 %v8516_v47, %v4131_v22  ;;  %v4138_v63 = vmul.f32 %v8497_v17, %v4130_v10  ;;  %v8877_v62 = vld [vmem:[#allocation20 + $0x368] sm:$0xff] }
0x1487   : > { %v4199_v9 = vsub.f32 0.0, %v4183_v60  ;;  %v4133_v44 = vadd.f32 0.2548296, %v4125_v5  ;;  %v4124_v3 = vmul.f32 %v8527_v49, %v4116_v48  ;;  %v8875_v15 = vld [vmem:[#allocation20 + $0x360] sm:$0xff]  ;;  %v6173_v10 = vpack.c.bf16 %v8868_v24, %v8866_v28 }
0x1488   : > { %v4185_v14 = vsub.f32 1.0, %v4177_v20  ;;  %v4184_v4 = vsub.f32 1.0, %v4176_v27  ;;  %v9401_v12 = vld [vmem:[#allocation84_spill] sm:$0xff]  ;;  %v4179_v47 = vmul.f32 %v8542_v42, %v4139_v57  ;;  %v9402_v17 = vld [vmem:[#allocation89_spill] sm:$0xff]  ;;  %v6175_v32 = vpack.c.bf16 %v8877_v62, %v8875_v15  ;;  %v9437_v15 = vld [vmem:[#allocation78_spill] sm:$0xff] }
0x1489   : > { %vm4197_vm14 = vcmp.lt.f32.partialorder %v9401_v12, 0.0  ;;  %v4207_v37 = vsel %vm4191_vm9, %v4199_v9, %v4183_v60  ;;  %v4178_v22 = vmul.f32 %v9402_v17, %v4138_v63  ;;  %v4141_v48 = vmul.f32 %v8683_v19, %v4133_v44  ;;  %v9403_v45 = vld [vmem:[#allocation76_spill] sm:$0xff]  ;;  %v9404_v63 = vld [vmem:[#allocation81_spill] sm:$0xff] }
0x148a   : > { %v4215_v20 = vadd.f32 1.0, %v4207_v37  ;;  %v4201_v27 = vsub.f32 0.0, %v4185_v14  ;;  %v4200_v5 = vsub.f32 0.0, %v4184_v4  ;;  %v4187_v7 = vsub.f32 1.0, %v4179_v47  ;;  %v9412_v12 = vld [vmem:[#allocation48_spill] sm:$0xff]  ;;  %v9435_v56 = vld [vmem:[#allocation61_spill] sm:$0xff] }
0x148b   : > { %v4186_v18 = vsub.f32 1.0, %v4178_v22  ;;  %v4132_v39 = vadd.f32 0.2548296, %v4124_v3  ;;  %v4181_v57 = vmul.f32 %v8689_v16, %v4141_v48  ;;  %vm4196_vm15 = vcmp.lt.f32.partialorder %v9404_v63, 0.0 }
0x148c   : > { %v4223_v60 = vmul.f32 %v4215_v20, %v9403_v45  ;;  %v4209_v42 = vsel %vm4193_vm11, %v4201_v27, %v4185_v14  ;;  %v4208_v9 = vsel %vm4192_vm10, %v4200_v5, %v4184_v4  ;;  %v4203_v44 = vsub.f32 0.0, %v4187_v7  ;;  %v8899_v14 = vpop.xlane.xlu1 %2843  ;;  %v9406_v4 = vld [vmem:[#allocation77_spill] sm:$0xff] }
0x148d   : > { %v4217_v37 = vadd.f32 1.0, %v4209_v42  ;;  %v4216_v19 = vadd.f32 1.0, %v4208_v9  ;;  %v4202_v47 = vsub.f32 0.0, %v4186_v18  ;;  %v4189_v3 = vsub.f32 1.0, %v4181_v57  ;;  %v8918_v9 = vpop.xlane.xlu0 %2840 }
0x148e   : > { %4335 = vmatprep.mubr.f32.mxu1 %v4223_v60  ;;  %v4140_v17 = vmul.f32 %v8527_v49, %v4132_v39  ;;  %v4572_v22 = vmul.f32 1.0614054, %v8726_v58  ;;  %v4211_v27 = vsel %vm4195_vm13, %v4203_v44, %v4187_v7  ;;  %v9407_v49 = vpack.c.bf16 %v8740_v21, %v8738_v36  ;;  %v9410_v21 = vld [vmem:[#allocation82_spill] sm:$0xff] }
0x148f   : > { %4336 = vmatmul.mubr.f32.vlgmr.msra.gmra.mrb[42].mxu1 %v8678_v26  ;;  %v4225_v16 = vmul.f32 %v4217_v37, %v9405_v43  ;;  %v4224_v20 = vmul.f32 %v4216_v19, %v9406_v4  ;;  %v4210_v5 = vsel %vm4194_vm12, %v4202_v47, %v4186_v18  ;;  %v4219_v39 = vadd.f32 1.0, %v4211_v27  ;;  %v9409_v18 = vld [vmem:[#allocation41_spill] sm:$0xff] }
0x1490   : > { %6152 = vmatpush3.bf16.msra.mxu1 %v9407_v49  ;;  %v4218_v48 = vadd.f32 1.0, %v4210_v5  ;;  %v4205_v45 = vsub.f32 0.0, %v4189_v3  ;;  %v4180_v60 = vmul.f32 %v8673_v61, %v4140_v17  ;;  %v9408_v26 = vpack.c.bf16 %v8744_v46, %v8742_v40 }
0x1491   : > { %4340 = vmatprep.mubr.f32.mxu1 %v4225_v16  ;;  %v4580_v42 = vadd.f32 -1.4531521, %v4572_v22  ;;  %v4582_v8 = vadd.f32 -1.4531521, %v4574_v1  ;;  %v4573_v7 = vmul.f32 1.0614054, %v8733_v30  ;;  %v2848_v11 = vsub.f32 %v9409_v18, %v8899_v14 }
0x1492   : > { %6154 = vmatprep.subr.bf16.mxu1 %v9408_v26  ;;  %v4227_v36 = vmul.f32 %v4219_v39, %v8608_v13  ;;  %v4226_v57 = vmul.f32 %v4218_v48, %v9410_v21  ;;  %v4213_v61 = vsel %vm4197_vm14, %v4205_v45, %v4189_v3  ;;  %v4188_v37 = vsub.f32 1.0, %v4180_v60 }
0x1493   : > { %4341 = vmatmul.mubr.f32.gmra.mrb[44].mxu1 %v4224_v20  ;;  %v4221_v40 = vadd.f32 1.0, %v4213_v61  ;;  %v4588_v46 = vmul.f32 %v8726_v58, %v4580_v42  ;;  %v4590_v19 = vmul.f32 %v8748_v35, %v4582_v8  ;;  %v4581_v44 = vadd.f32 -1.4531521, %v4573_v7 }
0x1494   : > { %v9411_v47 = vpack.c.bf16 %v8758_v54, %v8756_v34  ;;  %4345 = vmatprep.mubr.f32.mxu1 %v4227_v36  ;;  %v4204_v17 = vsub.f32 0.0, %v4188_v37  ;;  %v4576_v13 = vmul.f32 1.0614054, %v8797_v55  ;;  %v4575_v22 = vmul.f32 1.0614054, %v8772_v59 }
0x1495   : > { %v2847_v3 = vsub.f32 %v9412_v12, %v8918_v9  ;;  %v9413_v1 = vpack.c.bf16 %v8764_v51, %v8762_v52  ;;  %v4229_v14 = vmul.f32 %v4221_v40, %v8635_v23  ;;  %v4596_v43 = vadd.f32 1.4214138, %v4588_v46 }
0x1496   : > { %6156 = vmatpush3.bf16.msra.mxu1 %v9411_v47  ;;  %v4598_v16 = vadd.f32 1.4214138, %v4590_v19  ;;  %v4589_v34 = vmul.f32 %v8733_v30, %v4581_v44  ;;  %v4212_v54 = vsel %vm4196_vm15, %v4204_v17, %v4188_v37  ;;  %v4584_v4 = vadd.f32 -1.4531521, %v4576_v13 }
0x1497   : > { %6158 = vmatprep.subr.bf16.mxu1 %v9413_v1  ;;  %v4583_v20 = vadd.f32 -1.4531521, %v4575_v22  ;;  %v4578_v27 = vmul.f32 1.0614054, %v8815_v33  ;;  %4346 = vmatmul.mubr.f32.gmra.mrb[46].mxu1 %v4226_v57  ;;  %v4220_v5 = vadd.f32 1.0, %v4212_v54  ;;  %v4604_v49 = vmul.f32 %v8726_v58, %v4596_v43  ;;  %v9419_v1 = vld [vmem:[#allocation62_spill] sm:$0xff] }
0x1498   : > { %v4606_v52 = vmul.f32 %v8748_v35, %v4598_v16  ;;  %v4597_v51 = vadd.f32 1.4214138, %v4589_v34  ;;  %v9414_v23 = vpack.c.bf16 %v8783_v50, %v8781_v53  ;;  %4350 = vmatprep.mubr.f32.mxu1 %v4229_v14  ;;  %v4592_v39 = vmul.f32 %v8797_v55, %v4584_v4  ;;  %v9420_v14 = vld [vmem:[#allocation53_spill] sm:$0xff]  ;;  %v4762_v16 = vld [vmem:[#allocation20 + $0x3f0] sm:$0xff]  ;;  %v4763_v34 = vld [vmem:[#allocation20 + $0x3f8] sm:$0xff] }
0x1499   : > { %v4591_v63 = vmul.f32 %v8772_v59, %v4583_v20  ;;  %v4586_v48 = vadd.f32 -1.4531521, %v4578_v27  ;;  %v4577_v45 = vmul.f32 1.0614054, %v8810_v41  ;;  %v4228_v60 = vmul.f32 %v4220_v5, %v8632_v38  ;;  %v9422_v5 = vld [vmem:[#allocation57_spill] sm:$0xff] }
0x149a   : > { %6160 = vmatpush3.bf16.msra.mxu1 %v9414_v23  ;;  %v9415_v26 = vpack.c.bf16 %v8795_v2, %v8793_v0  ;;  %v4612_v42 = vadd.f32 -0.28449672, %v4604_v49  ;;  %v4614_v8 = vadd.f32 -0.28449672, %v4606_v52  ;;  %v4605_v7 = vmul.f32 %v8733_v30, %v4597_v51  ;;  %v9424_v49 = vld [vmem:[#allocation70_spill] sm:$0xff]  ;;  %v4747_v52 = vld [vmem:[#allocation20 + $0x378] sm:$0xff] }
0x149b   : > { %v4600_v53 = vadd.f32 1.4214138, %v4592_v39  ;;  %v4599_v50 = vadd.f32 1.4214138, %v4591_v63  ;;  %v4594_v18 = vmul.f32 %v8815_v33, %v4586_v48  ;;  %v4585_v9 = vadd.f32 -1.4531521, %v4577_v45  ;;  %4351 = vmatmul.mubr.f32.gmra.mrb[48].mxu1 %v4228_v60 }
0x149c   : > { %6162 = vmatprep.subr.bf16.mxu1 %v9415_v26  ;;  %v4620_v36 = vmul.f32 %v8726_v58, %v4612_v42  ;;  %v4622_v21 = vmul.f32 %v8748_v35, %v4614_v8  ;;  %v4613_v57 = vadd.f32 -0.28449672, %v4605_v7  ;;  %v2855_v38 = vmul.f32 1.442695, %v2848_v11  ;;  %v9426_v51 = vld [vmem:[#allocation45_spill] sm:$0xff]  ;;  %v9427_v39 = vld [vmem:[#allocation46_spill] sm:$0xff] }
0x149d   : > { %v9416_v2 = vpack.c.bf16 %v8805_v6, %v8803_v29  ;;  %v4608_v0 = vmul.f32 %v8797_v55, %v4600_v53  ;;  %v4607_v61 = vmul.f32 %v8772_v59, %v4599_v50  ;;  %v4602_v37 = vadd.f32 1.4214138, %v4594_v18  ;;  %v9418_v29 = vld [vmem:[#allocation56_spill] sm:$0xff] }
0x149e   : > { %v4593_v40 = vmul.f32 %v8810_v41, %v4585_v9  ;;  %v9417_v46 = vpack.c.bf16 %v8822_v25, %v8820_v31  ;;  %v4628_v19 = vadd.f32 0.2548296, %v4620_v36  ;;  %v4630_v44 = vadd.f32 0.2548296, %v4622_v21  ;;  %v9428_v50 = vld [vmem:[#allocation44_spill] sm:$0xff]  ;;  %v9429_v9 = vld [vmem:[#allocation58_spill] sm:$0xff] }
0x149f   : > { %6164 = vmatpush3.bf16.msra.mxu1 %v9416_v2  ;;  %v4621_v47 = vmul.f32 %v8733_v30, %v4613_v57  ;;  %6683 = vpow2.f32 %v2855_v38  ;;  %vm4694_vm1 = vcmp.lt.f32.partialorder %v9418_v29, 0.0  ;;  %v4616_v6 = vadd.f32 -0.28449672, %v4608_v0  ;;  %v9430_v36 = vld [vmem:[#allocation71_spill] sm:$0xff] }
0x14a0   : > { %6166 = vmatprep.subr.bf16.mxu1 %v9417_v46  ;;  %v4615_v11 = vadd.f32 -0.28449672, %v4607_v61  ;;  %v4610_v17 = vmul.f32 %v8815_v33, %v4602_v37  ;;  %v4601_v13 = vadd.f32 1.4214138, %v4593_v40  ;;  %v4636_v22 = vmul.f32 %v8726_v58, %v4628_v19  ;;  %v9423_v58 = vld [vmem:[#allocation69_spill] sm:$0xff] }
0x14a1   : > { %v4638_v12 = vmul.f32 %v8748_v35, %v4630_v44  ;;  %v4629_v31 = vadd.f32 0.2548296, %v4621_v47  ;;  %v2853_v25 = vmul.f32 1.442695, %v2847_v3  ;;  %v9421_v43 = vpack.c.bf16 %v9419_v1, %v9420_v14  ;;  %v4746_v3 = vld [vmem:[#allocation20 + $0x370] sm:$0xff]  ;;  %v9432_v46 = vld [vmem:[#allocation49_spill] sm:$0xff] }
0x14a2   : > { %v4624_v54 = vmul.f32 %v8797_v55, %v4616_v6  ;;  %v4623_v4 = vmul.f32 %v8772_v59, %v4615_v11  ;;  %v4618_v20 = vadd.f32 -0.28449672, %v4610_v17  ;;  %v4609_v27 = vmul.f32 %v8810_v41, %v4601_v13  ;;  %v9433_v44 = vld [vmem:[#allocation50_spill] sm:$0xff] }
0x14a3   : > { %6168 = vmatpush3.bf16.msra.mxu1 %v9421_v43  ;;  %vm4693_vm2 = vcmp.lt.f32.partialorder %v9422_v5, 0.0  ;;  %v9425_v35 = vpack.c.bf16 %v9423_v58, %v9424_v49  ;;  %v4676_v23 = vmul.f32 %v9426_v51, %v4636_v22  ;;  %v4678_v63 = vmul.f32 %v9427_v39, %v4638_v12  ;;  %v9441_v49 = vld [vmem:[#allocation47_spill] sm:$0xff] }
0x14a4   : > { %v4637_v48 = vmul.f32 %v8733_v30, %v4629_v31  ;;  %6685 = vpow2.f32 %v2853_v25  ;;  %v4632_v45 = vadd.f32 0.2548296, %v4624_v54  ;;  %v4631_v60 = vadd.f32 0.2548296, %v4623_v4  ;;  %v2862_v25 = vpop.xlane.xlu1 %2861  ;;  %v9439_v54 = vld [vmem:[#allocation75_spill] sm:$0xff] }
0x14a5   : > { %6170 = vmatprep.subr.bf16.mxu1 %v9425_v35  ;;  %v4626_v26 = vmul.f32 %v8815_v33, %v4618_v20  ;;  %v4617_v42 = vadd.f32 -0.28449672, %v4609_v27  ;;  %v6177_v8 = vpack.c.bf16 %v4763_v34, %v4762_v16  ;;  %v4684_v7 = vsub.f32 1.0, %v4676_v23  ;;  %v9438_v34 = vld [vmem:[#allocation60_spill] sm:$0xff]  ;;  %v9440_v27 = vld [vmem:[#allocation54_spill] sm:$0xff] }
0x14a6   : > { %v4686_v53 = vsub.f32 1.0, %v4678_v63  ;;  %v4677_v18 = vmul.f32 %v9428_v50, %v4637_v48  ;;  %v9431_v21 = vpack.c.bf16 %v9429_v9, %v9430_v36  ;;  %v4640_v57 = vmul.f32 %v8797_v55, %v4632_v45  ;;  %v9442_v63 = vld [vmem:[#allocation43_spill] sm:$0xff]  ;;  %v9443_v45 = vld [vmem:[#allocation73_spill] sm:$0xff]  ;;  %v9445_v9 = vld [vmem:[#allocation74_spill] sm:$0xff] }
0x14a7   : > { %v4639_v38 = vmul.f32 %v8772_v59, %v4631_v60  ;;  %v4634_v30 = vadd.f32 0.2548296, %v4626_v26  ;;  %v4625_v2 = vmul.f32 %v8810_v41, %v4617_v42  ;;  %v6179_v0 = vpack.c.bf16 %v4747_v52, %v4746_v3  ;;  %v2859_v26 = vpop.xlane.xlu0 %2858  ;;  %v9444_v42 = vld [vmem:[#allocation55_spill] sm:$0xff] }
0x14a8   : > { %6172 = vmatpush3.bf16.msra.mxu1 %v9431_v21  ;;  %v4700_v61 = vsub.f32 0.0, %v4684_v7  ;;  %v4702_v37 = vsub.f32 0.0, %v4686_v53  ;;  %v4685_v40 = vsub.f32 1.0, %v4677_v18  ;;  %v4680_v19 = vmul.f32 %v9432_v46, %v4640_v57  ;;  %v9446_v57 = vld [vmem:[#allocation63_spill] sm:$0xff] }
0x14a9   : > { %6174 = vmatprep.subr.bf16.mxu1 %v6173_v10  ;;  %v4679_v47 = vmul.f32 %v9433_v44, %v4639_v38  ;;  %v4642_v6 = vmul.f32 %v8815_v33, %v4634_v30  ;;  %v4633_v55 = vadd.f32 0.2548296, %v4625_v2  ;;  %v8999_v11 = vpop.eup %6683  ;;  %v7183_v12 = vmov 0   ;;  %v9434_v33 = vld [vmem:[#allocation39_spill] sm:$0xff]  ;;  %v9447_v2 = vld [vmem:[#allocation40_spill] sm:$0xff] }
0x14aa   : > { %v4708_v59 = vsel %vm4692_vm0, %v4700_v61, %v4684_v7  ;;  %v4710_v28 = vsel %vm4694_vm1, %v4702_v37, %v4686_v53  ;;  %v4701_v24 = vsub.f32 0.0, %v4685_v40  ;;  %v4688_v13 = vsub.f32 1.0, %v4680_v19  ;;  %6458 = vset.pattern.permute.xlu1 %v7183_v12  ;;  %6457 = vset.pattern.permute.xlu0 %v7183_v12  ;;  %v9448_v19 = vld [vmem:[#allocation59_spill] sm:$0xff] }
0x14ab   : > { %v4716_v10 = vadd.f32 1.0, %v4708_v59  ;;  %v4718_v17 = vadd.f32 1.0, %v4710_v28  ;;  %v4687_v22 = vsub.f32 1.0, %v4679_v47  ;;  %vm4695_vm3 = vcmp.lt.f32.partialorder %v9434_v33, 0.0  ;;  %v9450_v28 = vld [vmem:[#allocation38_spill] sm:$0xff] }
0x14ac   : > { %6176 = vmatpush3.bf16.msra.mxu1 %v6175_v32  ;;  %v4682_v31 = vmul.f32 %v9435_v56, %v4642_v6  ;;  %v4641_v29 = vmul.f32 %v8810_v41, %v4633_v55  ;;  %v2866_v1 = vsel %vm2832_vm5, %v8999_v11, 0.0  ;;  %v9436_v32 = vld [vmem:[#allocation42_spill] sm:$0xff]  ;;  %v4709_v14 = vsel %vm4693_vm2, %v4701_v24, %v4685_v40  ;;  %v9449_v6 = vld [vmem:[#allocation37_spill] sm:$0xff] }
0x14ad   : > { %6178 = vmatprep.subr.bf16.mxu1 %v6177_v8  ;;  %vm4696_vm4 = vcmp.lt.f32.partialorder %v9436_v32, 0.0  ;;  %v4724_v62 = vmul.f32 %v4716_v10, %v9437_v15  ;;  %v4704_v43 = vsub.f32 0.0, %v4688_v13  ;;  %2867 = vadd.xlane.f32.xlu1 %v2866_v1  ;;  %v4723_v41 = vmul.f32 %v9439_v54, %v9438_v34 }
0x14ae   : > { %v9019_v16 = vpop.eup %6685  ;;  %v4703_v4 = vsub.f32 0.0, %v4687_v22  ;;  %v4690_v20 = vsub.f32 1.0, %v4682_v31  ;;  %v4681_v58 = vmul.f32 %v9440_v27, %v4641_v29  ;;  %v4726_v35 = vmul.f32 %v4718_v17, %v9441_v49  ;;  %v5178_v27 = vld [vmem:[#allocation22 + $0x1] ss:$0 sm:$0xff]  ;;  %v9046_v49 = vld [vmem:[#allocation22] ss:$0 sm:$0xff] }
0x14af   : > { %4836 = vmatprep.mubr.f32.mxu1 %v4724_v62  ;;  %v4712_v3 = vsel %vm4696_vm4, %v4704_v43, %v4688_v13  ;;  %6687 = vrcp.f32 %v2862_v25  ;;  %v2863_v5 = vsel %vm2832_vm5, %v9019_v16, 0.0  ;;  %v4717_v52 = vadd.f32 1.0, %v4709_v14 }
0x14b0   : > { %6180 = vmatpush3.bf16.msra.mxu1 %v6179_v0  ;;  %v4720_v51 = vadd.f32 1.0, %v4712_v3  ;;  %v4706_v23 = vsub.f32 0.0, %v4690_v20  ;;  %v4689_v39 = vsub.f32 1.0, %v4681_v58  ;;  %2864 = vadd.xlane.f32.xlu0 %v2863_v5  ;;  %v4520_v48 = vmul.f32 0.5, %v9442_v63 }
0x14b1   : > { %vm4698_vm6 = vcmp.lt.f32.partialorder %v9443_v45, 0.0  ;;  %v4711_v60 = vsel %vm4695_vm3, %v4703_v4, %v4687_v22  ;;  %v4517_v8 = vmul.f32 0.5, %v9444_v42  ;;  %vm4697_vm5 = vcmp.lt.f32.partialorder %v9445_v9, 0.0  ;;  %v9452_v45 = vld [vmem:[#allocation52_spill] sm:$0xff] }
0x14b2   : > { %v4714_v7 = vsel %vm4698_vm6, %v4706_v23, %v4690_v20  ;;  %v4705_v53 = vsub.f32 0.0, %v4689_v39  ;;  %v4728_v50 = vmul.f32 %v4720_v51, %v4520_v48  ;;  %v4719_v21 = vadd.f32 1.0, %v4711_v60  ;;  %v9451_v23 = vld [vmem:[#allocation51_spill] sm:$0xff] }
0x14b3   : > { %4837 = vmatmul.mubr.f32.vlgmr.msra.gmra.mrb[50].mxu1 %v4723_v41  ;;  %v4722_v18 = vadd.f32 1.0, %v4714_v7  ;;  %v4725_v36 = vmul.f32 %v4717_v52, %v4517_v8  ;;  %6689 = vrcp.f32 %v2859_v26  ;;  %v4522_v38 = vmul.f32 0.5, %v9446_v57 }
0x14b4   : > { %4841 = vmatprep.mubr.f32.mxu1 %v4726_v35  ;;  %v4713_v30 = vsel %vm4697_vm5, %v4705_v53, %v4689_v39  ;;  %v4519_v0 = vmul.f32 0.5, %v9447_v2  ;;  %v4521_v44 = vmul.f32 0.5, %v9448_v19  ;;  %v7184_v10 = vmov 1  }
0x14b5   : > { %v4730_v61 = vmul.f32 %v4722_v18, %v4522_v38  ;;  %v4721_v40 = vadd.f32 1.0, %v4713_v30  ;;  %v7185_v17 = vmov 2   ;;  %v7186_v13 = vmov 3  }
0x14b6   : > { %v4727_v37 = vmul.f32 %v4719_v21, %v4519_v0  ;;  %v3332_v39 = vadd.f32 %v9451_v23, %v9046_v49  ;;  %v3337_v60 = vadd.f32 %v9452_v45, %v9046_v49  ;;  %v5179_v0 = vld [vmem:[#allocation22 + $0x2] ss:$0 sm:$0xff] }
0x14b7   : > { %4842 = vmatmul.mubr.f32.gmra.mrb[52].mxu1 %v4725_v36  ;;  %v4729_v47 = vmul.f32 %v4721_v40, %v4521_v44 }
0x14b8   : > { %4846 = vmatprep.mubr.f32.mxu1 %v4728_v50 }
0x14b9   : > { %v6688_v46 = vpop.eup %6687 }
0x14ba   : > { %v2874_v55 = vmul.f32 %v6688_v46, %v9449_v6 }
0x14bb   : > { %4847 = vmatmul.mubr.f32.gmra.mrb[54].mxu1 %v4727_v37 }
0x14bc   : > { %4851 = vmatprep.mubr.f32.mxu1 %v4730_v61 }
0x14bd   : > { %v6690_v59 = vpop.eup %6689 }
0x14be   : > { %3357 = vperm.xlu1 %6458, %v2874_v55   ;;  %v2873_v24 = vmul.f32 %v6690_v59, %v9450_v28 }
0x14bf   : > { %4852 = vmatmul.mubr.f32.gmra.mrb[56].mxu1 %v4729_v47 }
0x14c2   : > { %6459 = vset.pattern.permute.xlu1 %v7184_v10 }
0x14c3   : > { %3856 = vperm.xlu1 %6459, %v2873_v24  }
0x14c6   : > { %3352 = vperm.xlu0 %6457, %v2873_v24  }
0x14c7   : > { %3860 = vperm.xlu1 %6459, %v2874_v55  }
0x14ca   : > { %6461 = vset.pattern.permute.xlu0 %v7185_v17 }
0x14cb   : > { %4361 = vperm.xlu0 %6461, %v2874_v55   ;;  %6460 = vset.pattern.permute.xlu1 %v7185_v17 }
0x14cc   : > { %4357 = vperm.xlu1 %6460, %v2873_v24  }
0x14cf   : > { %6462 = vset.pattern.permute.xlu0 %v7186_v13 }
0x14d0   : > { %4858 = vperm.xlu0 %6462, %v2873_v24   ;;  %6463 = vset.pattern.permute.xlu1 %v7186_v13 }
0x14d1   : > { %4862 = vperm.xlu1 %6463, %v2874_v55  }
0x14d5   : > { %6464 = vset.pattern.permute.xlu1 %v7183_v12 }
0x1515   : > { %v5353_v22 = vpop.f32.mrb[30].mxu1 }
0x1516   : > { %v5354_v33 = vpop.f32.mrb[31].mxu1 }
0x1517   : > { %v9042_v56 = vadd.f32 %v5354_v33, %v5353_v22 }
0x1519   : > { %v5356_v31 = vpop.f32.mrb[32].mxu1 }
0x151a   : > { %v5357_v29 = vpop.f32.mrb[33].mxu1 }
0x151b   : > { %v9044_v25 = vadd.f32 %v5357_v29, %v5356_v31 }
0x151d   : > { %v5391_v1 = vpop.f32.mrb[34].mxu1 }
0x151e   : > { %v5392_v32 = vpop.f32.mrb[35].mxu1 }
0x151f   : > { %v5393_v15 = vadd.f32 %v5392_v32, %v5391_v1  ;;  %v5180_v1 = vld [vmem:[#allocation22 + $0x3] ss:$0 sm:$0xff] }
0x1521   : > { %v3837_v35 = vadd.f32 %v5393_v15, %v5178_v27 }
0x1522   : > { %v5394_v62 = vpop.f32.mrb[36].mxu1 }
0x1523   : > { %v5395_v14 = vpop.f32.mrb[37].mxu1 }
0x1524   : > { %v5396_v43 = vadd.f32 %v5395_v14, %v5394_v62 }
0x1526   : > { %v3842_v42 = vadd.f32 %v5396_v43, %v5178_v27 }
0x152e   : > { %v5397_v34 = vpop.f32.mrb[38].mxu1 }
0x152f   : > { %v5398_v54 = vpop.f32.mrb[39].mxu1 }
0x1530   : > { %v5399_v41 = vadd.f32 %v5398_v54, %v5397_v34 }
0x1532   : > { %v9048_v5 = vadd.f32 %v5399_v41, %v5178_v27 }
0x153a   : > { %v2868_v4 = vpop.xlane.xlu1 %2867 }
0x153b   : > { %6691 = vrcp.f32 %v2868_v4 }
0x153d   : > { %v2865_v58 = vpop.xlane.xlu0 %2864 }
0x153e   : > { %v3358_v20 = vpop.permute.xlu1 %3357  ;;  %6693 = vrcp.f32 %v2865_v58 }
0x153f   : > { %v5400_v52 = vpop.f32.mrb[40].mxu1  ;;  %v3371_v18 = vmul.f32 %v3358_v20, %v3337_v60  ;;  %v9454_v60 = vld [vmem:[#allocation33_spill] sm:$0xff] }
0x1540   : > { %v5401_v48 = vpop.f32.mrb[41].mxu1 }
0x1541   : > { %v5402_v8 = vadd.f32 %v5401_v48, %v5400_v52 }
0x1542   : > { %v3857_v3 = vpop.permute.xlu1 %3856 }
0x1543   : > { %v3871_v51 = vmul.f32 %v3857_v3, %v3837_v35  ;;  %v9055_v21 = vadd.f32 %v5402_v8, %v5178_v27  ;;  %v9453_v3 = vld [vmem:[#allocation34_spill] sm:$0xff] }
0x1545   : > { %v6692_v63 = vpop.eup %6691  ;;  %v3353_v26 = vpop.permute.xlu0 %3352 }
0x1546   : > { %v3370_v7 = vmul.f32 %v3353_v26, %v3332_v39  ;;  %v3861_v53 = vpop.permute.xlu1 %3860  ;;  %v2876_v50 = vmul.f32 %v6692_v63, %v8999_v11 }
0x1547   : > { %v3872_v9 = vmul.f32 %v3861_v53, %v3842_v42  ;;  %v3347_v53 = vadd.f32 %v9044_v25, %v9046_v49  ;;  %v3342_v25 = vadd.f32 %v9042_v56, %v9046_v49  ;;  %v9457_v56 = vld [vmem:[#allocation35_spill] sm:$0xff] }
0x1548   : > { %v3875_v36 = vadd.f32 %v3871_v51, %v3370_v7  ;;  %3367 = vperm.xlu1 %6464, %v2876_v50   ;;  %4870 = vperm.xlu0 %6462, %v2876_v50   ;;  %v6694_v38 = vpop.eup %6693 }
0x1549   : > { %v3876_v57 = vadd.f32 %v3872_v9, %v3371_v18  ;;  %v2875_v30 = vmul.f32 %v6694_v38, %v9019_v16 }
0x154b   : > { %v4358_v37 = vpop.permute.xlu1 %4357 }
0x154c   : > { %6465 = vset.pattern.permute.xlu1 %v7184_v10 }
0x154d   : > { %3868 = vperm.xlu1 %6465, %v2876_v50  }
0x1550   : > { %v4863_v58 = vpop.permute.xlu1 %4862 }
0x1551   : > { %6466 = vset.pattern.permute.xlu1 %v7185_v17 }
0x1552   : > { %4369 = vperm.xlu1 %6466, %v2876_v50  }
0x1556   : > { %6467 = vset.pattern.permute.xlu1 %v7183_v12  ;;  %v4362_v12 = vpop.permute.xlu0 %4361 }
0x1557   : > { %3362 = vperm.xlu1 %6467, %v2875_v30  }
0x155a   : > { %v4859_v43 = vpop.permute.xlu0 %4858 }
0x155b   : > { %6468 = vset.pattern.permute.xlu1 %v7184_v10 }
0x155c   : > { %3864 = vperm.xlu1 %6468, %v2875_v30  }
0x1560   : > { %6469 = vset.pattern.permute.xlu1 %v7185_v17 }
0x1561   : > { %4365 = vperm.xlu1 %6469, %v2875_v30  }
0x1562   : > { %v5435_v11 = vpop.f32.mrb[42].mxu1 }
0x1563   : > { %v5436_v2 = vpop.f32.mrb[43].mxu1 }
0x1564   : > { %v5437_v61 = vadd.f32 %v5436_v2, %v5435_v11 }
0x1565   : > { %6470 = vset.pattern.permute.xlu1 %v7186_v13 }
0x1566   : > { %4866 = vperm.xlu1 %6470, %v2875_v30   ;;  %v5438_v40 = vpop.f32.mrb[44].mxu1  ;;  %v4338_v46 = vadd.f32 %v5437_v61, %v5179_v0 }
0x1567   : > { %v5439_v19 = vpop.f32.mrb[45].mxu1 }
0x1568   : > { %v5440_v16 = vadd.f32 %v5439_v19, %v5438_v40  ;;  %v4372_v44 = vmul.f32 %v4358_v37, %v4338_v46  ;;  %v9455_v37 = vld [vmem:[#allocation36_spill] sm:$0xff] }
0x156a   : > { %v5441_v47 = vpop.f32.mrb[46].mxu1  ;;  %v4343_v6 = vadd.f32 %v5440_v16, %v5179_v0  ;;  %v4376_v55 = vadd.f32 %v4372_v44, %v3875_v36 }
0x156b   : > { %v5442_v59 = vpop.f32.mrb[47].mxu1 }
0x156c   : > { %v5443_v28 = vadd.f32 %v5442_v59, %v5441_v47  ;;  %v4373_v24 = vmul.f32 %v4362_v12, %v4343_v6 }
0x156e   : > { %v5444_v10 = vpop.f32.mrb[48].mxu1  ;;  %v4377_v17 = vadd.f32 %v4373_v24, %v3876_v57  ;;  %v4348_v13 = vadd.f32 %v5443_v28, %v5179_v0 }
0x156f   : > { %v5445_v22 = vpop.f32.mrb[49].mxu1 }
0x1570   : > { %v5446_v33 = vadd.f32 %v5445_v22, %v5444_v10 }
0x1572   : > { %v4353_v31 = vadd.f32 %v5446_v33, %v5179_v0 }
0x1586   : > { %v5479_v29 = vpop.f32.mrb[50].mxu1 }
0x1587   : > { %v5480_v32 = vpop.f32.mrb[51].mxu1 }
0x1588   : > { %v5481_v15 = vadd.f32 %v5480_v32, %v5479_v29 }
0x158a   : > { %v4839_v62 = vadd.f32 %v5481_v15, %v5180_v1  ;;  %v5482_v14 = vpop.f32.mrb[52].mxu1 }
0x158b   : > { %v5483_v34 = vpop.f32.mrb[53].mxu1 }
0x158c   : > { %v4873_v54 = vmul.f32 %v4859_v43, %v4839_v62  ;;  %v5484_v41 = vadd.f32 %v5483_v34, %v5482_v14 }
0x158e   : > { %v4877_v4 = vadd.f32 %v4873_v54, %v4376_v55  ;;  %v4844_v20 = vadd.f32 %v5484_v41, %v5180_v1  ;;  %v5485_v27 = vpop.f32.mrb[54].mxu1 }
0x158f   : > { %v5486_v35 = vpop.f32.mrb[55].mxu1 }
0x1590   : > { %v4881_v52 = vadd.f32 %v4877_v4, %v9453_v3  ;;  %v4874_v51 = vmul.f32 %v4863_v58, %v4844_v20  ;;  %v5487_v23 = vadd.f32 %v5486_v35, %v5485_v27 }
0x1592   : > { %4885 = vst [vmem:[%s9066_s5] sm:$0xff] %v4881_v52  ;;  %v4878_v39 = vadd.f32 %v4874_v51, %v4377_v17  ;;  %v5488_v63 = vpop.f32.mrb[56].mxu1  ;;  %v4849_v48 = vadd.f32 %v5487_v23, %v5180_v1 }
0x1593   : > { %v5489_v45 = vpop.f32.mrb[57].mxu1 }
0x1594   : > { %v4882_v26 = vadd.f32 %v4878_v39, %v9454_v60  ;;  %v5490_v42 = vadd.f32 %v5489_v45, %v5488_v63 }
0x1596   : > { %4886 = vst [vmem:[%s9066_s5 + $0x8] sm:$0xff] %v4882_v26  ;;  %v4854_v8 = vadd.f32 %v5490_v42, %v5180_v1 }
0x15c7   : > { %v3368_v7 = vpop.permute.xlu1 %3367  ;;  %v4871_v57 = vpop.permute.xlu0 %4870 }
0x15c8   : > { %v3373_v18 = vmul.f32 %v3368_v7, %v3347_v53  ;;  %v4876_v11 = vmul.f32 %v4871_v57, %v4854_v8 }
0x15cc   : > { %v3869_v50 = vpop.permute.xlu1 %3868 }
0x15cd   : > { %v3874_v9 = vmul.f32 %v3869_v50, %v9055_v21 }
0x15cf   : > { %v3878_v36 = vadd.f32 %v3874_v9, %v3373_v18 }
0x15d1   : > { %v4370_v38 = vpop.permute.xlu1 %4369 }
0x15d2   : > { %v4375_v30 = vmul.f32 %v4370_v38, %v4353_v31 }
0x15d4   : > { %v4379_v2 = vadd.f32 %v4375_v30, %v3878_v36 }
0x15d6   : > { %v4880_v0 = vadd.f32 %v4876_v11, %v4379_v2  ;;  %v3363_v61 = vpop.permute.xlu1 %3362 }
0x15d7   : > { %v3372_v21 = vmul.f32 %v3363_v61, %v3342_v25 }
0x15d8   : > { %v4884_v40 = vadd.f32 %v4880_v0, %v9455_v37 }
0x15da   : > { %4888 = vst [vmem:[%s9066_s5 + $0x18] sm:$0xff] %v4884_v40 }
0x15db   : > { %v3865_v46 = vpop.permute.xlu1 %3864 }
0x15dc   : > { %v3873_v19 = vmul.f32 %v3865_v46, %v9048_v5 }
0x15de   : > { %v3877_v16 = vadd.f32 %v3873_v19, %v3372_v21 }
0x15e0   : > { %v4366_v44 = vpop.permute.xlu1 %4365 }
0x15e1   : > { %v4374_v12 = vmul.f32 %v4366_v44, %v4348_v13 }
0x15e3   : > { %v4378_v47 = vadd.f32 %v4374_v12, %v3877_v16 }
0x15e5   : > { %v4867_v6 = vpop.permute.xlu1 %4866 }
0x15e6   : > { %v4875_v55 = vmul.f32 %v4867_v6, %v4849_v48 }
0x15e8   : > { %v4879_v59 = vadd.f32 %v4875_v55, %v4378_v47 }
0x15ea   : > { %v4883_v49 = vadd.f32 %v4879_v59, %v9457_v56 }
0x15ec   : > { %4887 = vst [vmem:[%s9066_s5 + $0x10] sm:$0xff] %v4883_v49 }
0x15ed   : > { %7078 = shalt.err (!%p7075_p9)
}
0x15ee   : > { %s7079_s3 = scalar_lea.hbm %s9084_s9, 512  ;;  %s7083_s5 = scalar_lea.hbm %s9456_s22, 1024 }
0x15ef   : > { %p7080_p7 = scmp.ne.s32.totalorder %s9084_s9, %s7079_s3  ;;  %p7084_p1 = scmp.lt.u32.totalorder %s9084_s9, %s9456_s22 }
0x15f0   : > { %p7085_p13 = scmp.lt.u32.totalorder %s7083_s5, %s7079_s3  ;;  %p7087_p2 = scmp.lt.u32.totalorder %s7079_s3, %s9084_s9 }
0x15f1   : > { %p7081_p10 = pnand %p7080_p7, %p9458_p8 }
0x15f2   : > { %p7086_p0 = por %p7085_p13, %p7084_p1 }
0x15f3   : > { %p7082_p4 = pneg %p7081_p10 }
0x15f4   : > { %p7088_p6 = por %p7087_p2, %p7086_p0 }
0x15f6   : > { %p7089_p11 = pnand %p7088_p6, %p7082_p4 }
0x15f8   : > { %7092 = shalt.err (!%p7089_p11)
}
0x15f9   : > { %s7188_s7 = smov 128   ;;  %s7189_s17 = smov 8  }
0x15fa   : > { %6231 = dma.vmem_to_hbm [thread:$0]  (%p9458_p8), %s9086_s20, 512, %s9084_s9, %s4890_s21, %s7188_s7, %s7188_s7, %s7189_s17  }
0x15fb PF: > { %s4919_s14 = sand.u32 1, %s7143_s25   ;;  %p9459_p12 = scmp.ne.s32.totalorder %s9249_s1, 0 }
0x15fc   : > { %p9460_p3 = scmp.ge.s32.totalorder %s7155_s28, 2  ;;  %s4920_s18 = scalar_lea.sflag [#allocation4], %s4919_s14 }
0x15fe   : > { %p6275_p5 = pnand %p9460_p3, %p9459_p12 }
0x1600   : > { %7138 = dma.done.wait (!%p6275_p5), %s4920_s18, 512  }
0x1601   : > { %7140 = vsyncadd (!%p6275_p5), %s4920_s18, 4294966784  ;;  %p32_p9 = scmp.ge.s32.totalorder %s7559_s16, 4   ;;  %s9461_s25 = smov %s7147_s26 }
0x1602   : > { %s9462_s26 = smov %s7151_s27  ;;  %s9463_s27 = smov %s7571_s30 }
0x1603   : > { %s9464_s28 = smov %s7559_s16  ;;  %34 = sbr.rel (!%p32_p9) target bundleno = 20 (0x14), region = 177 }
0x160a   :  { %4925 = vsyncpa [#allocation3], 1 }
0x160b   :  { %4927 = vsyncpa [#allocation3 + $0x1], 1 }
0x160c   :  { %4928 = vsyncpa [#allocation6], 1 }
0x160d   :  { %4929 = vsyncpa [#allocation9], 1 }
0x160e   :  { %4930 = vsyncpa [#allocation12], 1 }
0x160f   :  { %4931 = vsyncpa [#allocation15], 1 }
0x1610   :  { %4932 = vsyncpa [#allocation18], 1 }
0x1611   :  { %4933 = vsyncpa [#allocation21], 1 }
0x1612   :  { %4934 = vsyncpa [#allocation4], 1 }
0x1613   :  { %4936 = vsyncpa [#allocation4 + $0x1], 1 }

</bundles_post_ra>
